<compile_context>
chip_gen: v5e
topology: v5e:2x2
jax: 0.10.0
libtpu: 0.0.40
codegen_flags: <defaults>
</compile_context>

<pallas_src>
import functools

import jax
import jax.numpy as jnp
from jax.experimental import pallas as pl
from jax.experimental.pallas import tpu as pltpu


def _round_up(v, m):
    return (v + m - 1) // m * m


# ---------------------------------------------------------------------------
# Small-channel path: pure VPU (the MXU cannot be fed at Cin=4 / Cout=2).
# ---------------------------------------------------------------------------
def _ppm_vpu_kernel(x_ref, w_ref, b_ref, *o_refs, H, W, dila, d_max, cin, cout):
    """All PPM branches for one batch element, computed on the VPU.

    x_ref:  (1, Cin, Hp, WL) f32 -- input zero-padded to the max dilation;
                                    width sits on the lane axis (lane-dense
                                    VMEM block, no Cin->128 inflation).
    w_ref:  (B*Cout*Cin*9,)  f32 -- SMEM, BN scale folded, [b][co][ci][ky][kx].
    b_ref:  (B*Cout,)        f32 -- SMEM, folded BN bias.
    o_refs: B x (1, Cout*H, W)   -- per-branch outputs; wrapper reshape to
                                    (N, Cout, H, W) is a free view.
    """
    for b, d in enumerate(dila):
        accs = [jnp.zeros((H, W), jnp.float32) for _ in range(cout)]
        for ky in range(3):
            row_off = ky * d + (d_max - d)          # static
            for kx in range(3):
                col_off = kx * d + (d_max - d)      # static
                for ci in range(cin):
                    # Shifted tap window: a (H, W) slice of the padded plane.
                    slab = x_ref[0, ci, pl.ds(row_off, H), pl.ds(col_off, W)]
                    for co in range(cout):
                        w = w_ref[(((b * cout + co) * cin + ci) * 3 + ky) * 3 + kx]
                        accs[co] = accs[co] + w * slab
        rows = []
        for co in range(cout):
            y = jnp.maximum(accs[co] + b_ref[b * cout + co], 0.0)
            rows.append(y.astype(o_refs[b].dtype))
        o_refs[b][0] = jnp.concatenate(rows, axis=0)          # (Cout*H, W)


def _ppm_forward_vpu(x_nchw, w_oihw, bias, dila, out_dtype):
    N, Cin, H, W = x_nchw.shape
    B, Cout = w_oihw.shape[0], w_oihw.shape[1]
    d_max = max(dila)
    Hp = H + 2 * d_max
    WL = _round_up(W + 2 * d_max, 128)              # lane-dense padded width

    # NCHW stays NCHW (width already minor); single pad to the max dilation.
    x_pad = jnp.pad(x_nchw.astype(jnp.float32),
                    ((0, 0), (0, 0), (d_max, d_max), (d_max, WL - W - d_max)))
    w_flat = w_oihw.astype(jnp.float32).reshape(-1)  # [b][co][ci][ky][kx]
    b_flat = bias.astype(jnp.float32).reshape(-1)    # [b][co]

    kernel = functools.partial(
        _ppm_vpu_kernel, H=H, W=W, dila=tuple(int(d) for d in dila),
        d_max=d_max, cin=Cin, cout=Cout)

    outs = pl.pallas_call(
        kernel,
        out_shape=tuple(jax.ShapeDtypeStruct((N, Cout * H, W), out_dtype)
                        for _ in range(B)),
        grid_spec=pltpu.PrefetchScalarGridSpec(
            num_scalar_prefetch=0,
            grid=(N,),
            in_specs=[
                pl.BlockSpec((1, Cin, Hp, WL), lambda n: (n, 0, 0, 0)),
                pl.BlockSpec(memory_space=pltpu.MemorySpace.SMEM),
                pl.BlockSpec(memory_space=pltpu.MemorySpace.SMEM),
            ],
            out_specs=tuple(
                pl.BlockSpec((1, Cout * H, W), lambda n: (n, 0, 0))
                for _ in range(B)),
        ),
        compiler_params=pltpu.CompilerParams(
            dimension_semantics=("parallel",)),
    )(x_pad, w_flat, b_flat)

    # (N, Cout*H, W) -> (N, Cout, H, W) is a free view.
    return [o.reshape(N, Cout, H, W) for o in outs]


# ---------------------------------------------------------------------------
# Large-channel path: MXU, tap shifts as free LHS views, one crop per branch.
# ---------------------------------------------------------------------------
def _pick_tile_h_mxu(N, H, W, Cin, Cout, B, wp, hp1):
    """Largest row tile TH dividing H that keeps lane-dense output stores
    (TH*W % 128 == 0, or TH == H), fits a conservative VMEM budget, and when
    possible leaves >= 2 grid steps so both v7x TensorCores get work."""
    budget = 12 * 1024 * 1024
    best = None
    for t in range(H, 0, -1):
        if H % t:
            continue
        if t != H and (t * W) % 128 != 0:
            continue
        vmem = (2 * hp1 * wp * max(Cin, 128) * 2        # input block (dbl-buffered)
                + 2 * B * 9 * Cin * max(Cout, 128) * 2  # folded weights
                + 2 * B * Cout * t * W * 2              # per-branch bf16 outputs
                + 2 * t * wp * max(Cin, Cout) * 4)      # live f32 acc / lhs
        if vmem > budget:
            continue
        if best is None:
            best = t
        if N * (H // t) >= 2:
            return t
    return best if best is not None else H


def _ppm_mxu_kernel(x_ref, w_ref, b_ref, *o_refs, W, wp, TH, dila, d_max):
    """All PPM branches for one (batch, row-tile) grid step on the MXU.

    x_ref:  (1, hp1*wp, Cin) bf16 -- padded input with rows flattened, so each
                                     tap's ky/kx shift is a free pl.ds view of
                                     the matmul LHS (no per-tap result crop).
    w_ref:  (B*9, Cin, Cout) bf16 -- conv taps with BN scale folded in.
    b_ref:  (B, 1, Cout)     f32  -- folded BN bias.
    o_refs: B x (1, Cout, TH*W)   -- lane-dense per-branch outputs.
    """
    cout = w_ref.shape[-1]
    row_base = pl.program_id(1) * TH
    for b, d in enumerate(dila):
        acc = jnp.zeros((TH * wp, cout), jnp.float32)
        for ky in range(3):
            for kx in range(3):
                # Flat element offset of this tap inside the padded image.
                start = (row_base + ky * d + (d_max - d)) * wp \
                    + kx * d + (d_max - d)
                lhs = x_ref[0, pl.ds(start, TH * wp), :]          # (TH*wp, Cin)
                acc = acc + jnp.dot(lhs, w_ref[b * 9 + ky * 3 + kx],
                                    preferred_element_type=jnp.float32)
        # Epilogue ONCE per branch: crop the padded-width frame, bias + ReLU in
        # (pixels, Cout) orientation, a single transpose, lane-dense store.
        yc = acc.reshape(TH, wp, cout)[:, :W, :].reshape(TH * W, cout)
        y = jnp.maximum(yc + b_ref[b], 0.0)
        o_refs[b][0] = y.T.astype(o_refs[b].dtype)


def _ppm_forward_mxu(x_nchw, w_oihw, bias, dila, out_dtype):
    N, Cin, H, W = x_nchw.shape
    B, Cout = w_oihw.shape[0], w_oihw.shape[1]
    d_max = max(dila)
    # Padded width aligned to bf16's sublane packing (16 rows / vreg) so the
    # row flattening / strip views stay layout-preserving.
    wp = _round_up(W + 2 * d_max, 16)
    hp = H + 2 * d_max
    hp1 = hp + 1   # one guard row: the flat LHS view of the last tap of the
                   # last row tile legally over-reads <= 2*d_max zero elements.

    # NCHW -> NHWC bf16 (MXU-native, halves HBM traffic), pad once, flatten the
    # rows so the kernel addresses every tap with a single pl.ds.
    x = jnp.transpose(x_nchw.astype(jnp.bfloat16), (0, 2, 3, 1))
    x_pad = jnp.pad(x, ((0, 0), (d_max, d_max + 1),
                        (d_max, wp - W - d_max), (0, 0)))
    x_flat = x_pad.reshape(N, hp1 * wp, Cin)

    # (B, Cout, Cin, 3, 3) -> (B*9, Cin, Cout), BN scale already folded.
    w_mxu = jnp.transpose(w_oihw, (0, 3, 4, 2, 1)).reshape(B * 9, Cin, Cout)
    w_mxu = w_mxu.astype(jnp.bfloat16)
    b_mxu = bias.reshape(B, 1, Cout).astype(jnp.float32)

    TH = _pick_tile_h_mxu(N, H, W, Cin, Cout, B, wp, hp1)
    n_t = H // TH

    kernel = functools.partial(
        _ppm_mxu_kernel, W=W, wp=wp, TH=TH,
        dila=tuple(int(d) for d in dila), d_max=d_max)

    # TODO(synk): for production-sized inputs on v7x (64 MiB VMEM) tile rows
    # with a halo instead of shipping the whole padded image per batch and/or
    # lower the input/weight specs to pipeline_mode=pl.Buffered(1).
    outs = pl.pallas_call(
        kernel,
        out_shape=tuple(jax.ShapeDtypeStruct((N, Cout, H * W), out_dtype)
                        for _ in range(B)),
        grid_spec=pltpu.PrefetchScalarGridSpec(
            num_scalar_prefetch=0,
            grid=(N, n_t),
            in_specs=[
                # Whole padded image per batch; block index is constant along
                # the row-tile axis -> DMA'd only when n changes.
                pl.BlockSpec((1, hp1 * wp, Cin), lambda n, h: (n, 0, 0)),
                pl.BlockSpec((B * 9, Cin, Cout), lambda n, h: (0, 0, 0)),
                pl.BlockSpec((B, 1, Cout), lambda n, h: (0, 0, 0)),
            ],
            out_specs=tuple(
                pl.BlockSpec((1, Cout, TH * W), lambda n, h: (n, 0, h))
                for _ in range(B)),
        ),
        compiler_params=pltpu.CompilerParams(
            dimension_semantics=("parallel", "parallel")),
    )(x_flat, w_mxu, b_mxu)

    # (N, Cout, H*W) -> (N, Cout, H, W) is a free view.
    return [o.reshape(N, Cout, H, W) for o in outs]


# ---------------------------------------------------------------------------
# Public forward + parameters + reference.
# ---------------------------------------------------------------------------
def ppm_forward(x_nchw, params, out_dtype=jnp.bfloat16):
    """Matches PPM.forward: a list of (N, Cout, H, W) maps, one per dilation."""
    dila = params["dila"]
    w_oihw, bias = params["w_oihw"], params["bias"]
    Cin = x_nchw.shape[1]
    Cout = w_oihw.shape[1]
    # Tiny channel counts cannot feed the 128/256-wide MXU; use the lane-dense
    # VPU formulation there, the MXU path only for wide channels.
    if min(Cin, Cout) >= 64:
        return _ppm_forward_mxu(x_nchw, w_oihw, bias, dila, out_dtype)
    return _ppm_forward_vpu(x_nchw, w_oihw, bias, dila, out_dtype)


def init_ppm_params(key, chnn_in, rd_sc, dila):
    """Deterministic synthetic parameters mirroring PPM.__init__ shapes.

    BatchNorm is folded in inference mode: the scale goes into the conv
    weights, leaving only a per-channel bias for the kernel epilogue.
    """
    chnn = chnn_in // rd_sc
    eps = 1e-5
    ws, bs = [], []
    for i, _ in enumerate(dila):
        kb = jax.random.fold_in(key, i)
        kw, k1, k2, k3, k4 = jax.random.split(kb, 5)
        # PyTorch Conv2d weight shape: (Cout, Cin, 3, 3).
        w_t = 0.1 * jax.random.normal(kw, (chnn, chnn_in, 3, 3), jnp.float32)
        gamma = 1.0 + 0.1 * jax.random.normal(k1, (chnn,), jnp.float32)
        beta = 0.1 * jax.random.normal(k2, (chnn,), jnp.float32)
        mean = 0.1 * jax.random.normal(k3, (chnn,), jnp.float32)
        var = jnp.abs(jax.random.normal(k4, (chnn,), jnp.float32)) + 0.5
        scale = gamma / jnp.sqrt(var + eps)
        ws.append(w_t * scale[:, None, None, None])   # fold BN scale
        bs.append(beta - mean * scale)                # remaining bias
    return {
        "w_oihw": jnp.stack(ws, axis=0),              # (B, Cout, Cin, 3, 3) f32
        "bias": jnp.stack(bs, axis=0),                # (B, Cout) f32
        "dila": tuple(int(d) for d in dila),
    }


def _reference_branch(x_nchw_f32, w_oihw_f32, bias, d):
    """Pure-JAX reference: dilated conv (folded weights) + bias + ReLU."""
    cout = w_oihw_f32.shape[0]
    y = jax.lax.conv_general_dilated(
        x_nchw_f32, w_oihw_f32, window_strides=(1, 1),
        padding=((d, d), (d, d)), rhs_dilation=(d, d),
        dimension_numbers=("NCHW", "OIHW", "NCHW"),
        precision=jax.lax.Precision.HIGHEST)
    return jnp.maximum(y + bias.reshape(1, cout, 1, 1), 0.0)


if __name__ == "__main__":
    key = jax.random.PRNGKey(0)
    k1, k2, k3, k4 = jax.random.split(key, 4)

    # ---- Test 1: spec-sized tiny-channel shapes -> VPU path ---------------
    chnn_in, rd_sc, dila = 4, 2, (1, 2, 4)
    N, H, W = 2, 16, 16
    x = jax.random.normal(k1, (N, chnn_in, H, W), jnp.float32)    # NCHW
    params = init_ppm_params(k2, chnn_in, rd_sc, dila)

    feats = ppm_forward(x, params)
    feats = [jax.block_until_ready(f) for f in feats]

    chnn = chnn_in // rd_sc
    assert len(feats) == len(dila)
    assert all(f.shape == (N, chnn, H, W) for f in feats)
    assert all(bool(jnp.all(f >= 0.0)) for f in feats)            # ReLU output
    for i, d in enumerate(dila):
        ref = _reference_branch(x, params["w_oihw"][i], params["bias"][i], d)
        got = feats[i].astype(jnp.float32)
        err = float(jnp.max(jnp.abs(got - ref)))
        assert bool(jnp.allclose(got, ref, atol=2e-2, rtol=2e-2)), (
            f"VPU branch {i} mismatch, max abs err {err}")

    # ---- Test 2: wide channels -> MXU path ---------------------------------
    chnn_in2, rd_sc2, dila2 = 128, 2, (1, 2, 4)
    N2, H2, W2 = 2, 16, 16
    x2 = jax.random.normal(k3, (N2, chnn_in2, H2, W2), jnp.float32)
    params2 = init_ppm_params(k4, chnn_in2, rd_sc2, dila2)

    feats2 = [jax.block_until_ready(f) for f in ppm_forward(x2, params2)]
    assert all(f.shape == (N2, chnn_in2 // rd_sc2, H2, W2) for f in feats2)

    # The MXU path rounds inputs/weights to bf16 -> compare against a reference
    # computed on the same bf16-rounded operands (f32 accumulation both sides).
    x2r = x2.astype(jnp.bfloat16).astype(jnp.float32)
    for i, d in enumerate(dila2):
        w_r = params2["w_oihw"][i].astype(jnp.bfloat16).astype(jnp.float32)
        ref = _reference_branch(x2r, w_r, params2["bias"][i], d)
        got = feats2[i].astype(jnp.float32)
        err = float(jnp.max(jnp.abs(got - ref)))
        assert bool(jnp.allclose(got, ref, atol=5e-2, rtol=5e-2)), (
            f"MXU branch {i} mismatch, max abs err {err}")

    print("KERNEL_OK")
</pallas_src>

<mosaic_0001>
module attributes {stable_mosaic.version = 11 : i64} {
  func.func @_ppm_vpu_kernel(%arg0: i32, %arg1: memref<1x4x24x128xf32, #tpu.memory_space<vmem>>, %arg2: memref<216xf32, #tpu.memory_space<smem>>, %arg3: memref<6xf32, #tpu.memory_space<smem>>, %arg4: memref<1x32x16xbf16, #tpu.memory_space<vmem>>, %arg5: memref<1x32x16xbf16, #tpu.memory_space<vmem>>, %arg6: memref<1x32x16xbf16, #tpu.memory_space<vmem>>) attributes {dimension_semantics = [#tpu.dimension_semantics<parallel>], iteration_bounds = array<i64: 2>, scalar_prefetch = 0 : i64, scratch_operands = 0 : i64, tpu.core_type = #tpu.core_type<tc>, window_params = [{transform_indices = @transform_0, window_bounds = array<i64: 1, 4, 24, 128>}, {transform_indices = @transform_1, window_bounds = array<i64: 216>}, {transform_indices = @transform_2, window_bounds = array<i64: 6>}, {transform_indices = @transform_3, window_bounds = array<i64: 1, 32, 16>}, {transform_indices = @transform_4, window_bounds = array<i64: 1, 32, 16>}, {transform_indices = @transform_5, window_bounds = array<i64: 1, 32, 16>}]} {
    %cst = arith.constant 0.000000e+00 : f32
    %0 = vector.broadcast %cst : f32 to vector<16x16xf32>
    %cst_0 = arith.constant 0.000000e+00 : f32
    %1 = vector.broadcast %cst_0 : f32 to vector<16x16xf32>
    %c0 = arith.constant 0 : index
    %c0_1 = arith.constant 0 : index
    %c3 = arith.constant 3 : index
    %c3_2 = arith.constant 3 : index
    %2 = vector.load %arg1[%c0, %c0_1, %c3, %c3_2] : memref<1x4x24x128xf32, #tpu.memory_space<vmem>>, vector<1x1x16x16xf32>
    %3 = vector.shape_cast %2 : vector<1x1x16x16xf32> to vector<16x16xf32>
    %c0_3 = arith.constant 0 : index
    %4 = memref.load %arg2[%c0_3] : memref<216xf32, #tpu.memory_space<smem>>
    %5 = vector.broadcast %4 : f32 to vector<16x16xf32>
    %6 = arith.mulf %5, %3 : vector<16x16xf32>
    %7 = arith.addf %0, %6 : vector<16x16xf32>
    %c36 = arith.constant 36 : index
    %8 = memref.load %arg2[%c36] : memref<216xf32, #tpu.memory_space<smem>>
    %9 = vector.broadcast %8 : f32 to vector<16x16xf32>
    %10 = arith.mulf %9, %3 : vector<16x16xf32>
    %11 = arith.addf %1, %10 : vector<16x16xf32>
    %c0_4 = arith.constant 0 : index
    %c1 = arith.constant 1 : index
    %c3_5 = arith.constant 3 : index
    %c3_6 = arith.constant 3 : index
    %12 = vector.load %arg1[%c0_4, %c1, %c3_5, %c3_6] : memref<1x4x24x128xf32, #tpu.memory_space<vmem>>, vector<1x1x16x16xf32>
    %13 = vector.shape_cast %12 : vector<1x1x16x16xf32> to vector<16x16xf32>
    %c9 = arith.constant 9 : index
    %14 = memref.load %arg2[%c9] : memref<216xf32, #tpu.memory_space<smem>>
    %15 = vector.broadcast %14 : f32 to vector<16x16xf32>
    %16 = arith.mulf %15, %13 : vector<16x16xf32>
    %17 = arith.addf %7, %16 : vector<16x16xf32>
    %c45 = arith.constant 45 : index
    %18 = memref.load %arg2[%c45] : memref<216xf32, #tpu.memory_space<smem>>
    %19 = vector.broadcast %18 : f32 to vector<16x16xf32>
    %20 = arith.mulf %19, %13 : vector<16x16xf32>
    %21 = arith.addf %11, %20 : vector<16x16xf32>
    %c0_7 = arith.constant 0 : index
    %c2 = arith.constant 2 : index
    %c3_8 = arith.constant 3 : index
    %c3_9 = arith.constant 3 : index
    %22 = vector.load %arg1[%c0_7, %c2, %c3_8, %c3_9] : memref<1x4x24x128xf32, #tpu.memory_space<vmem>>, vector<1x1x16x16xf32>
    %23 = vector.shape_cast %22 : vector<1x1x16x16xf32> to vector<16x16xf32>
    %c18 = arith.constant 18 : index
    %24 = memref.load %arg2[%c18] : memref<216xf32, #tpu.memory_space<smem>>
    %25 = vector.broadcast %24 : f32 to vector<16x16xf32>
    %26 = arith.mulf %25, %23 : vector<16x16xf32>
    %27 = arith.addf %17, %26 : vector<16x16xf32>
    %c54 = arith.constant 54 : index
    %28 = memref.load %arg2[%c54] : memref<216xf32, #tpu.memory_space<smem>>
    %29 = vector.broadcast %28 : f32 to vector<16x16xf32>
    %30 = arith.mulf %29, %23 : vector<16x16xf32>
    %31 = arith.addf %21, %30 : vector<16x16xf32>
    %c0_10 = arith.constant 0 : index
    %c3_11 = arith.constant 3 : index
    %c3_12 = arith.constant 3 : index
    %c3_13 = arith.constant 3 : index
    %32 = vector.load %arg1[%c0_10, %c3_11, %c3_12, %c3_13] : memref<1x4x24x128xf32, #tpu.memory_space<vmem>>, vector<1x1x16x16xf32>
    %33 = vector.shape_cast %32 : vector<1x1x16x16xf32> to vector<16x16xf32>
    %c27 = arith.constant 27 : index
    %34 = memref.load %arg2[%c27] : memref<216xf32, #tpu.memory_space<smem>>
    %35 = vector.broadcast %34 : f32 to vector<16x16xf32>
    %36 = arith.mulf %35, %33 : vector<16x16xf32>
    %37 = arith.addf %27, %36 : vector<16x16xf32>
    %c63 = arith.constant 63 : index
    %38 = memref.load %arg2[%c63] : memref<216xf32, #tpu.memory_space<smem>>
    %39 = vector.broadcast %38 : f32 to vector<16x16xf32>
    %40 = arith.mulf %39, %33 : vector<16x16xf32>
    %41 = arith.addf %31, %40 : vector<16x16xf32>
    %c0_14 = arith.constant 0 : index
    %c0_15 = arith.constant 0 : index
    %c3_16 = arith.constant 3 : index
    %c4 = arith.constant 4 : index
    %42 = vector.load %arg1[%c0_14, %c0_15, %c3_16, %c4] : memref<1x4x24x128xf32, #tpu.memory_space<vmem>>, vector<1x1x16x16xf32>
    %43 = vector.shape_cast %42 : vector<1x1x16x16xf32> to vector<16x16xf32>
    %c1_17 = arith.constant 1 : index
    %44 = memref.load %arg2[%c1_17] : memref<216xf32, #tpu.memory_space<smem>>
    %45 = vector.broadcast %44 : f32 to vector<16x16xf32>
    %46 = arith.mulf %45, %43 : vector<16x16xf32>
    %47 = arith.addf %37, %46 : vector<16x16xf32>
    %c37 = arith.constant 37 : index
    %48 = memref.load %arg2[%c37] : memref<216xf32, #tpu.memory_space<smem>>
    %49 = vector.broadcast %48 : f32 to vector<16x16xf32>
    %50 = arith.mulf %49, %43 : vector<16x16xf32>
    %51 = arith.addf %41, %50 : vector<16x16xf32>
    %c0_18 = arith.constant 0 : index
    %c1_19 = arith.constant 1 : index
    %c3_20 = arith.constant 3 : index
    %c4_21 = arith.constant 4 : index
    %52 = vector.load %arg1[%c0_18, %c1_19, %c3_20, %c4_21] : memref<1x4x24x128xf32, #tpu.memory_space<vmem>>, vector<1x1x16x16xf32>
    %53 = vector.shape_cast %52 : vector<1x1x16x16xf32> to vector<16x16xf32>
    %c10 = arith.constant 10 : index
    %54 = memref.load %arg2[%c10] : memref<216xf32, #tpu.memory_space<smem>>
    %55 = vector.broadcast %54 : f32 to vector<16x16xf32>
    %56 = arith.mulf %55, %53 : vector<16x16xf32>
    %57 = arith.addf %47, %56 : vector<16x16xf32>
    %c46 = arith.constant 46 : index
    %58 = memref.load %arg2[%c46] : memref<216xf32, #tpu.memory_space<smem>>
    %59 = vector.broadcast %58 : f32 to vector<16x16xf32>
    %60 = arith.mulf %59, %53 : vector<16x16xf32>
    %61 = arith.addf %51, %60 : vector<16x16xf32>
    %c0_22 = arith.constant 0 : index
    %c2_23 = arith.constant 2 : index
    %c3_24 = arith.constant 3 : index
    %c4_25 = arith.constant 4 : index
    %62 = vector.load %arg1[%c0_22, %c2_23, %c3_24, %c4_25] : memref<1x4x24x128xf32, #tpu.memory_space<vmem>>, vector<1x1x16x16xf32>
    %63 = vector.shape_cast %62 : vector<1x1x16x16xf32> to vector<16x16xf32>
    %c19 = arith.constant 19 : index
    %64 = memref.load %arg2[%c19] : memref<216xf32, #tpu.memory_space<smem>>
    %65 = vector.broadcast %64 : f32 to vector<16x16xf32>
    %66 = arith.mulf %65, %63 : vector<16x16xf32>
    %67 = arith.addf %57, %66 : vector<16x16xf32>
    %c55 = arith.constant 55 : index
    %68 = memref.load %arg2[%c55] : memref<216xf32, #tpu.memory_space<smem>>
    %69 = vector.broadcast %68 : f32 to vector<16x16xf32>
    %70 = arith.mulf %69, %63 : vector<16x16xf32>
    %71 = arith.addf %61, %70 : vector<16x16xf32>
    %c0_26 = arith.constant 0 : index
    %c3_27 = arith.constant 3 : index
    %c3_28 = arith.constant 3 : index
    %c4_29 = arith.constant 4 : index
    %72 = vector.load %arg1[%c0_26, %c3_27, %c3_28, %c4_29] : memref<1x4x24x128xf32, #tpu.memory_space<vmem>>, vector<1x1x16x16xf32>
    %73 = vector.shape_cast %72 : vector<1x1x16x16xf32> to vector<16x16xf32>
    %c28 = arith.constant 28 : index
    %74 = memref.load %arg2[%c28] : memref<216xf32, #tpu.memory_space<smem>>
    %75 = vector.broadcast %74 : f32 to vector<16x16xf32>
    %76 = arith.mulf %75, %73 : vector<16x16xf32>
    %77 = arith.addf %67, %76 : vector<16x16xf32>
    %c64 = arith.constant 64 : index
    %78 = memref.load %arg2[%c64] : memref<216xf32, #tpu.memory_space<smem>>
    %79 = vector.broadcast %78 : f32 to vector<16x16xf32>
    %80 = arith.mulf %79, %73 : vector<16x16xf32>
    %81 = arith.addf %71, %80 : vector<16x16xf32>
    %c0_30 = arith.constant 0 : index
    %c0_31 = arith.constant 0 : index
    %c3_32 = arith.constant 3 : index
    %c5 = arith.constant 5 : index
    %82 = vector.load %arg1[%c0_30, %c0_31, %c3_32, %c5] : memref<1x4x24x128xf32, #tpu.memory_space<vmem>>, vector<1x1x16x16xf32>
    %83 = vector.shape_cast %82 : vector<1x1x16x16xf32> to vector<16x16xf32>
    %c2_33 = arith.constant 2 : index
    %84 = memref.load %arg2[%c2_33] : memref<216xf32, #tpu.memory_space<smem>>
    %85 = vector.broadcast %84 : f32 to vector<16x16xf32>
    %86 = arith.mulf %85, %83 : vector<16x16xf32>
    %87 = arith.addf %77, %86 : vector<16x16xf32>
    %c38 = arith.constant 38 : index
    %88 = memref.load %arg2[%c38] : memref<216xf32, #tpu.memory_space<smem>>
    %89 = vector.broadcast %88 : f32 to vector<16x16xf32>
    %90 = arith.mulf %89, %83 : vector<16x16xf32>
    %91 = arith.addf %81, %90 : vector<16x16xf32>
    %c0_34 = arith.constant 0 : index
    %c1_35 = arith.constant 1 : index
    %c3_36 = arith.constant 3 : index
    %c5_37 = arith.constant 5 : index
    %92 = vector.load %arg1[%c0_34, %c1_35, %c3_36, %c5_37] : memref<1x4x24x128xf32, #tpu.memory_space<vmem>>, vector<1x1x16x16xf32>
    %93 = vector.shape_cast %92 : vector<1x1x16x16xf32> to vector<16x16xf32>
    %c11 = arith.constant 11 : index
    %94 = memref.load %arg2[%c11] : memref<216xf32, #tpu.memory_space<smem>>
    %95 = vector.broadcast %94 : f32 to vector<16x16xf32>
    %96 = arith.mulf %95, %93 : vector<16x16xf32>
    %97 = arith.addf %87, %96 : vector<16x16xf32>
    %c47 = arith.constant 47 : index
    %98 = memref.load %arg2[%c47] : memref<216xf32, #tpu.memory_space<smem>>
    %99 = vector.broadcast %98 : f32 to vector<16x16xf32>
    %100 = arith.mulf %99, %93 : vector<16x16xf32>
    %101 = arith.addf %91, %100 : vector<16x16xf32>
    %c0_38 = arith.constant 0 : index
    %c2_39 = arith.constant 2 : index
    %c3_40 = arith.constant 3 : index
    %c5_41 = arith.constant 5 : index
    %102 = vector.load %arg1[%c0_38, %c2_39, %c3_40, %c5_41] : memref<1x4x24x128xf32, #tpu.memory_space<vmem>>, vector<1x1x16x16xf32>
    %103 = vector.shape_cast %102 : vector<1x1x16x16xf32> to vector<16x16xf32>
    %c20 = arith.constant 20 : index
    %104 = memref.load %arg2[%c20] : memref<216xf32, #tpu.memory_space<smem>>
    %105 = vector.broadcast %104 : f32 to vector<16x16xf32>
    %106 = arith.mulf %105, %103 : vector<16x16xf32>
    %107 = arith.addf %97, %106 : vector<16x16xf32>
    %c56 = arith.constant 56 : index
    %108 = memref.load %arg2[%c56] : memref<216xf32, #tpu.memory_space<smem>>
    %109 = vector.broadcast %108 : f32 to vector<16x16xf32>
    %110 = arith.mulf %109, %103 : vector<16x16xf32>
    %111 = arith.addf %101, %110 : vector<16x16xf32>
    %c0_42 = arith.constant 0 : index
    %c3_43 = arith.constant 3 : index
    %c3_44 = arith.constant 3 : index
    %c5_45 = arith.constant 5 : index
    %112 = vector.load %arg1[%c0_42, %c3_43, %c3_44, %c5_45] : memref<1x4x24x128xf32, #tpu.memory_space<vmem>>, vector<1x1x16x16xf32>
    %113 = vector.shape_cast %112 : vector<1x1x16x16xf32> to vector<16x16xf32>
    %c29 = arith.constant 29 : index
    %114 = memref.load %arg2[%c29] : memref<216xf32, #tpu.memory_space<smem>>
    %115 = vector.broadcast %114 : f32 to vector<16x16xf32>
    %116 = arith.mulf %115, %113 : vector<16x16xf32>
    %117 = arith.addf %107, %116 : vector<16x16xf32>
    %c65 = arith.constant 65 : index
    %118 = memref.load %arg2[%c65] : memref<216xf32, #tpu.memory_space<smem>>
    %119 = vector.broadcast %118 : f32 to vector<16x16xf32>
    %120 = arith.mulf %119, %113 : vector<16x16xf32>
    %121 = arith.addf %111, %120 : vector<16x16xf32>
    %c0_46 = arith.constant 0 : index
    %c0_47 = arith.constant 0 : index
    %c4_48 = arith.constant 4 : index
    %c3_49 = arith.constant 3 : index
    %122 = vector.load %arg1[%c0_46, %c0_47, %c4_48, %c3_49] : memref<1x4x24x128xf32, #tpu.memory_space<vmem>>, vector<1x1x16x16xf32>
    %123 = vector.shape_cast %122 : vector<1x1x16x16xf32> to vector<16x16xf32>
    %c3_50 = arith.constant 3 : index
    %124 = memref.load %arg2[%c3_50] : memref<216xf32, #tpu.memory_space<smem>>
    %125 = vector.broadcast %124 : f32 to vector<16x16xf32>
    %126 = arith.mulf %125, %123 : vector<16x16xf32>
    %127 = arith.addf %117, %126 : vector<16x16xf32>
    %c39 = arith.constant 39 : index
    %128 = memref.load %arg2[%c39] : memref<216xf32, #tpu.memory_space<smem>>
    %129 = vector.broadcast %128 : f32 to vector<16x16xf32>
    %130 = arith.mulf %129, %123 : vector<16x16xf32>
    %131 = arith.addf %121, %130 : vector<16x16xf32>
    %c0_51 = arith.constant 0 : index
    %c1_52 = arith.constant 1 : index
    %c4_53 = arith.constant 4 : index
    %c3_54 = arith.constant 3 : index
    %132 = vector.load %arg1[%c0_51, %c1_52, %c4_53, %c3_54] : memref<1x4x24x128xf32, #tpu.memory_space<vmem>>, vector<1x1x16x16xf32>
    %133 = vector.shape_cast %132 : vector<1x1x16x16xf32> to vector<16x16xf32>
    %c12 = arith.constant 12 : index
    %134 = memref.load %arg2[%c12] : memref<216xf32, #tpu.memory_space<smem>>
    %135 = vector.broadcast %134 : f32 to vector<16x16xf32>
    %136 = arith.mulf %135, %133 : vector<16x16xf32>
    %137 = arith.addf %127, %136 : vector<16x16xf32>
    %c48 = arith.constant 48 : index
    %138 = memref.load %arg2[%c48] : memref<216xf32, #tpu.memory_space<smem>>
    %139 = vector.broadcast %138 : f32 to vector<16x16xf32>
    %140 = arith.mulf %139, %133 : vector<16x16xf32>
    %141 = arith.addf %131, %140 : vector<16x16xf32>
    %c0_55 = arith.constant 0 : index
    %c2_56 = arith.constant 2 : index
    %c4_57 = arith.constant 4 : index
    %c3_58 = arith.constant 3 : index
    %142 = vector.load %arg1[%c0_55, %c2_56, %c4_57, %c3_58] : memref<1x4x24x128xf32, #tpu.memory_space<vmem>>, vector<1x1x16x16xf32>
    %143 = vector.shape_cast %142 : vector<1x1x16x16xf32> to vector<16x16xf32>
    %c21 = arith.constant 21 : index
    %144 = memref.load %arg2[%c21] : memref<216xf32, #tpu.memory_space<smem>>
    %145 = vector.broadcast %144 : f32 to vector<16x16xf32>
    %146 = arith.mulf %145, %143 : vector<16x16xf32>
    %147 = arith.addf %137, %146 : vector<16x16xf32>
    %c57 = arith.constant 57 : index
    %148 = memref.load %arg2[%c57] : memref<216xf32, #tpu.memory_space<smem>>
    %149 = vector.broadcast %148 : f32 to vector<16x16xf32>
    %150 = arith.mulf %149, %143 : vector<16x16xf32>
    %151 = arith.addf %141, %150 : vector<16x16xf32>
    %c0_59 = arith.constant 0 : index
    %c3_60 = arith.constant 3 : index
    %c4_61 = arith.constant 4 : index
    %c3_62 = arith.constant 3 : index
    %152 = vector.load %arg1[%c0_59, %c3_60, %c4_61, %c3_62] : memref<1x4x24x128xf32, #tpu.memory_space<vmem>>, vector<1x1x16x16xf32>
    %153 = vector.shape_cast %152 : vector<1x1x16x16xf32> to vector<16x16xf32>
    %c30 = arith.constant 30 : index
    %154 = memref.load %arg2[%c30] : memref<216xf32, #tpu.memory_space<smem>>
    %155 = vector.broadcast %154 : f32 to vector<16x16xf32>
    %156 = arith.mulf %155, %153 : vector<16x16xf32>
    %157 = arith.addf %147, %156 : vector<16x16xf32>
    %c66 = arith.constant 66 : index
    %158 = memref.load %arg2[%c66] : memref<216xf32, #tpu.memory_space<smem>>
    %159 = vector.broadcast %158 : f32 to vector<16x16xf32>
    %160 = arith.mulf %159, %153 : vector<16x16xf32>
    %161 = arith.addf %151, %160 : vector<16x16xf32>
    %c0_63 = arith.constant 0 : index
    %c0_64 = arith.constant 0 : index
    %c4_65 = arith.constant 4 : index
    %c4_66 = arith.constant 4 : index
    %162 = vector.load %arg1[%c0_63, %c0_64, %c4_65, %c4_66] : memref<1x4x24x128xf32, #tpu.memory_space<vmem>>, vector<1x1x16x16xf32>
    %163 = vector.shape_cast %162 : vector<1x1x16x16xf32> to vector<16x16xf32>
    %c4_67 = arith.constant 4 : index
    %164 = memref.load %arg2[%c4_67] : memref<216xf32, #tpu.memory_space<smem>>
    %165 = vector.broadcast %164 : f32 to vector<16x16xf32>
    %166 = arith.mulf %165, %163 : vector<16x16xf32>
    %167 = arith.addf %157, %166 : vector<16x16xf32>
    %c40 = arith.constant 40 : index
    %168 = memref.load %arg2[%c40] : memref<216xf32, #tpu.memory_space<smem>>
    %169 = vector.broadcast %168 : f32 to vector<16x16xf32>
    %170 = arith.mulf %169, %163 : vector<16x16xf32>
    %171 = arith.addf %161, %170 : vector<16x16xf32>
    %c0_68 = arith.constant 0 : index
    %c1_69 = arith.constant 1 : index
    %c4_70 = arith.constant 4 : index
    %c4_71 = arith.constant 4 : index
    %172 = vector.load %arg1[%c0_68, %c1_69, %c4_70, %c4_71] : memref<1x4x24x128xf32, #tpu.memory_space<vmem>>, vector<1x1x16x16xf32>
    %173 = vector.shape_cast %172 : vector<1x1x16x16xf32> to vector<16x16xf32>
    %c13 = arith.constant 13 : index
    %174 = memref.load %arg2[%c13] : memref<216xf32, #tpu.memory_space<smem>>
    %175 = vector.broadcast %174 : f32 to vector<16x16xf32>
    %176 = arith.mulf %175, %173 : vector<16x16xf32>
    %177 = arith.addf %167, %176 : vector<16x16xf32>
    %c49 = arith.constant 49 : index
    %178 = memref.load %arg2[%c49] : memref<216xf32, #tpu.memory_space<smem>>
    %179 = vector.broadcast %178 : f32 to vector<16x16xf32>
    %180 = arith.mulf %179, %173 : vector<16x16xf32>
    %181 = arith.addf %171, %180 : vector<16x16xf32>
    %c0_72 = arith.constant 0 : index
    %c2_73 = arith.constant 2 : index
    %c4_74 = arith.constant 4 : index
    %c4_75 = arith.constant 4 : index
    %182 = vector.load %arg1[%c0_72, %c2_73, %c4_74, %c4_75] : memref<1x4x24x128xf32, #tpu.memory_space<vmem>>, vector<1x1x16x16xf32>
    %183 = vector.shape_cast %182 : vector<1x1x16x16xf32> to vector<16x16xf32>
    %c22 = arith.constant 22 : index
    %184 = memref.load %arg2[%c22] : memref<216xf32, #tpu.memory_space<smem>>
    %185 = vector.broadcast %184 : f32 to vector<16x16xf32>
    %186 = arith.mulf %185, %183 : vector<16x16xf32>
    %187 = arith.addf %177, %186 : vector<16x16xf32>
    %c58 = arith.constant 58 : index
    %188 = memref.load %arg2[%c58] : memref<216xf32, #tpu.memory_space<smem>>
    %189 = vector.broadcast %188 : f32 to vector<16x16xf32>
    %190 = arith.mulf %189, %183 : vector<16x16xf32>
    %191 = arith.addf %181, %190 : vector<16x16xf32>
    %c0_76 = arith.constant 0 : index
    %c3_77 = arith.constant 3 : index
    %c4_78 = arith.constant 4 : index
    %c4_79 = arith.constant 4 : index
    %192 = vector.load %arg1[%c0_76, %c3_77, %c4_78, %c4_79] : memref<1x4x24x128xf32, #tpu.memory_space<vmem>>, vector<1x1x16x16xf32>
    %193 = vector.shape_cast %192 : vector<1x1x16x16xf32> to vector<16x16xf32>
    %c31 = arith.constant 31 : index
    %194 = memref.load %arg2[%c31] : memref<216xf32, #tpu.memory_space<smem>>
    %195 = vector.broadcast %194 : f32 to vector<16x16xf32>
    %196 = arith.mulf %195, %193 : vector<16x16xf32>
    %197 = arith.addf %187, %196 : vector<16x16xf32>
    %c67 = arith.constant 67 : index
    %198 = memref.load %arg2[%c67] : memref<216xf32, #tpu.memory_space<smem>>
    %199 = vector.broadcast %198 : f32 to vector<16x16xf32>
    %200 = arith.mulf %199, %193 : vector<16x16xf32>
    %201 = arith.addf %191, %200 : vector<16x16xf32>
    %c0_80 = arith.constant 0 : index
    %c0_81 = arith.constant 0 : index
    %c4_82 = arith.constant 4 : index
    %c5_83 = arith.constant 5 : index
    %202 = vector.load %arg1[%c0_80, %c0_81, %c4_82, %c5_83] : memref<1x4x24x128xf32, #tpu.memory_space<vmem>>, vector<1x1x16x16xf32>
    %203 = vector.shape_cast %202 : vector<1x1x16x16xf32> to vector<16x16xf32>
    %c5_84 = arith.constant 5 : index
    %204 = memref.load %arg2[%c5_84] : memref<216xf32, #tpu.memory_space<smem>>
    %205 = vector.broadcast %204 : f32 to vector<16x16xf32>
    %206 = arith.mulf %205, %203 : vector<16x16xf32>
    %207 = arith.addf %197, %206 : vector<16x16xf32>
    %c41 = arith.constant 41 : index
    %208 = memref.load %arg2[%c41] : memref<216xf32, #tpu.memory_space<smem>>
    %209 = vector.broadcast %208 : f32 to vector<16x16xf32>
    %210 = arith.mulf %209, %203 : vector<16x16xf32>
    %211 = arith.addf %201, %210 : vector<16x16xf32>
    %c0_85 = arith.constant 0 : index
    %c1_86 = arith.constant 1 : index
    %c4_87 = arith.constant 4 : index
    %c5_88 = arith.constant 5 : index
    %212 = vector.load %arg1[%c0_85, %c1_86, %c4_87, %c5_88] : memref<1x4x24x128xf32, #tpu.memory_space<vmem>>, vector<1x1x16x16xf32>
    %213 = vector.shape_cast %212 : vector<1x1x16x16xf32> to vector<16x16xf32>
    %c14 = arith.constant 14 : index
    %214 = memref.load %arg2[%c14] : memref<216xf32, #tpu.memory_space<smem>>
    %215 = vector.broadcast %214 : f32 to vector<16x16xf32>
    %216 = arith.mulf %215, %213 : vector<16x16xf32>
    %217 = arith.addf %207, %216 : vector<16x16xf32>
    %c50 = arith.constant 50 : index
    %218 = memref.load %arg2[%c50] : memref<216xf32, #tpu.memory_space<smem>>
    %219 = vector.broadcast %218 : f32 to vector<16x16xf32>
    %220 = arith.mulf %219, %213 : vector<16x16xf32>
    %221 = arith.addf %211, %220 : vector<16x16xf32>
    %c0_89 = arith.constant 0 : index
    %c2_90 = arith.constant 2 : index
    %c4_91 = arith.constant 4 : index
    %c5_92 = arith.constant 5 : index
    %222 = vector.load %arg1[%c0_89, %c2_90, %c4_91, %c5_92] : memref<1x4x24x128xf32, #tpu.memory_space<vmem>>, vector<1x1x16x16xf32>
    %223 = vector.shape_cast %222 : vector<1x1x16x16xf32> to vector<16x16xf32>
    %c23 = arith.constant 23 : index
    %224 = memref.load %arg2[%c23] : memref<216xf32, #tpu.memory_space<smem>>
    %225 = vector.broadcast %224 : f32 to vector<16x16xf32>
    %226 = arith.mulf %225, %223 : vector<16x16xf32>
    %227 = arith.addf %217, %226 : vector<16x16xf32>
    %c59 = arith.constant 59 : index
    %228 = memref.load %arg2[%c59] : memref<216xf32, #tpu.memory_space<smem>>
    %229 = vector.broadcast %228 : f32 to vector<16x16xf32>
    %230 = arith.mulf %229, %223 : vector<16x16xf32>
    %231 = arith.addf %221, %230 : vector<16x16xf32>
    %c0_93 = arith.constant 0 : index
    %c3_94 = arith.constant 3 : index
    %c4_95 = arith.constant 4 : index
    %c5_96 = arith.constant 5 : index
    %232 = vector.load %arg1[%c0_93, %c3_94, %c4_95, %c5_96] : memref<1x4x24x128xf32, #tpu.memory_space<vmem>>, vector<1x1x16x16xf32>
    %233 = vector.shape_cast %232 : vector<1x1x16x16xf32> to vector<16x16xf32>
    %c32 = arith.constant 32 : index
    %234 = memref.load %arg2[%c32] : memref<216xf32, #tpu.memory_space<smem>>
    %235 = vector.broadcast %234 : f32 to vector<16x16xf32>
    %236 = arith.mulf %235, %233 : vector<16x16xf32>
    %237 = arith.addf %227, %236 : vector<16x16xf32>
    %c68 = arith.constant 68 : index
    %238 = memref.load %arg2[%c68] : memref<216xf32, #tpu.memory_space<smem>>
    %239 = vector.broadcast %238 : f32 to vector<16x16xf32>
    %240 = arith.mulf %239, %233 : vector<16x16xf32>
    %241 = arith.addf %231, %240 : vector<16x16xf32>
    %c0_97 = arith.constant 0 : index
    %c0_98 = arith.constant 0 : index
    %c5_99 = arith.constant 5 : index
    %c3_100 = arith.constant 3 : index
    %242 = vector.load %arg1[%c0_97, %c0_98, %c5_99, %c3_100] : memref<1x4x24x128xf32, #tpu.memory_space<vmem>>, vector<1x1x16x16xf32>
    %243 = vector.shape_cast %242 : vector<1x1x16x16xf32> to vector<16x16xf32>
    %c6 = arith.constant 6 : index
    %244 = memref.load %arg2[%c6] : memref<216xf32, #tpu.memory_space<smem>>
    %245 = vector.broadcast %244 : f32 to vector<16x16xf32>
    %246 = arith.mulf %245, %243 : vector<16x16xf32>
    %247 = arith.addf %237, %246 : vector<16x16xf32>
    %c42 = arith.constant 42 : index
    %248 = memref.load %arg2[%c42] : memref<216xf32, #tpu.memory_space<smem>>
    %249 = vector.broadcast %248 : f32 to vector<16x16xf32>
    %250 = arith.mulf %249, %243 : vector<16x16xf32>
    %251 = arith.addf %241, %250 : vector<16x16xf32>
    %c0_101 = arith.constant 0 : index
    %c1_102 = arith.constant 1 : index
    %c5_103 = arith.constant 5 : index
    %c3_104 = arith.constant 3 : index
    %252 = vector.load %arg1[%c0_101, %c1_102, %c5_103, %c3_104] : memref<1x4x24x128xf32, #tpu.memory_space<vmem>>, vector<1x1x16x16xf32>
    %253 = vector.shape_cast %252 : vector<1x1x16x16xf32> to vector<16x16xf32>
    %c15 = arith.constant 15 : index
    %254 = memref.load %arg2[%c15] : memref<216xf32, #tpu.memory_space<smem>>
    %255 = vector.broadcast %254 : f32 to vector<16x16xf32>
    %256 = arith.mulf %255, %253 : vector<16x16xf32>
    %257 = arith.addf %247, %256 : vector<16x16xf32>
    %c51 = arith.constant 51 : index
    %258 = memref.load %arg2[%c51] : memref<216xf32, #tpu.memory_space<smem>>
    %259 = vector.broadcast %258 : f32 to vector<16x16xf32>
    %260 = arith.mulf %259, %253 : vector<16x16xf32>
    %261 = arith.addf %251, %260 : vector<16x16xf32>
    %c0_105 = arith.constant 0 : index
    %c2_106 = arith.constant 2 : index
    %c5_107 = arith.constant 5 : index
    %c3_108 = arith.constant 3 : index
    %262 = vector.load %arg1[%c0_105, %c2_106, %c5_107, %c3_108] : memref<1x4x24x128xf32, #tpu.memory_space<vmem>>, vector<1x1x16x16xf32>
    %263 = vector.shape_cast %262 : vector<1x1x16x16xf32> to vector<16x16xf32>
    %c24 = arith.constant 24 : index
    %264 = memref.load %arg2[%c24] : memref<216xf32, #tpu.memory_space<smem>>
    %265 = vector.broadcast %264 : f32 to vector<16x16xf32>
    %266 = arith.mulf %265, %263 : vector<16x16xf32>
    %267 = arith.addf %257, %266 : vector<16x16xf32>
    %c60 = arith.constant 60 : index
    %268 = memref.load %arg2[%c60] : memref<216xf32, #tpu.memory_space<smem>>
    %269 = vector.broadcast %268 : f32 to vector<16x16xf32>
    %270 = arith.mulf %269, %263 : vector<16x16xf32>
    %271 = arith.addf %261, %270 : vector<16x16xf32>
    %c0_109 = arith.constant 0 : index
    %c3_110 = arith.constant 3 : index
    %c5_111 = arith.constant 5 : index
    %c3_112 = arith.constant 3 : index
    %272 = vector.load %arg1[%c0_109, %c3_110, %c5_111, %c3_112] : memref<1x4x24x128xf32, #tpu.memory_space<vmem>>, vector<1x1x16x16xf32>
    %273 = vector.shape_cast %272 : vector<1x1x16x16xf32> to vector<16x16xf32>
    %c33 = arith.constant 33 : index
    %274 = memref.load %arg2[%c33] : memref<216xf32, #tpu.memory_space<smem>>
    %275 = vector.broadcast %274 : f32 to vector<16x16xf32>
    %276 = arith.mulf %275, %273 : vector<16x16xf32>
    %277 = arith.addf %267, %276 : vector<16x16xf32>
    %c69 = arith.constant 69 : index
    %278 = memref.load %arg2[%c69] : memref<216xf32, #tpu.memory_space<smem>>
    %279 = vector.broadcast %278 : f32 to vector<16x16xf32>
    %280 = arith.mulf %279, %273 : vector<16x16xf32>
    %281 = arith.addf %271, %280 : vector<16x16xf32>
    %c0_113 = arith.constant 0 : index
    %c0_114 = arith.constant 0 : index
    %c5_115 = arith.constant 5 : index
    %c4_116 = arith.constant 4 : index
    %282 = vector.load %arg1[%c0_113, %c0_114, %c5_115, %c4_116] : memref<1x4x24x128xf32, #tpu.memory_space<vmem>>, vector<1x1x16x16xf32>
    %283 = vector.shape_cast %282 : vector<1x1x16x16xf32> to vector<16x16xf32>
    %c7 = arith.constant 7 : index
    %284 = memref.load %arg2[%c7] : memref<216xf32, #tpu.memory_space<smem>>
    %285 = vector.broadcast %284 : f32 to vector<16x16xf32>
    %286 = arith.mulf %285, %283 : vector<16x16xf32>
    %287 = arith.addf %277, %286 : vector<16x16xf32>
    %c43 = arith.constant 43 : index
    %288 = memref.load %arg2[%c43] : memref<216xf32, #tpu.memory_space<smem>>
    %289 = vector.broadcast %288 : f32 to vector<16x16xf32>
    %290 = arith.mulf %289, %283 : vector<16x16xf32>
    %291 = arith.addf %281, %290 : vector<16x16xf32>
    %c0_117 = arith.constant 0 : index
    %c1_118 = arith.constant 1 : index
    %c5_119 = arith.constant 5 : index
    %c4_120 = arith.constant 4 : index
    %292 = vector.load %arg1[%c0_117, %c1_118, %c5_119, %c4_120] : memref<1x4x24x128xf32, #tpu.memory_space<vmem>>, vector<1x1x16x16xf32>
    %293 = vector.shape_cast %292 : vector<1x1x16x16xf32> to vector<16x16xf32>
    %c16 = arith.constant 16 : index
    %294 = memref.load %arg2[%c16] : memref<216xf32, #tpu.memory_space<smem>>
    %295 = vector.broadcast %294 : f32 to vector<16x16xf32>
    %296 = arith.mulf %295, %293 : vector<16x16xf32>
    %297 = arith.addf %287, %296 : vector<16x16xf32>
    %c52 = arith.constant 52 : index
    %298 = memref.load %arg2[%c52] : memref<216xf32, #tpu.memory_space<smem>>
    %299 = vector.broadcast %298 : f32 to vector<16x16xf32>
    %300 = arith.mulf %299, %293 : vector<16x16xf32>
    %301 = arith.addf %291, %300 : vector<16x16xf32>
    %c0_121 = arith.constant 0 : index
    %c2_122 = arith.constant 2 : index
    %c5_123 = arith.constant 5 : index
    %c4_124 = arith.constant 4 : index
    %302 = vector.load %arg1[%c0_121, %c2_122, %c5_123, %c4_124] : memref<1x4x24x128xf32, #tpu.memory_space<vmem>>, vector<1x1x16x16xf32>
    %303 = vector.shape_cast %302 : vector<1x1x16x16xf32> to vector<16x16xf32>
    %c25 = arith.constant 25 : index
    %304 = memref.load %arg2[%c25] : memref<216xf32, #tpu.memory_space<smem>>
    %305 = vector.broadcast %304 : f32 to vector<16x16xf32>
    %306 = arith.mulf %305, %303 : vector<16x16xf32>
    %307 = arith.addf %297, %306 : vector<16x16xf32>
    %c61 = arith.constant 61 : index
    %308 = memref.load %arg2[%c61] : memref<216xf32, #tpu.memory_space<smem>>
    %309 = vector.broadcast %308 : f32 to vector<16x16xf32>
    %310 = arith.mulf %309, %303 : vector<16x16xf32>
    %311 = arith.addf %301, %310 : vector<16x16xf32>
    %c0_125 = arith.constant 0 : index
    %c3_126 = arith.constant 3 : index
    %c5_127 = arith.constant 5 : index
    %c4_128 = arith.constant 4 : index
    %312 = vector.load %arg1[%c0_125, %c3_126, %c5_127, %c4_128] : memref<1x4x24x128xf32, #tpu.memory_space<vmem>>, vector<1x1x16x16xf32>
    %313 = vector.shape_cast %312 : vector<1x1x16x16xf32> to vector<16x16xf32>
    %c34 = arith.constant 34 : index
    %314 = memref.load %arg2[%c34] : memref<216xf32, #tpu.memory_space<smem>>
    %315 = vector.broadcast %314 : f32 to vector<16x16xf32>
    %316 = arith.mulf %315, %313 : vector<16x16xf32>
    %317 = arith.addf %307, %316 : vector<16x16xf32>
    %c70 = arith.constant 70 : index
    %318 = memref.load %arg2[%c70] : memref<216xf32, #tpu.memory_space<smem>>
    %319 = vector.broadcast %318 : f32 to vector<16x16xf32>
    %320 = arith.mulf %319, %313 : vector<16x16xf32>
    %321 = arith.addf %311, %320 : vector<16x16xf32>
    %c0_129 = arith.constant 0 : index
    %c0_130 = arith.constant 0 : index
    %c5_131 = arith.constant 5 : index
    %c5_132 = arith.constant 5 : index
    %322 = vector.load %arg1[%c0_129, %c0_130, %c5_131, %c5_132] : memref<1x4x24x128xf32, #tpu.memory_space<vmem>>, vector<1x1x16x16xf32>
    %323 = vector.shape_cast %322 : vector<1x1x16x16xf32> to vector<16x16xf32>
    %c8 = arith.constant 8 : index
    %324 = memref.load %arg2[%c8] : memref<216xf32, #tpu.memory_space<smem>>
    %325 = vector.broadcast %324 : f32 to vector<16x16xf32>
    %326 = arith.mulf %325, %323 : vector<16x16xf32>
    %327 = arith.addf %317, %326 : vector<16x16xf32>
    %c44 = arith.constant 44 : index
    %328 = memref.load %arg2[%c44] : memref<216xf32, #tpu.memory_space<smem>>
    %329 = vector.broadcast %328 : f32 to vector<16x16xf32>
    %330 = arith.mulf %329, %323 : vector<16x16xf32>
    %331 = arith.addf %321, %330 : vector<16x16xf32>
    %c0_133 = arith.constant 0 : index
    %c1_134 = arith.constant 1 : index
    %c5_135 = arith.constant 5 : index
    %c5_136 = arith.constant 5 : index
    %332 = vector.load %arg1[%c0_133, %c1_134, %c5_135, %c5_136] : memref<1x4x24x128xf32, #tpu.memory_space<vmem>>, vector<1x1x16x16xf32>
    %333 = vector.shape_cast %332 : vector<1x1x16x16xf32> to vector<16x16xf32>
    %c17 = arith.constant 17 : index
    %334 = memref.load %arg2[%c17] : memref<216xf32, #tpu.memory_space<smem>>
    %335 = vector.broadcast %334 : f32 to vector<16x16xf32>
    %336 = arith.mulf %335, %333 : vector<16x16xf32>
    %337 = arith.addf %327, %336 : vector<16x16xf32>
    %c53 = arith.constant 53 : index
    %338 = memref.load %arg2[%c53] : memref<216xf32, #tpu.memory_space<smem>>
    %339 = vector.broadcast %338 : f32 to vector<16x16xf32>
    %340 = arith.mulf %339, %333 : vector<16x16xf32>
    %341 = arith.addf %331, %340 : vector<16x16xf32>
    %c0_137 = arith.constant 0 : index
    %c2_138 = arith.constant 2 : index
    %c5_139 = arith.constant 5 : index
    %c5_140 = arith.constant 5 : index
    %342 = vector.load %arg1[%c0_137, %c2_138, %c5_139, %c5_140] : memref<1x4x24x128xf32, #tpu.memory_space<vmem>>, vector<1x1x16x16xf32>
    %343 = vector.shape_cast %342 : vector<1x1x16x16xf32> to vector<16x16xf32>
    %c26 = arith.constant 26 : index
    %344 = memref.load %arg2[%c26] : memref<216xf32, #tpu.memory_space<smem>>
    %345 = vector.broadcast %344 : f32 to vector<16x16xf32>
    %346 = arith.mulf %345, %343 : vector<16x16xf32>
    %347 = arith.addf %337, %346 : vector<16x16xf32>
    %c62 = arith.constant 62 : index
    %348 = memref.load %arg2[%c62] : memref<216xf32, #tpu.memory_space<smem>>
    %349 = vector.broadcast %348 : f32 to vector<16x16xf32>
    %350 = arith.mulf %349, %343 : vector<16x16xf32>
    %351 = arith.addf %341, %350 : vector<16x16xf32>
    %c0_141 = arith.constant 0 : index
    %c3_142 = arith.constant 3 : index
    %c5_143 = arith.constant 5 : index
    %c5_144 = arith.constant 5 : index
    %352 = vector.load %arg1[%c0_141, %c3_142, %c5_143, %c5_144] : memref<1x4x24x128xf32, #tpu.memory_space<vmem>>, vector<1x1x16x16xf32>
    %353 = vector.shape_cast %352 : vector<1x1x16x16xf32> to vector<16x16xf32>
    %c35 = arith.constant 35 : index
    %354 = memref.load %arg2[%c35] : memref<216xf32, #tpu.memory_space<smem>>
    %355 = vector.broadcast %354 : f32 to vector<16x16xf32>
    %356 = arith.mulf %355, %353 : vector<16x16xf32>
    %357 = arith.addf %347, %356 : vector<16x16xf32>
    %c71 = arith.constant 71 : index
    %358 = memref.load %arg2[%c71] : memref<216xf32, #tpu.memory_space<smem>>
    %359 = vector.broadcast %358 : f32 to vector<16x16xf32>
    %360 = arith.mulf %359, %353 : vector<16x16xf32>
    %361 = arith.addf %351, %360 : vector<16x16xf32>
    %c0_145 = arith.constant 0 : index
    %362 = memref.load %arg3[%c0_145] : memref<6xf32, #tpu.memory_space<smem>>
    %363 = vector.broadcast %362 : f32 to vector<16x16xf32>
    %364 = arith.addf %357, %363 : vector<16x16xf32>
    %cst_146 = arith.constant 0.000000e+00 : f32
    %365 = vector.broadcast %cst_146 : f32 to vector<16x16xf32>
    %366 = arith.maximumf %364, %365 : vector<16x16xf32>
    %367 = arith.truncf %366 : vector<16x16xf32> to vector<16x16xbf16>
    %c1_147 = arith.constant 1 : index
    %368 = memref.load %arg3[%c1_147] : memref<6xf32, #tpu.memory_space<smem>>
    %369 = vector.broadcast %368 : f32 to vector<16x16xf32>
    %370 = arith.addf %361, %369 : vector<16x16xf32>
    %cst_148 = arith.constant 0.000000e+00 : f32
    %371 = vector.broadcast %cst_148 : f32 to vector<16x16xf32>
    %372 = arith.maximumf %370, %371 : vector<16x16xf32>
    %373 = arith.truncf %372 : vector<16x16xf32> to vector<16x16xbf16>
    %374 = tpu.concatenate %367, %373 in 0 : vector<16x16xbf16>, vector<16x16xbf16> -> vector<32x16xbf16>
    %c0_149 = arith.constant 0 : index
    %c0_150 = arith.constant 0 : index
    %c0_151 = arith.constant 0 : index
    %375 = vector.load %arg4[%c0_149, %c0_150, %c0_151] : memref<1x32x16xbf16, #tpu.memory_space<vmem>>, vector<1x32x16xbf16>
    %376 = vector.shape_cast %375 : vector<1x32x16xbf16> to vector<32x16xbf16>
    %377 = vector.shape_cast %374 : vector<32x16xbf16> to vector<1x32x16xbf16>
    tpu.vector_store %arg4[%c0_149, %c0_150, %c0_151], %377 {strides = array<i32>} : memref<1x32x16xbf16, #tpu.memory_space<vmem>>, vector<1x32x16xbf16>,
    %cst_152 = arith.constant 0.000000e+00 : f32
    %378 = vector.broadcast %cst_152 : f32 to vector<16x16xf32>
    %cst_153 = arith.constant 0.000000e+00 : f32
    %379 = vector.broadcast %cst_153 : f32 to vector<16x16xf32>
    %c0_154 = arith.constant 0 : index
    %c0_155 = arith.constant 0 : index
    %c2_156 = arith.constant 2 : index
    %c2_157 = arith.constant 2 : index
    %380 = vector.load %arg1[%c0_154, %c0_155, %c2_156, %c2_157] : memref<1x4x24x128xf32, #tpu.memory_space<vmem>>, vector<1x1x16x16xf32>
    %381 = vector.shape_cast %380 : vector<1x1x16x16xf32> to vector<16x16xf32>
    %c72 = arith.constant 72 : index
    %382 = memref.load %arg2[%c72] : memref<216xf32, #tpu.memory_space<smem>>
    %383 = vector.broadcast %382 : f32 to vector<16x16xf32>
    %384 = arith.mulf %383, %381 : vector<16x16xf32>
    %385 = arith.addf %378, %384 : vector<16x16xf32>
    %c108 = arith.constant 108 : index
    %386 = memref.load %arg2[%c108] : memref<216xf32, #tpu.memory_space<smem>>
    %387 = vector.broadcast %386 : f32 to vector<16x16xf32>
    %388 = arith.mulf %387, %381 : vector<16x16xf32>
    %389 = arith.addf %379, %388 : vector<16x16xf32>
    %c0_158 = arith.constant 0 : index
    %c1_159 = arith.constant 1 : index
    %c2_160 = arith.constant 2 : index
    %c2_161 = arith.constant 2 : index
    %390 = vector.load %arg1[%c0_158, %c1_159, %c2_160, %c2_161] : memref<1x4x24x128xf32, #tpu.memory_space<vmem>>, vector<1x1x16x16xf32>
    %391 = vector.shape_cast %390 : vector<1x1x16x16xf32> to vector<16x16xf32>
    %c81 = arith.constant 81 : index
    %392 = memref.load %arg2[%c81] : memref<216xf32, #tpu.memory_space<smem>>
    %393 = vector.broadcast %392 : f32 to vector<16x16xf32>
    %394 = arith.mulf %393, %391 : vector<16x16xf32>
    %395 = arith.addf %385, %394 : vector<16x16xf32>
    %c117 = arith.constant 117 : index
    %396 = memref.load %arg2[%c117] : memref<216xf32, #tpu.memory_space<smem>>
    %397 = vector.broadcast %396 : f32 to vector<16x16xf32>
    %398 = arith.mulf %397, %391 : vector<16x16xf32>
    %399 = arith.addf %389, %398 : vector<16x16xf32>
    %c0_162 = arith.constant 0 : index
    %c2_163 = arith.constant 2 : index
    %c2_164 = arith.constant 2 : index
    %c2_165 = arith.constant 2 : index
    %400 = vector.load %arg1[%c0_162, %c2_163, %c2_164, %c2_165] : memref<1x4x24x128xf32, #tpu.memory_space<vmem>>, vector<1x1x16x16xf32>
    %401 = vector.shape_cast %400 : vector<1x1x16x16xf32> to vector<16x16xf32>
    %c90 = arith.constant 90 : index
    %402 = memref.load %arg2[%c90] : memref<216xf32, #tpu.memory_space<smem>>
    %403 = vector.broadcast %402 : f32 to vector<16x16xf32>
    %404 = arith.mulf %403, %401 : vector<16x16xf32>
    %405 = arith.addf %395, %404 : vector<16x16xf32>
    %c126 = arith.constant 126 : index
    %406 = memref.load %arg2[%c126] : memref<216xf32, #tpu.memory_space<smem>>
    %407 = vector.broadcast %406 : f32 to vector<16x16xf32>
    %408 = arith.mulf %407, %401 : vector<16x16xf32>
    %409 = arith.addf %399, %408 : vector<16x16xf32>
    %c0_166 = arith.constant 0 : index
    %c3_167 = arith.constant 3 : index
    %c2_168 = arith.constant 2 : index
    %c2_169 = arith.constant 2 : index
    %410 = vector.load %arg1[%c0_166, %c3_167, %c2_168, %c2_169] : memref<1x4x24x128xf32, #tpu.memory_space<vmem>>, vector<1x1x16x16xf32>
    %411 = vector.shape_cast %410 : vector<1x1x16x16xf32> to vector<16x16xf32>
    %c99 = arith.constant 99 : index
    %412 = memref.load %arg2[%c99] : memref<216xf32, #tpu.memory_space<smem>>
    %413 = vector.broadcast %412 : f32 to vector<16x16xf32>
    %414 = arith.mulf %413, %411 : vector<16x16xf32>
    %415 = arith.addf %405, %414 : vector<16x16xf32>
    %c135 = arith.constant 135 : index
    %416 = memref.load %arg2[%c135] : memref<216xf32, #tpu.memory_space<smem>>
    %417 = vector.broadcast %416 : f32 to vector<16x16xf32>
    %418 = arith.mulf %417, %411 : vector<16x16xf32>
    %419 = arith.addf %409, %418 : vector<16x16xf32>
    %c0_170 = arith.constant 0 : index
    %c0_171 = arith.constant 0 : index
    %c2_172 = arith.constant 2 : index
    %c4_173 = arith.constant 4 : index
    %420 = vector.load %arg1[%c0_170, %c0_171, %c2_172, %c4_173] : memref<1x4x24x128xf32, #tpu.memory_space<vmem>>, vector<1x1x16x16xf32>
    %421 = vector.shape_cast %420 : vector<1x1x16x16xf32> to vector<16x16xf32>
    %c73 = arith.constant 73 : index
    %422 = memref.load %arg2[%c73] : memref<216xf32, #tpu.memory_space<smem>>
    %423 = vector.broadcast %422 : f32 to vector<16x16xf32>
    %424 = arith.mulf %423, %421 : vector<16x16xf32>
    %425 = arith.addf %415, %424 : vector<16x16xf32>
    %c109 = arith.constant 109 : index
    %426 = memref.load %arg2[%c109] : memref<216xf32, #tpu.memory_space<smem>>
    %427 = vector.broadcast %426 : f32 to vector<16x16xf32>
    %428 = arith.mulf %427, %421 : vector<16x16xf32>
    %429 = arith.addf %419, %428 : vector<16x16xf32>
    %c0_174 = arith.constant 0 : index
    %c1_175 = arith.constant 1 : index
    %c2_176 = arith.constant 2 : index
    %c4_177 = arith.constant 4 : index
    %430 = vector.load %arg1[%c0_174, %c1_175, %c2_176, %c4_177] : memref<1x4x24x128xf32, #tpu.memory_space<vmem>>, vector<1x1x16x16xf32>
    %431 = vector.shape_cast %430 : vector<1x1x16x16xf32> to vector<16x16xf32>
    %c82 = arith.constant 82 : index
    %432 = memref.load %arg2[%c82] : memref<216xf32, #tpu.memory_space<smem>>
    %433 = vector.broadcast %432 : f32 to vector<16x16xf32>
    %434 = arith.mulf %433, %431 : vector<16x16xf32>
    %435 = arith.addf %425, %434 : vector<16x16xf32>
    %c118 = arith.constant 118 : index
    %436 = memref.load %arg2[%c118] : memref<216xf32, #tpu.memory_space<smem>>
    %437 = vector.broadcast %436 : f32 to vector<16x16xf32>
    %438 = arith.mulf %437, %431 : vector<16x16xf32>
    %439 = arith.addf %429, %438 : vector<16x16xf32>
    %c0_178 = arith.constant 0 : index
    %c2_179 = arith.constant 2 : index
    %c2_180 = arith.constant 2 : index
    %c4_181 = arith.constant 4 : index
    %440 = vector.load %arg1[%c0_178, %c2_179, %c2_180, %c4_181] : memref<1x4x24x128xf32, #tpu.memory_space<vmem>>, vector<1x1x16x16xf32>
    %441 = vector.shape_cast %440 : vector<1x1x16x16xf32> to vector<16x16xf32>
    %c91 = arith.constant 91 : index
    %442 = memref.load %arg2[%c91] : memref<216xf32, #tpu.memory_space<smem>>
    %443 = vector.broadcast %442 : f32 to vector<16x16xf32>
    %444 = arith.mulf %443, %441 : vector<16x16xf32>
    %445 = arith.addf %435, %444 : vector<16x16xf32>
    %c127 = arith.constant 127 : index
    %446 = memref.load %arg2[%c127] : memref<216xf32, #tpu.memory_space<smem>>
    %447 = vector.broadcast %446 : f32 to vector<16x16xf32>
    %448 = arith.mulf %447, %441 : vector<16x16xf32>
    %449 = arith.addf %439, %448 : vector<16x16xf32>
    %c0_182 = arith.constant 0 : index
    %c3_183 = arith.constant 3 : index
    %c2_184 = arith.constant 2 : index
    %c4_185 = arith.constant 4 : index
    %450 = vector.load %arg1[%c0_182, %c3_183, %c2_184, %c4_185] : memref<1x4x24x128xf32, #tpu.memory_space<vmem>>, vector<1x1x16x16xf32>
    %451 = vector.shape_cast %450 : vector<1x1x16x16xf32> to vector<16x16xf32>
    %c100 = arith.constant 100 : index
    %452 = memref.load %arg2[%c100] : memref<216xf32, #tpu.memory_space<smem>>
    %453 = vector.broadcast %452 : f32 to vector<16x16xf32>
    %454 = arith.mulf %453, %451 : vector<16x16xf32>
    %455 = arith.addf %445, %454 : vector<16x16xf32>
    %c136 = arith.constant 136 : index
    %456 = memref.load %arg2[%c136] : memref<216xf32, #tpu.memory_space<smem>>
    %457 = vector.broadcast %456 : f32 to vector<16x16xf32>
    %458 = arith.mulf %457, %451 : vector<16x16xf32>
    %459 = arith.addf %449, %458 : vector<16x16xf32>
    %c0_186 = arith.constant 0 : index
    %c0_187 = arith.constant 0 : index
    %c2_188 = arith.constant 2 : index
    %c6_189 = arith.constant 6 : index
    %460 = vector.load %arg1[%c0_186, %c0_187, %c2_188, %c6_189] : memref<1x4x24x128xf32, #tpu.memory_space<vmem>>, vector<1x1x16x16xf32>
    %461 = vector.shape_cast %460 : vector<1x1x16x16xf32> to vector<16x16xf32>
    %c74 = arith.constant 74 : index
    %462 = memref.load %arg2[%c74] : memref<216xf32, #tpu.memory_space<smem>>
    %463 = vector.broadcast %462 : f32 to vector<16x16xf32>
    %464 = arith.mulf %463, %461 : vector<16x16xf32>
    %465 = arith.addf %455, %464 : vector<16x16xf32>
    %c110 = arith.constant 110 : index
    %466 = memref.load %arg2[%c110] : memref<216xf32, #tpu.memory_space<smem>>
    %467 = vector.broadcast %466 : f32 to vector<16x16xf32>
    %468 = arith.mulf %467, %461 : vector<16x16xf32>
    %469 = arith.addf %459, %468 : vector<16x16xf32>
    %c0_190 = arith.constant 0 : index
    %c1_191 = arith.constant 1 : index
    %c2_192 = arith.constant 2 : index
    %c6_193 = arith.constant 6 : index
    %470 = vector.load %arg1[%c0_190, %c1_191, %c2_192, %c6_193] : memref<1x4x24x128xf32, #tpu.memory_space<vmem>>, vector<1x1x16x16xf32>
    %471 = vector.shape_cast %470 : vector<1x1x16x16xf32> to vector<16x16xf32>
    %c83 = arith.constant 83 : index
    %472 = memref.load %arg2[%c83] : memref<216xf32, #tpu.memory_space<smem>>
    %473 = vector.broadcast %472 : f32 to vector<16x16xf32>
    %474 = arith.mulf %473, %471 : vector<16x16xf32>
    %475 = arith.addf %465, %474 : vector<16x16xf32>
    %c119 = arith.constant 119 : index
    %476 = memref.load %arg2[%c119] : memref<216xf32, #tpu.memory_space<smem>>
    %477 = vector.broadcast %476 : f32 to vector<16x16xf32>
    %478 = arith.mulf %477, %471 : vector<16x16xf32>
    %479 = arith.addf %469, %478 : vector<16x16xf32>
    %c0_194 = arith.constant 0 : index
    %c2_195 = arith.constant 2 : index
    %c2_196 = arith.constant 2 : index
    %c6_197 = arith.constant 6 : index
    %480 = vector.load %arg1[%c0_194, %c2_195, %c2_196, %c6_197] : memref<1x4x24x128xf32, #tpu.memory_space<vmem>>, vector<1x1x16x16xf32>
    %481 = vector.shape_cast %480 : vector<1x1x16x16xf32> to vector<16x16xf32>
    %c92 = arith.constant 92 : index
    %482 = memref.load %arg2[%c92] : memref<216xf32, #tpu.memory_space<smem>>
    %483 = vector.broadcast %482 : f32 to vector<16x16xf32>
    %484 = arith.mulf %483, %481 : vector<16x16xf32>
    %485 = arith.addf %475, %484 : vector<16x16xf32>
    %c128 = arith.constant 128 : index
    %486 = memref.load %arg2[%c128] : memref<216xf32, #tpu.memory_space<smem>>
    %487 = vector.broadcast %486 : f32 to vector<16x16xf32>
    %488 = arith.mulf %487, %481 : vector<16x16xf32>
    %489 = arith.addf %479, %488 : vector<16x16xf32>
    %c0_198 = arith.constant 0 : index
    %c3_199 = arith.constant 3 : index
    %c2_200 = arith.constant 2 : index
    %c6_201 = arith.constant 6 : index
    %490 = vector.load %arg1[%c0_198, %c3_199, %c2_200, %c6_201] : memref<1x4x24x128xf32, #tpu.memory_space<vmem>>, vector<1x1x16x16xf32>
    %491 = vector.shape_cast %490 : vector<1x1x16x16xf32> to vector<16x16xf32>
    %c101 = arith.constant 101 : index
    %492 = memref.load %arg2[%c101] : memref<216xf32, #tpu.memory_space<smem>>
    %493 = vector.broadcast %492 : f32 to vector<16x16xf32>
    %494 = arith.mulf %493, %491 : vector<16x16xf32>
    %495 = arith.addf %485, %494 : vector<16x16xf32>
    %c137 = arith.constant 137 : index
    %496 = memref.load %arg2[%c137] : memref<216xf32, #tpu.memory_space<smem>>
    %497 = vector.broadcast %496 : f32 to vector<16x16xf32>
    %498 = arith.mulf %497, %491 : vector<16x16xf32>
    %499 = arith.addf %489, %498 : vector<16x16xf32>
    %c0_202 = arith.constant 0 : index
    %c0_203 = arith.constant 0 : index
    %c4_204 = arith.constant 4 : index
    %c2_205 = arith.constant 2 : index
    %500 = vector.load %arg1[%c0_202, %c0_203, %c4_204, %c2_205] : memref<1x4x24x128xf32, #tpu.memory_space<vmem>>, vector<1x1x16x16xf32>
    %501 = vector.shape_cast %500 : vector<1x1x16x16xf32> to vector<16x16xf32>
    %c75 = arith.constant 75 : index
    %502 = memref.load %arg2[%c75] : memref<216xf32, #tpu.memory_space<smem>>
    %503 = vector.broadcast %502 : f32 to vector<16x16xf32>
    %504 = arith.mulf %503, %501 : vector<16x16xf32>
    %505 = arith.addf %495, %504 : vector<16x16xf32>
    %c111 = arith.constant 111 : index
    %506 = memref.load %arg2[%c111] : memref<216xf32, #tpu.memory_space<smem>>
    %507 = vector.broadcast %506 : f32 to vector<16x16xf32>
    %508 = arith.mulf %507, %501 : vector<16x16xf32>
    %509 = arith.addf %499, %508 : vector<16x16xf32>
    %c0_206 = arith.constant 0 : index
    %c1_207 = arith.constant 1 : index
    %c4_208 = arith.constant 4 : index
    %c2_209 = arith.constant 2 : index
    %510 = vector.load %arg1[%c0_206, %c1_207, %c4_208, %c2_209] : memref<1x4x24x128xf32, #tpu.memory_space<vmem>>, vector<1x1x16x16xf32>
    %511 = vector.shape_cast %510 : vector<1x1x16x16xf32> to vector<16x16xf32>
    %c84 = arith.constant 84 : index
    %512 = memref.load %arg2[%c84] : memref<216xf32, #tpu.memory_space<smem>>
    %513 = vector.broadcast %512 : f32 to vector<16x16xf32>
    %514 = arith.mulf %513, %511 : vector<16x16xf32>
    %515 = arith.addf %505, %514 : vector<16x16xf32>
    %c120 = arith.constant 120 : index
    %516 = memref.load %arg2[%c120] : memref<216xf32, #tpu.memory_space<smem>>
    %517 = vector.broadcast %516 : f32 to vector<16x16xf32>
    %518 = arith.mulf %517, %511 : vector<16x16xf32>
    %519 = arith.addf %509, %518 : vector<16x16xf32>
    %c0_210 = arith.constant 0 : index
    %c2_211 = arith.constant 2 : index
    %c4_212 = arith.constant 4 : index
    %c2_213 = arith.constant 2 : index
    %520 = vector.load %arg1[%c0_210, %c2_211, %c4_212, %c2_213] : memref<1x4x24x128xf32, #tpu.memory_space<vmem>>, vector<1x1x16x16xf32>
    %521 = vector.shape_cast %520 : vector<1x1x16x16xf32> to vector<16x16xf32>
    %c93 = arith.constant 93 : index
    %522 = memref.load %arg2[%c93] : memref<216xf32, #tpu.memory_space<smem>>
    %523 = vector.broadcast %522 : f32 to vector<16x16xf32>
    %524 = arith.mulf %523, %521 : vector<16x16xf32>
    %525 = arith.addf %515, %524 : vector<16x16xf32>
    %c129 = arith.constant 129 : index
    %526 = memref.load %arg2[%c129] : memref<216xf32, #tpu.memory_space<smem>>
    %527 = vector.broadcast %526 : f32 to vector<16x16xf32>
    %528 = arith.mulf %527, %521 : vector<16x16xf32>
    %529 = arith.addf %519, %528 : vector<16x16xf32>
    %c0_214 = arith.constant 0 : index
    %c3_215 = arith.constant 3 : index
    %c4_216 = arith.constant 4 : index
    %c2_217 = arith.constant 2 : index
    %530 = vector.load %arg1[%c0_214, %c3_215, %c4_216, %c2_217] : memref<1x4x24x128xf32, #tpu.memory_space<vmem>>, vector<1x1x16x16xf32>
    %531 = vector.shape_cast %530 : vector<1x1x16x16xf32> to vector<16x16xf32>
    %c102 = arith.constant 102 : index
    %532 = memref.load %arg2[%c102] : memref<216xf32, #tpu.memory_space<smem>>
    %533 = vector.broadcast %532 : f32 to vector<16x16xf32>
    %534 = arith.mulf %533, %531 : vector<16x16xf32>
    %535 = arith.addf %525, %534 : vector<16x16xf32>
    %c138 = arith.constant 138 : index
    %536 = memref.load %arg2[%c138] : memref<216xf32, #tpu.memory_space<smem>>
    %537 = vector.broadcast %536 : f32 to vector<16x16xf32>
    %538 = arith.mulf %537, %531 : vector<16x16xf32>
    %539 = arith.addf %529, %538 : vector<16x16xf32>
    %c0_218 = arith.constant 0 : index
    %c0_219 = arith.constant 0 : index
    %c4_220 = arith.constant 4 : index
    %c4_221 = arith.constant 4 : index
    %540 = vector.load %arg1[%c0_218, %c0_219, %c4_220, %c4_221] : memref<1x4x24x128xf32, #tpu.memory_space<vmem>>, vector<1x1x16x16xf32>
    %541 = vector.shape_cast %540 : vector<1x1x16x16xf32> to vector<16x16xf32>
    %c76 = arith.constant 76 : index
    %542 = memref.load %arg2[%c76] : memref<216xf32, #tpu.memory_space<smem>>
    %543 = vector.broadcast %542 : f32 to vector<16x16xf32>
    %544 = arith.mulf %543, %541 : vector<16x16xf32>
    %545 = arith.addf %535, %544 : vector<16x16xf32>
    %c112 = arith.constant 112 : index
    %546 = memref.load %arg2[%c112] : memref<216xf32, #tpu.memory_space<smem>>
    %547 = vector.broadcast %546 : f32 to vector<16x16xf32>
    %548 = arith.mulf %547, %541 : vector<16x16xf32>
    %549 = arith.addf %539, %548 : vector<16x16xf32>
    %c0_222 = arith.constant 0 : index
    %c1_223 = arith.constant 1 : index
    %c4_224 = arith.constant 4 : index
    %c4_225 = arith.constant 4 : index
    %550 = vector.load %arg1[%c0_222, %c1_223, %c4_224, %c4_225] : memref<1x4x24x128xf32, #tpu.memory_space<vmem>>, vector<1x1x16x16xf32>
    %551 = vector.shape_cast %550 : vector<1x1x16x16xf32> to vector<16x16xf32>
    %c85 = arith.constant 85 : index
    %552 = memref.load %arg2[%c85] : memref<216xf32, #tpu.memory_space<smem>>
    %553 = vector.broadcast %552 : f32 to vector<16x16xf32>
    %554 = arith.mulf %553, %551 : vector<16x16xf32>
    %555 = arith.addf %545, %554 : vector<16x16xf32>
    %c121 = arith.constant 121 : index
    %556 = memref.load %arg2[%c121] : memref<216xf32, #tpu.memory_space<smem>>
    %557 = vector.broadcast %556 : f32 to vector<16x16xf32>
    %558 = arith.mulf %557, %551 : vector<16x16xf32>
    %559 = arith.addf %549, %558 : vector<16x16xf32>
    %c0_226 = arith.constant 0 : index
    %c2_227 = arith.constant 2 : index
    %c4_228 = arith.constant 4 : index
    %c4_229 = arith.constant 4 : index
    %560 = vector.load %arg1[%c0_226, %c2_227, %c4_228, %c4_229] : memref<1x4x24x128xf32, #tpu.memory_space<vmem>>, vector<1x1x16x16xf32>
    %561 = vector.shape_cast %560 : vector<1x1x16x16xf32> to vector<16x16xf32>
    %c94 = arith.constant 94 : index
    %562 = memref.load %arg2[%c94] : memref<216xf32, #tpu.memory_space<smem>>
    %563 = vector.broadcast %562 : f32 to vector<16x16xf32>
    %564 = arith.mulf %563, %561 : vector<16x16xf32>
    %565 = arith.addf %555, %564 : vector<16x16xf32>
    %c130 = arith.constant 130 : index
    %566 = memref.load %arg2[%c130] : memref<216xf32, #tpu.memory_space<smem>>
    %567 = vector.broadcast %566 : f32 to vector<16x16xf32>
    %568 = arith.mulf %567, %561 : vector<16x16xf32>
    %569 = arith.addf %559, %568 : vector<16x16xf32>
    %c0_230 = arith.constant 0 : index
    %c3_231 = arith.constant 3 : index
    %c4_232 = arith.constant 4 : index
    %c4_233 = arith.constant 4 : index
    %570 = vector.load %arg1[%c0_230, %c3_231, %c4_232, %c4_233] : memref<1x4x24x128xf32, #tpu.memory_space<vmem>>, vector<1x1x16x16xf32>
    %571 = vector.shape_cast %570 : vector<1x1x16x16xf32> to vector<16x16xf32>
    %c103 = arith.constant 103 : index
    %572 = memref.load %arg2[%c103] : memref<216xf32, #tpu.memory_space<smem>>
    %573 = vector.broadcast %572 : f32 to vector<16x16xf32>
    %574 = arith.mulf %573, %571 : vector<16x16xf32>
    %575 = arith.addf %565, %574 : vector<16x16xf32>
    %c139 = arith.constant 139 : index
    %576 = memref.load %arg2[%c139] : memref<216xf32, #tpu.memory_space<smem>>
    %577 = vector.broadcast %576 : f32 to vector<16x16xf32>
    %578 = arith.mulf %577, %571 : vector<16x16xf32>
    %579 = arith.addf %569, %578 : vector<16x16xf32>
    %c0_234 = arith.constant 0 : index
    %c0_235 = arith.constant 0 : index
    %c4_236 = arith.constant 4 : index
    %c6_237 = arith.constant 6 : index
    %580 = vector.load %arg1[%c0_234, %c0_235, %c4_236, %c6_237] : memref<1x4x24x128xf32, #tpu.memory_space<vmem>>, vector<1x1x16x16xf32>
    %581 = vector.shape_cast %580 : vector<1x1x16x16xf32> to vector<16x16xf32>
    %c77 = arith.constant 77 : index
    %582 = memref.load %arg2[%c77] : memref<216xf32, #tpu.memory_space<smem>>
    %583 = vector.broadcast %582 : f32 to vector<16x16xf32>
    %584 = arith.mulf %583, %581 : vector<16x16xf32>
    %585 = arith.addf %575, %584 : vector<16x16xf32>
    %c113 = arith.constant 113 : index
    %586 = memref.load %arg2[%c113] : memref<216xf32, #tpu.memory_space<smem>>
    %587 = vector.broadcast %586 : f32 to vector<16x16xf32>
    %588 = arith.mulf %587, %581 : vector<16x16xf32>
    %589 = arith.addf %579, %588 : vector<16x16xf32>
    %c0_238 = arith.constant 0 : index
    %c1_239 = arith.constant 1 : index
    %c4_240 = arith.constant 4 : index
    %c6_241 = arith.constant 6 : index
    %590 = vector.load %arg1[%c0_238, %c1_239, %c4_240, %c6_241] : memref<1x4x24x128xf32, #tpu.memory_space<vmem>>, vector<1x1x16x16xf32>
    %591 = vector.shape_cast %590 : vector<1x1x16x16xf32> to vector<16x16xf32>
    %c86 = arith.constant 86 : index
    %592 = memref.load %arg2[%c86] : memref<216xf32, #tpu.memory_space<smem>>
    %593 = vector.broadcast %592 : f32 to vector<16x16xf32>
    %594 = arith.mulf %593, %591 : vector<16x16xf32>
    %595 = arith.addf %585, %594 : vector<16x16xf32>
    %c122 = arith.constant 122 : index
    %596 = memref.load %arg2[%c122] : memref<216xf32, #tpu.memory_space<smem>>
    %597 = vector.broadcast %596 : f32 to vector<16x16xf32>
    %598 = arith.mulf %597, %591 : vector<16x16xf32>
    %599 = arith.addf %589, %598 : vector<16x16xf32>
    %c0_242 = arith.constant 0 : index
    %c2_243 = arith.constant 2 : index
    %c4_244 = arith.constant 4 : index
    %c6_245 = arith.constant 6 : index
    %600 = vector.load %arg1[%c0_242, %c2_243, %c4_244, %c6_245] : memref<1x4x24x128xf32, #tpu.memory_space<vmem>>, vector<1x1x16x16xf32>
    %601 = vector.shape_cast %600 : vector<1x1x16x16xf32> to vector<16x16xf32>
    %c95 = arith.constant 95 : index
    %602 = memref.load %arg2[%c95] : memref<216xf32, #tpu.memory_space<smem>>
    %603 = vector.broadcast %602 : f32 to vector<16x16xf32>
    %604 = arith.mulf %603, %601 : vector<16x16xf32>
    %605 = arith.addf %595, %604 : vector<16x16xf32>
    %c131 = arith.constant 131 : index
    %606 = memref.load %arg2[%c131] : memref<216xf32, #tpu.memory_space<smem>>
    %607 = vector.broadcast %606 : f32 to vector<16x16xf32>
    %608 = arith.mulf %607, %601 : vector<16x16xf32>
    %609 = arith.addf %599, %608 : vector<16x16xf32>
    %c0_246 = arith.constant 0 : index
    %c3_247 = arith.constant 3 : index
    %c4_248 = arith.constant 4 : index
    %c6_249 = arith.constant 6 : index
    %610 = vector.load %arg1[%c0_246, %c3_247, %c4_248, %c6_249] : memref<1x4x24x128xf32, #tpu.memory_space<vmem>>, vector<1x1x16x16xf32>
    %611 = vector.shape_cast %610 : vector<1x1x16x16xf32> to vector<16x16xf32>
    %c104 = arith.constant 104 : index
    %612 = memref.load %arg2[%c104] : memref<216xf32, #tpu.memory_space<smem>>
    %613 = vector.broadcast %612 : f32 to vector<16x16xf32>
    %614 = arith.mulf %613, %611 : vector<16x16xf32>
    %615 = arith.addf %605, %614 : vector<16x16xf32>
    %c140 = arith.constant 140 : index
    %616 = memref.load %arg2[%c140] : memref<216xf32, #tpu.memory_space<smem>>
    %617 = vector.broadcast %616 : f32 to vector<16x16xf32>
    %618 = arith.mulf %617, %611 : vector<16x16xf32>
    %619 = arith.addf %609, %618 : vector<16x16xf32>
    %c0_250 = arith.constant 0 : index
    %c0_251 = arith.constant 0 : index
    %c6_252 = arith.constant 6 : index
    %c2_253 = arith.constant 2 : index
    %620 = vector.load %arg1[%c0_250, %c0_251, %c6_252, %c2_253] : memref<1x4x24x128xf32, #tpu.memory_space<vmem>>, vector<1x1x16x16xf32>
    %621 = vector.shape_cast %620 : vector<1x1x16x16xf32> to vector<16x16xf32>
    %c78 = arith.constant 78 : index
    %622 = memref.load %arg2[%c78] : memref<216xf32, #tpu.memory_space<smem>>
    %623 = vector.broadcast %622 : f32 to vector<16x16xf32>
    %624 = arith.mulf %623, %621 : vector<16x16xf32>
    %625 = arith.addf %615, %624 : vector<16x16xf32>
    %c114 = arith.constant 114 : index
    %626 = memref.load %arg2[%c114] : memref<216xf32, #tpu.memory_space<smem>>
    %627 = vector.broadcast %626 : f32 to vector<16x16xf32>
    %628 = arith.mulf %627, %621 : vector<16x16xf32>
    %629 = arith.addf %619, %628 : vector<16x16xf32>
    %c0_254 = arith.constant 0 : index
    %c1_255 = arith.constant 1 : index
    %c6_256 = arith.constant 6 : index
    %c2_257 = arith.constant 2 : index
    %630 = vector.load %arg1[%c0_254, %c1_255, %c6_256, %c2_257] : memref<1x4x24x128xf32, #tpu.memory_space<vmem>>, vector<1x1x16x16xf32>
    %631 = vector.shape_cast %630 : vector<1x1x16x16xf32> to vector<16x16xf32>
    %c87 = arith.constant 87 : index
    %632 = memref.load %arg2[%c87] : memref<216xf32, #tpu.memory_space<smem>>
    %633 = vector.broadcast %632 : f32 to vector<16x16xf32>
    %634 = arith.mulf %633, %631 : vector<16x16xf32>
    %635 = arith.addf %625, %634 : vector<16x16xf32>
    %c123 = arith.constant 123 : index
    %636 = memref.load %arg2[%c123] : memref<216xf32, #tpu.memory_space<smem>>
    %637 = vector.broadcast %636 : f32 to vector<16x16xf32>
    %638 = arith.mulf %637, %631 : vector<16x16xf32>
    %639 = arith.addf %629, %638 : vector<16x16xf32>
    %c0_258 = arith.constant 0 : index
    %c2_259 = arith.constant 2 : index
    %c6_260 = arith.constant 6 : index
    %c2_261 = arith.constant 2 : index
    %640 = vector.load %arg1[%c0_258, %c2_259, %c6_260, %c2_261] : memref<1x4x24x128xf32, #tpu.memory_space<vmem>>, vector<1x1x16x16xf32>
    %641 = vector.shape_cast %640 : vector<1x1x16x16xf32> to vector<16x16xf32>
    %c96 = arith.constant 96 : index
    %642 = memref.load %arg2[%c96] : memref<216xf32, #tpu.memory_space<smem>>
    %643 = vector.broadcast %642 : f32 to vector<16x16xf32>
    %644 = arith.mulf %643, %641 : vector<16x16xf32>
    %645 = arith.addf %635, %644 : vector<16x16xf32>
    %c132 = arith.constant 132 : index
    %646 = memref.load %arg2[%c132] : memref<216xf32, #tpu.memory_space<smem>>
    %647 = vector.broadcast %646 : f32 to vector<16x16xf32>
    %648 = arith.mulf %647, %641 : vector<16x16xf32>
    %649 = arith.addf %639, %648 : vector<16x16xf32>
    %c0_262 = arith.constant 0 : index
    %c3_263 = arith.constant 3 : index
    %c6_264 = arith.constant 6 : index
    %c2_265 = arith.constant 2 : index
    %650 = vector.load %arg1[%c0_262, %c3_263, %c6_264, %c2_265] : memref<1x4x24x128xf32, #tpu.memory_space<vmem>>, vector<1x1x16x16xf32>
    %651 = vector.shape_cast %650 : vector<1x1x16x16xf32> to vector<16x16xf32>
    %c105 = arith.constant 105 : index
    %652 = memref.load %arg2[%c105] : memref<216xf32, #tpu.memory_space<smem>>
    %653 = vector.broadcast %652 : f32 to vector<16x16xf32>
    %654 = arith.mulf %653, %651 : vector<16x16xf32>
    %655 = arith.addf %645, %654 : vector<16x16xf32>
    %c141 = arith.constant 141 : index
    %656 = memref.load %arg2[%c141] : memref<216xf32, #tpu.memory_space<smem>>
    %657 = vector.broadcast %656 : f32 to vector<16x16xf32>
    %658 = arith.mulf %657, %651 : vector<16x16xf32>
    %659 = arith.addf %649, %658 : vector<16x16xf32>
    %c0_266 = arith.constant 0 : index
    %c0_267 = arith.constant 0 : index
    %c6_268 = arith.constant 6 : index
    %c4_269 = arith.constant 4 : index
    %660 = vector.load %arg1[%c0_266, %c0_267, %c6_268, %c4_269] : memref<1x4x24x128xf32, #tpu.memory_space<vmem>>, vector<1x1x16x16xf32>
    %661 = vector.shape_cast %660 : vector<1x1x16x16xf32> to vector<16x16xf32>
    %c79 = arith.constant 79 : index
    %662 = memref.load %arg2[%c79] : memref<216xf32, #tpu.memory_space<smem>>
    %663 = vector.broadcast %662 : f32 to vector<16x16xf32>
    %664 = arith.mulf %663, %661 : vector<16x16xf32>
    %665 = arith.addf %655, %664 : vector<16x16xf32>
    %c115 = arith.constant 115 : index
    %666 = memref.load %arg2[%c115] : memref<216xf32, #tpu.memory_space<smem>>
    %667 = vector.broadcast %666 : f32 to vector<16x16xf32>
    %668 = arith.mulf %667, %661 : vector<16x16xf32>
    %669 = arith.addf %659, %668 : vector<16x16xf32>
    %c0_270 = arith.constant 0 : index
    %c1_271 = arith.constant 1 : index
    %c6_272 = arith.constant 6 : index
    %c4_273 = arith.constant 4 : index
    %670 = vector.load %arg1[%c0_270, %c1_271, %c6_272, %c4_273] : memref<1x4x24x128xf32, #tpu.memory_space<vmem>>, vector<1x1x16x16xf32>
    %671 = vector.shape_cast %670 : vector<1x1x16x16xf32> to vector<16x16xf32>
    %c88 = arith.constant 88 : index
    %672 = memref.load %arg2[%c88] : memref<216xf32, #tpu.memory_space<smem>>
    %673 = vector.broadcast %672 : f32 to vector<16x16xf32>
    %674 = arith.mulf %673, %671 : vector<16x16xf32>
    %675 = arith.addf %665, %674 : vector<16x16xf32>
    %c124 = arith.constant 124 : index
    %676 = memref.load %arg2[%c124] : memref<216xf32, #tpu.memory_space<smem>>
    %677 = vector.broadcast %676 : f32 to vector<16x16xf32>
    %678 = arith.mulf %677, %671 : vector<16x16xf32>
    %679 = arith.addf %669, %678 : vector<16x16xf32>
    %c0_274 = arith.constant 0 : index
    %c2_275 = arith.constant 2 : index
    %c6_276 = arith.constant 6 : index
    %c4_277 = arith.constant 4 : index
    %680 = vector.load %arg1[%c0_274, %c2_275, %c6_276, %c4_277] : memref<1x4x24x128xf32, #tpu.memory_space<vmem>>, vector<1x1x16x16xf32>
    %681 = vector.shape_cast %680 : vector<1x1x16x16xf32> to vector<16x16xf32>
    %c97 = arith.constant 97 : index
    %682 = memref.load %arg2[%c97] : memref<216xf32, #tpu.memory_space<smem>>
    %683 = vector.broadcast %682 : f32 to vector<16x16xf32>
    %684 = arith.mulf %683, %681 : vector<16x16xf32>
    %685 = arith.addf %675, %684 : vector<16x16xf32>
    %c133 = arith.constant 133 : index
    %686 = memref.load %arg2[%c133] : memref<216xf32, #tpu.memory_space<smem>>
    %687 = vector.broadcast %686 : f32 to vector<16x16xf32>
    %688 = arith.mulf %687, %681 : vector<16x16xf32>
    %689 = arith.addf %679, %688 : vector<16x16xf32>
    %c0_278 = arith.constant 0 : index
    %c3_279 = arith.constant 3 : index
    %c6_280 = arith.constant 6 : index
    %c4_281 = arith.constant 4 : index
    %690 = vector.load %arg1[%c0_278, %c3_279, %c6_280, %c4_281] : memref<1x4x24x128xf32, #tpu.memory_space<vmem>>, vector<1x1x16x16xf32>
    %691 = vector.shape_cast %690 : vector<1x1x16x16xf32> to vector<16x16xf32>
    %c106 = arith.constant 106 : index
    %692 = memref.load %arg2[%c106] : memref<216xf32, #tpu.memory_space<smem>>
    %693 = vector.broadcast %692 : f32 to vector<16x16xf32>
    %694 = arith.mulf %693, %691 : vector<16x16xf32>
    %695 = arith.addf %685, %694 : vector<16x16xf32>
    %c142 = arith.constant 142 : index
    %696 = memref.load %arg2[%c142] : memref<216xf32, #tpu.memory_space<smem>>
    %697 = vector.broadcast %696 : f32 to vector<16x16xf32>
    %698 = arith.mulf %697, %691 : vector<16x16xf32>
    %699 = arith.addf %689, %698 : vector<16x16xf32>
    %c0_282 = arith.constant 0 : index
    %c0_283 = arith.constant 0 : index
    %c6_284 = arith.constant 6 : index
    %c6_285 = arith.constant 6 : index
    %700 = vector.load %arg1[%c0_282, %c0_283, %c6_284, %c6_285] : memref<1x4x24x128xf32, #tpu.memory_space<vmem>>, vector<1x1x16x16xf32>
    %701 = vector.shape_cast %700 : vector<1x1x16x16xf32> to vector<16x16xf32>
    %c80 = arith.constant 80 : index
    %702 = memref.load %arg2[%c80] : memref<216xf32, #tpu.memory_space<smem>>
    %703 = vector.broadcast %702 : f32 to vector<16x16xf32>
    %704 = arith.mulf %703, %701 : vector<16x16xf32>
    %705 = arith.addf %695, %704 : vector<16x16xf32>
    %c116 = arith.constant 116 : index
    %706 = memref.load %arg2[%c116] : memref<216xf32, #tpu.memory_space<smem>>
    %707 = vector.broadcast %706 : f32 to vector<16x16xf32>
    %708 = arith.mulf %707, %701 : vector<16x16xf32>
    %709 = arith.addf %699, %708 : vector<16x16xf32>
    %c0_286 = arith.constant 0 : index
    %c1_287 = arith.constant 1 : index
    %c6_288 = arith.constant 6 : index
    %c6_289 = arith.constant 6 : index
    %710 = vector.load %arg1[%c0_286, %c1_287, %c6_288, %c6_289] : memref<1x4x24x128xf32, #tpu.memory_space<vmem>>, vector<1x1x16x16xf32>
    %711 = vector.shape_cast %710 : vector<1x1x16x16xf32> to vector<16x16xf32>
    %c89 = arith.constant 89 : index
    %712 = memref.load %arg2[%c89] : memref<216xf32, #tpu.memory_space<smem>>
    %713 = vector.broadcast %712 : f32 to vector<16x16xf32>
    %714 = arith.mulf %713, %711 : vector<16x16xf32>
    %715 = arith.addf %705, %714 : vector<16x16xf32>
    %c125 = arith.constant 125 : index
    %716 = memref.load %arg2[%c125] : memref<216xf32, #tpu.memory_space<smem>>
    %717 = vector.broadcast %716 : f32 to vector<16x16xf32>
    %718 = arith.mulf %717, %711 : vector<16x16xf32>
    %719 = arith.addf %709, %718 : vector<16x16xf32>
    %c0_290 = arith.constant 0 : index
    %c2_291 = arith.constant 2 : index
    %c6_292 = arith.constant 6 : index
    %c6_293 = arith.constant 6 : index
    %720 = vector.load %arg1[%c0_290, %c2_291, %c6_292, %c6_293] : memref<1x4x24x128xf32, #tpu.memory_space<vmem>>, vector<1x1x16x16xf32>
    %721 = vector.shape_cast %720 : vector<1x1x16x16xf32> to vector<16x16xf32>
    %c98 = arith.constant 98 : index
    %722 = memref.load %arg2[%c98] : memref<216xf32, #tpu.memory_space<smem>>
    %723 = vector.broadcast %722 : f32 to vector<16x16xf32>
    %724 = arith.mulf %723, %721 : vector<16x16xf32>
    %725 = arith.addf %715, %724 : vector<16x16xf32>
    %c134 = arith.constant 134 : index
    %726 = memref.load %arg2[%c134] : memref<216xf32, #tpu.memory_space<smem>>
    %727 = vector.broadcast %726 : f32 to vector<16x16xf32>
    %728 = arith.mulf %727, %721 : vector<16x16xf32>
    %729 = arith.addf %719, %728 : vector<16x16xf32>
    %c0_294 = arith.constant 0 : index
    %c3_295 = arith.constant 3 : index
    %c6_296 = arith.constant 6 : index
    %c6_297 = arith.constant 6 : index
    %730 = vector.load %arg1[%c0_294, %c3_295, %c6_296, %c6_297] : memref<1x4x24x128xf32, #tpu.memory_space<vmem>>, vector<1x1x16x16xf32>
    %731 = vector.shape_cast %730 : vector<1x1x16x16xf32> to vector<16x16xf32>
    %c107 = arith.constant 107 : index
    %732 = memref.load %arg2[%c107] : memref<216xf32, #tpu.memory_space<smem>>
    %733 = vector.broadcast %732 : f32 to vector<16x16xf32>
    %734 = arith.mulf %733, %731 : vector<16x16xf32>
    %735 = arith.addf %725, %734 : vector<16x16xf32>
    %c143 = arith.constant 143 : index
    %736 = memref.load %arg2[%c143] : memref<216xf32, #tpu.memory_space<smem>>
    %737 = vector.broadcast %736 : f32 to vector<16x16xf32>
    %738 = arith.mulf %737, %731 : vector<16x16xf32>
    %739 = arith.addf %729, %738 : vector<16x16xf32>
    %c2_298 = arith.constant 2 : index
    %740 = memref.load %arg3[%c2_298] : memref<6xf32, #tpu.memory_space<smem>>
    %741 = vector.broadcast %740 : f32 to vector<16x16xf32>
    %742 = arith.addf %735, %741 : vector<16x16xf32>
    %cst_299 = arith.constant 0.000000e+00 : f32
    %743 = vector.broadcast %cst_299 : f32 to vector<16x16xf32>
    %744 = arith.maximumf %742, %743 : vector<16x16xf32>
    %745 = arith.truncf %744 : vector<16x16xf32> to vector<16x16xbf16>
    %c3_300 = arith.constant 3 : index
    %746 = memref.load %arg3[%c3_300] : memref<6xf32, #tpu.memory_space<smem>>
    %747 = vector.broadcast %746 : f32 to vector<16x16xf32>
    %748 = arith.addf %739, %747 : vector<16x16xf32>
    %cst_301 = arith.constant 0.000000e+00 : f32
    %749 = vector.broadcast %cst_301 : f32 to vector<16x16xf32>
    %750 = arith.maximumf %748, %749 : vector<16x16xf32>
    %751 = arith.truncf %750 : vector<16x16xf32> to vector<16x16xbf16>
    %752 = tpu.concatenate %745, %751 in 0 : vector<16x16xbf16>, vector<16x16xbf16> -> vector<32x16xbf16>
    %c0_302 = arith.constant 0 : index
    %c0_303 = arith.constant 0 : index
    %c0_304 = arith.constant 0 : index
    %753 = vector.load %arg5[%c0_302, %c0_303, %c0_304] : memref<1x32x16xbf16, #tpu.memory_space<vmem>>, vector<1x32x16xbf16>
    %754 = vector.shape_cast %753 : vector<1x32x16xbf16> to vector<32x16xbf16>
    %755 = vector.shape_cast %752 : vector<32x16xbf16> to vector<1x32x16xbf16>
    tpu.vector_store %arg5[%c0_302, %c0_303, %c0_304], %755 {strides = array<i32>} : memref<1x32x16xbf16, #tpu.memory_space<vmem>>, vector<1x32x16xbf16>,
    %cst_305 = arith.constant 0.000000e+00 : f32
    %756 = vector.broadcast %cst_305 : f32 to vector<16x16xf32>
    %cst_306 = arith.constant 0.000000e+00 : f32
    %757 = vector.broadcast %cst_306 : f32 to vector<16x16xf32>
    %c0_307 = arith.constant 0 : index
    %c0_308 = arith.constant 0 : index
    %c0_309 = arith.constant 0 : index
    %c0_310 = arith.constant 0 : index
    %758 = vector.load %arg1[%c0_307, %c0_308, %c0_309, %c0_310] : memref<1x4x24x128xf32, #tpu.memory_space<vmem>>, vector<1x1x16x16xf32>
    %759 = vector.shape_cast %758 : vector<1x1x16x16xf32> to vector<16x16xf32>
    %c144 = arith.constant 144 : index
    %760 = memref.load %arg2[%c144] : memref<216xf32, #tpu.memory_space<smem>>
    %761 = vector.broadcast %760 : f32 to vector<16x16xf32>
    %762 = arith.mulf %761, %759 : vector<16x16xf32>
    %763 = arith.addf %756, %762 : vector<16x16xf32>
    %c180 = arith.constant 180 : index
    %764 = memref.load %arg2[%c180] : memref<216xf32, #tpu.memory_space<smem>>
    %765 = vector.broadcast %764 : f32 to vector<16x16xf32>
    %766 = arith.mulf %765, %759 : vector<16x16xf32>
    %767 = arith.addf %757, %766 : vector<16x16xf32>
    %c0_311 = arith.constant 0 : index
    %c1_312 = arith.constant 1 : index
    %c0_313 = arith.constant 0 : index
    %c0_314 = arith.constant 0 : index
    %768 = vector.load %arg1[%c0_311, %c1_312, %c0_313, %c0_314] : memref<1x4x24x128xf32, #tpu.memory_space<vmem>>, vector<1x1x16x16xf32>
    %769 = vector.shape_cast %768 : vector<1x1x16x16xf32> to vector<16x16xf32>
    %c153 = arith.constant 153 : index
    %770 = memref.load %arg2[%c153] : memref<216xf32, #tpu.memory_space<smem>>
    %771 = vector.broadcast %770 : f32 to vector<16x16xf32>
    %772 = arith.mulf %771, %769 : vector<16x16xf32>
    %773 = arith.addf %763, %772 : vector<16x16xf32>
    %c189 = arith.constant 189 : index
    %774 = memref.load %arg2[%c189] : memref<216xf32, #tpu.memory_space<smem>>
    %775 = vector.broadcast %774 : f32 to vector<16x16xf32>
    %776 = arith.mulf %775, %769 : vector<16x16xf32>
    %777 = arith.addf %767, %776 : vector<16x16xf32>
    %c0_315 = arith.constant 0 : index
    %c2_316 = arith.constant 2 : index
    %c0_317 = arith.constant 0 : index
    %c0_318 = arith.constant 0 : index
    %778 = vector.load %arg1[%c0_315, %c2_316, %c0_317, %c0_318] : memref<1x4x24x128xf32, #tpu.memory_space<vmem>>, vector<1x1x16x16xf32>
    %779 = vector.shape_cast %778 : vector<1x1x16x16xf32> to vector<16x16xf32>
    %c162 = arith.constant 162 : index
    %780 = memref.load %arg2[%c162] : memref<216xf32, #tpu.memory_space<smem>>
    %781 = vector.broadcast %780 : f32 to vector<16x16xf32>
    %782 = arith.mulf %781, %779 : vector<16x16xf32>
    %783 = arith.addf %773, %782 : vector<16x16xf32>
    %c198 = arith.constant 198 : index
    %784 = memref.load %arg2[%c198] : memref<216xf32, #tpu.memory_space<smem>>
    %785 = vector.broadcast %784 : f32 to vector<16x16xf32>
    %786 = arith.mulf %785, %779 : vector<16x16xf32>
    %787 = arith.addf %777, %786 : vector<16x16xf32>
    %c0_319 = arith.constant 0 : index
    %c3_320 = arith.constant 3 : index
    %c0_321 = arith.constant 0 : index
    %c0_322 = arith.constant 0 : index
    %788 = vector.load %arg1[%c0_319, %c3_320, %c0_321, %c0_322] : memref<1x4x24x128xf32, #tpu.memory_space<vmem>>, vector<1x1x16x16xf32>
    %789 = vector.shape_cast %788 : vector<1x1x16x16xf32> to vector<16x16xf32>
    %c171 = arith.constant 171 : index
    %790 = memref.load %arg2[%c171] : memref<216xf32, #tpu.memory_space<smem>>
    %791 = vector.broadcast %790 : f32 to vector<16x16xf32>
    %792 = arith.mulf %791, %789 : vector<16x16xf32>
    %793 = arith.addf %783, %792 : vector<16x16xf32>
    %c207 = arith.constant 207 : index
    %794 = memref.load %arg2[%c207] : memref<216xf32, #tpu.memory_space<smem>>
    %795 = vector.broadcast %794 : f32 to vector<16x16xf32>
    %796 = arith.mulf %795, %789 : vector<16x16xf32>
    %797 = arith.addf %787, %796 : vector<16x16xf32>
    %c0_323 = arith.constant 0 : index
    %c0_324 = arith.constant 0 : index
    %c0_325 = arith.constant 0 : index
    %c4_326 = arith.constant 4 : index
    %798 = vector.load %arg1[%c0_323, %c0_324, %c0_325, %c4_326] : memref<1x4x24x128xf32, #tpu.memory_space<vmem>>, vector<1x1x16x16xf32>
    %799 = vector.shape_cast %798 : vector<1x1x16x16xf32> to vector<16x16xf32>
    %c145 = arith.constant 145 : index
    %800 = memref.load %arg2[%c145] : memref<216xf32, #tpu.memory_space<smem>>
    %801 = vector.broadcast %800 : f32 to vector<16x16xf32>
    %802 = arith.mulf %801, %799 : vector<16x16xf32>
    %803 = arith.addf %793, %802 : vector<16x16xf32>
    %c181 = arith.constant 181 : index
    %804 = memref.load %arg2[%c181] : memref<216xf32, #tpu.memory_space<smem>>
    %805 = vector.broadcast %804 : f32 to vector<16x16xf32>
    %806 = arith.mulf %805, %799 : vector<16x16xf32>
    %807 = arith.addf %797, %806 : vector<16x16xf32>
    %c0_327 = arith.constant 0 : index
    %c1_328 = arith.constant 1 : index
    %c0_329 = arith.constant 0 : index
    %c4_330 = arith.constant 4 : index
    %808 = vector.load %arg1[%c0_327, %c1_328, %c0_329, %c4_330] : memref<1x4x24x128xf32, #tpu.memory_space<vmem>>, vector<1x1x16x16xf32>
    %809 = vector.shape_cast %808 : vector<1x1x16x16xf32> to vector<16x16xf32>
    %c154 = arith.constant 154 : index
    %810 = memref.load %arg2[%c154] : memref<216xf32, #tpu.memory_space<smem>>
    %811 = vector.broadcast %810 : f32 to vector<16x16xf32>
    %812 = arith.mulf %811, %809 : vector<16x16xf32>
    %813 = arith.addf %803, %812 : vector<16x16xf32>
    %c190 = arith.constant 190 : index
    %814 = memref.load %arg2[%c190] : memref<216xf32, #tpu.memory_space<smem>>
    %815 = vector.broadcast %814 : f32 to vector<16x16xf32>
    %816 = arith.mulf %815, %809 : vector<16x16xf32>
    %817 = arith.addf %807, %816 : vector<16x16xf32>
    %c0_331 = arith.constant 0 : index
    %c2_332 = arith.constant 2 : index
    %c0_333 = arith.constant 0 : index
    %c4_334 = arith.constant 4 : index
    %818 = vector.load %arg1[%c0_331, %c2_332, %c0_333, %c4_334] : memref<1x4x24x128xf32, #tpu.memory_space<vmem>>, vector<1x1x16x16xf32>
    %819 = vector.shape_cast %818 : vector<1x1x16x16xf32> to vector<16x16xf32>
    %c163 = arith.constant 163 : index
    %820 = memref.load %arg2[%c163] : memref<216xf32, #tpu.memory_space<smem>>
    %821 = vector.broadcast %820 : f32 to vector<16x16xf32>
    %822 = arith.mulf %821, %819 : vector<16x16xf32>
    %823 = arith.addf %813, %822 : vector<16x16xf32>
    %c199 = arith.constant 199 : index
    %824 = memref.load %arg2[%c199] : memref<216xf32, #tpu.memory_space<smem>>
    %825 = vector.broadcast %824 : f32 to vector<16x16xf32>
    %826 = arith.mulf %825, %819 : vector<16x16xf32>
    %827 = arith.addf %817, %826 : vector<16x16xf32>
    %c0_335 = arith.constant 0 : index
    %c3_336 = arith.constant 3 : index
    %c0_337 = arith.constant 0 : index
    %c4_338 = arith.constant 4 : index
    %828 = vector.load %arg1[%c0_335, %c3_336, %c0_337, %c4_338] : memref<1x4x24x128xf32, #tpu.memory_space<vmem>>, vector<1x1x16x16xf32>
    %829 = vector.shape_cast %828 : vector<1x1x16x16xf32> to vector<16x16xf32>
    %c172 = arith.constant 172 : index
    %830 = memref.load %arg2[%c172] : memref<216xf32, #tpu.memory_space<smem>>
    %831 = vector.broadcast %830 : f32 to vector<16x16xf32>
    %832 = arith.mulf %831, %829 : vector<16x16xf32>
    %833 = arith.addf %823, %832 : vector<16x16xf32>
    %c208 = arith.constant 208 : index
    %834 = memref.load %arg2[%c208] : memref<216xf32, #tpu.memory_space<smem>>
    %835 = vector.broadcast %834 : f32 to vector<16x16xf32>
    %836 = arith.mulf %835, %829 : vector<16x16xf32>
    %837 = arith.addf %827, %836 : vector<16x16xf32>
    %c0_339 = arith.constant 0 : index
    %c0_340 = arith.constant 0 : index
    %c0_341 = arith.constant 0 : index
    %c8_342 = arith.constant 8 : index
    %838 = vector.load %arg1[%c0_339, %c0_340, %c0_341, %c8_342] : memref<1x4x24x128xf32, #tpu.memory_space<vmem>>, vector<1x1x16x16xf32>
    %839 = vector.shape_cast %838 : vector<1x1x16x16xf32> to vector<16x16xf32>
    %c146 = arith.constant 146 : index
    %840 = memref.load %arg2[%c146] : memref<216xf32, #tpu.memory_space<smem>>
    %841 = vector.broadcast %840 : f32 to vector<16x16xf32>
    %842 = arith.mulf %841, %839 : vector<16x16xf32>
    %843 = arith.addf %833, %842 : vector<16x16xf32>
    %c182 = arith.constant 182 : index
    %844 = memref.load %arg2[%c182] : memref<216xf32, #tpu.memory_space<smem>>
    %845 = vector.broadcast %844 : f32 to vector<16x16xf32>
    %846 = arith.mulf %845, %839 : vector<16x16xf32>
    %847 = arith.addf %837, %846 : vector<16x16xf32>
    %c0_343 = arith.constant 0 : index
    %c1_344 = arith.constant 1 : index
    %c0_345 = arith.constant 0 : index
    %c8_346 = arith.constant 8 : index
    %848 = vector.load %arg1[%c0_343, %c1_344, %c0_345, %c8_346] : memref<1x4x24x128xf32, #tpu.memory_space<vmem>>, vector<1x1x16x16xf32>
    %849 = vector.shape_cast %848 : vector<1x1x16x16xf32> to vector<16x16xf32>
    %c155 = arith.constant 155 : index
    %850 = memref.load %arg2[%c155] : memref<216xf32, #tpu.memory_space<smem>>
    %851 = vector.broadcast %850 : f32 to vector<16x16xf32>
    %852 = arith.mulf %851, %849 : vector<16x16xf32>
    %853 = arith.addf %843, %852 : vector<16x16xf32>
    %c191 = arith.constant 191 : index
    %854 = memref.load %arg2[%c191] : memref<216xf32, #tpu.memory_space<smem>>
    %855 = vector.broadcast %854 : f32 to vector<16x16xf32>
    %856 = arith.mulf %855, %849 : vector<16x16xf32>
    %857 = arith.addf %847, %856 : vector<16x16xf32>
    %c0_347 = arith.constant 0 : index
    %c2_348 = arith.constant 2 : index
    %c0_349 = arith.constant 0 : index
    %c8_350 = arith.constant 8 : index
    %858 = vector.load %arg1[%c0_347, %c2_348, %c0_349, %c8_350] : memref<1x4x24x128xf32, #tpu.memory_space<vmem>>, vector<1x1x16x16xf32>
    %859 = vector.shape_cast %858 : vector<1x1x16x16xf32> to vector<16x16xf32>
    %c164 = arith.constant 164 : index
    %860 = memref.load %arg2[%c164] : memref<216xf32, #tpu.memory_space<smem>>
    %861 = vector.broadcast %860 : f32 to vector<16x16xf32>
    %862 = arith.mulf %861, %859 : vector<16x16xf32>
    %863 = arith.addf %853, %862 : vector<16x16xf32>
    %c200 = arith.constant 200 : index
    %864 = memref.load %arg2[%c200] : memref<216xf32, #tpu.memory_space<smem>>
    %865 = vector.broadcast %864 : f32 to vector<16x16xf32>
    %866 = arith.mulf %865, %859 : vector<16x16xf32>
    %867 = arith.addf %857, %866 : vector<16x16xf32>
    %c0_351 = arith.constant 0 : index
    %c3_352 = arith.constant 3 : index
    %c0_353 = arith.constant 0 : index
    %c8_354 = arith.constant 8 : index
    %868 = vector.load %arg1[%c0_351, %c3_352, %c0_353, %c8_354] : memref<1x4x24x128xf32, #tpu.memory_space<vmem>>, vector<1x1x16x16xf32>
    %869 = vector.shape_cast %868 : vector<1x1x16x16xf32> to vector<16x16xf32>
    %c173 = arith.constant 173 : index
    %870 = memref.load %arg2[%c173] : memref<216xf32, #tpu.memory_space<smem>>
    %871 = vector.broadcast %870 : f32 to vector<16x16xf32>
    %872 = arith.mulf %871, %869 : vector<16x16xf32>
    %873 = arith.addf %863, %872 : vector<16x16xf32>
    %c209 = arith.constant 209 : index
    %874 = memref.load %arg2[%c209] : memref<216xf32, #tpu.memory_space<smem>>
    %875 = vector.broadcast %874 : f32 to vector<16x16xf32>
    %876 = arith.mulf %875, %869 : vector<16x16xf32>
    %877 = arith.addf %867, %876 : vector<16x16xf32>
    %c0_355 = arith.constant 0 : index
    %c0_356 = arith.constant 0 : index
    %c4_357 = arith.constant 4 : index
    %c0_358 = arith.constant 0 : index
    %878 = vector.load %arg1[%c0_355, %c0_356, %c4_357, %c0_358] : memref<1x4x24x128xf32, #tpu.memory_space<vmem>>, vector<1x1x16x16xf32>
    %879 = vector.shape_cast %878 : vector<1x1x16x16xf32> to vector<16x16xf32>
    %c147 = arith.constant 147 : index
    %880 = memref.load %arg2[%c147] : memref<216xf32, #tpu.memory_space<smem>>
    %881 = vector.broadcast %880 : f32 to vector<16x16xf32>
    %882 = arith.mulf %881, %879 : vector<16x16xf32>
    %883 = arith.addf %873, %882 : vector<16x16xf32>
    %c183 = arith.constant 183 : index
    %884 = memref.load %arg2[%c183] : memref<216xf32, #tpu.memory_space<smem>>
    %885 = vector.broadcast %884 : f32 to vector<16x16xf32>
    %886 = arith.mulf %885, %879 : vector<16x16xf32>
    %887 = arith.addf %877, %886 : vector<16x16xf32>
    %c0_359 = arith.constant 0 : index
    %c1_360 = arith.constant 1 : index
    %c4_361 = arith.constant 4 : index
    %c0_362 = arith.constant 0 : index
    %888 = vector.load %arg1[%c0_359, %c1_360, %c4_361, %c0_362] : memref<1x4x24x128xf32, #tpu.memory_space<vmem>>, vector<1x1x16x16xf32>
    %889 = vector.shape_cast %888 : vector<1x1x16x16xf32> to vector<16x16xf32>
    %c156 = arith.constant 156 : index
    %890 = memref.load %arg2[%c156] : memref<216xf32, #tpu.memory_space<smem>>
    %891 = vector.broadcast %890 : f32 to vector<16x16xf32>
    %892 = arith.mulf %891, %889 : vector<16x16xf32>
    %893 = arith.addf %883, %892 : vector<16x16xf32>
    %c192 = arith.constant 192 : index
    %894 = memref.load %arg2[%c192] : memref<216xf32, #tpu.memory_space<smem>>
    %895 = vector.broadcast %894 : f32 to vector<16x16xf32>
    %896 = arith.mulf %895, %889 : vector<16x16xf32>
    %897 = arith.addf %887, %896 : vector<16x16xf32>
    %c0_363 = arith.constant 0 : index
    %c2_364 = arith.constant 2 : index
    %c4_365 = arith.constant 4 : index
    %c0_366 = arith.constant 0 : index
    %898 = vector.load %arg1[%c0_363, %c2_364, %c4_365, %c0_366] : memref<1x4x24x128xf32, #tpu.memory_space<vmem>>, vector<1x1x16x16xf32>
    %899 = vector.shape_cast %898 : vector<1x1x16x16xf32> to vector<16x16xf32>
    %c165 = arith.constant 165 : index
    %900 = memref.load %arg2[%c165] : memref<216xf32, #tpu.memory_space<smem>>
    %901 = vector.broadcast %900 : f32 to vector<16x16xf32>
    %902 = arith.mulf %901, %899 : vector<16x16xf32>
    %903 = arith.addf %893, %902 : vector<16x16xf32>
    %c201 = arith.constant 201 : index
    %904 = memref.load %arg2[%c201] : memref<216xf32, #tpu.memory_space<smem>>
    %905 = vector.broadcast %904 : f32 to vector<16x16xf32>
    %906 = arith.mulf %905, %899 : vector<16x16xf32>
    %907 = arith.addf %897, %906 : vector<16x16xf32>
    %c0_367 = arith.constant 0 : index
    %c3_368 = arith.constant 3 : index
    %c4_369 = arith.constant 4 : index
    %c0_370 = arith.constant 0 : index
    %908 = vector.load %arg1[%c0_367, %c3_368, %c4_369, %c0_370] : memref<1x4x24x128xf32, #tpu.memory_space<vmem>>, vector<1x1x16x16xf32>
    %909 = vector.shape_cast %908 : vector<1x1x16x16xf32> to vector<16x16xf32>
    %c174 = arith.constant 174 : index
    %910 = memref.load %arg2[%c174] : memref<216xf32, #tpu.memory_space<smem>>
    %911 = vector.broadcast %910 : f32 to vector<16x16xf32>
    %912 = arith.mulf %911, %909 : vector<16x16xf32>
    %913 = arith.addf %903, %912 : vector<16x16xf32>
    %c210 = arith.constant 210 : index
    %914 = memref.load %arg2[%c210] : memref<216xf32, #tpu.memory_space<smem>>
    %915 = vector.broadcast %914 : f32 to vector<16x16xf32>
    %916 = arith.mulf %915, %909 : vector<16x16xf32>
    %917 = arith.addf %907, %916 : vector<16x16xf32>
    %c0_371 = arith.constant 0 : index
    %c0_372 = arith.constant 0 : index
    %c4_373 = arith.constant 4 : index
    %c4_374 = arith.constant 4 : index
    %918 = vector.load %arg1[%c0_371, %c0_372, %c4_373, %c4_374] : memref<1x4x24x128xf32, #tpu.memory_space<vmem>>, vector<1x1x16x16xf32>
    %919 = vector.shape_cast %918 : vector<1x1x16x16xf32> to vector<16x16xf32>
    %c148 = arith.constant 148 : index
    %920 = memref.load %arg2[%c148] : memref<216xf32, #tpu.memory_space<smem>>
    %921 = vector.broadcast %920 : f32 to vector<16x16xf32>
    %922 = arith.mulf %921, %919 : vector<16x16xf32>
    %923 = arith.addf %913, %922 : vector<16x16xf32>
    %c184 = arith.constant 184 : index
    %924 = memref.load %arg2[%c184] : memref<216xf32, #tpu.memory_space<smem>>
    %925 = vector.broadcast %924 : f32 to vector<16x16xf32>
    %926 = arith.mulf %925, %919 : vector<16x16xf32>
    %927 = arith.addf %917, %926 : vector<16x16xf32>
    %c0_375 = arith.constant 0 : index
    %c1_376 = arith.constant 1 : index
    %c4_377 = arith.constant 4 : index
    %c4_378 = arith.constant 4 : index
    %928 = vector.load %arg1[%c0_375, %c1_376, %c4_377, %c4_378] : memref<1x4x24x128xf32, #tpu.memory_space<vmem>>, vector<1x1x16x16xf32>
    %929 = vector.shape_cast %928 : vector<1x1x16x16xf32> to vector<16x16xf32>
    %c157 = arith.constant 157 : index
    %930 = memref.load %arg2[%c157] : memref<216xf32, #tpu.memory_space<smem>>
    %931 = vector.broadcast %930 : f32 to vector<16x16xf32>
    %932 = arith.mulf %931, %929 : vector<16x16xf32>
    %933 = arith.addf %923, %932 : vector<16x16xf32>
    %c193 = arith.constant 193 : index
    %934 = memref.load %arg2[%c193] : memref<216xf32, #tpu.memory_space<smem>>
    %935 = vector.broadcast %934 : f32 to vector<16x16xf32>
    %936 = arith.mulf %935, %929 : vector<16x16xf32>
    %937 = arith.addf %927, %936 : vector<16x16xf32>
    %c0_379 = arith.constant 0 : index
    %c2_380 = arith.constant 2 : index
    %c4_381 = arith.constant 4 : index
    %c4_382 = arith.constant 4 : index
    %938 = vector.load %arg1[%c0_379, %c2_380, %c4_381, %c4_382] : memref<1x4x24x128xf32, #tpu.memory_space<vmem>>, vector<1x1x16x16xf32>
    %939 = vector.shape_cast %938 : vector<1x1x16x16xf32> to vector<16x16xf32>
    %c166 = arith.constant 166 : index
    %940 = memref.load %arg2[%c166] : memref<216xf32, #tpu.memory_space<smem>>
    %941 = vector.broadcast %940 : f32 to vector<16x16xf32>
    %942 = arith.mulf %941, %939 : vector<16x16xf32>
    %943 = arith.addf %933, %942 : vector<16x16xf32>
    %c202 = arith.constant 202 : index
    %944 = memref.load %arg2[%c202] : memref<216xf32, #tpu.memory_space<smem>>
    %945 = vector.broadcast %944 : f32 to vector<16x16xf32>
    %946 = arith.mulf %945, %939 : vector<16x16xf32>
    %947 = arith.addf %937, %946 : vector<16x16xf32>
    %c0_383 = arith.constant 0 : index
    %c3_384 = arith.constant 3 : index
    %c4_385 = arith.constant 4 : index
    %c4_386 = arith.constant 4 : index
    %948 = vector.load %arg1[%c0_383, %c3_384, %c4_385, %c4_386] : memref<1x4x24x128xf32, #tpu.memory_space<vmem>>, vector<1x1x16x16xf32>
    %949 = vector.shape_cast %948 : vector<1x1x16x16xf32> to vector<16x16xf32>
    %c175 = arith.constant 175 : index
    %950 = memref.load %arg2[%c175] : memref<216xf32, #tpu.memory_space<smem>>
    %951 = vector.broadcast %950 : f32 to vector<16x16xf32>
    %952 = arith.mulf %951, %949 : vector<16x16xf32>
    %953 = arith.addf %943, %952 : vector<16x16xf32>
    %c211 = arith.constant 211 : index
    %954 = memref.load %arg2[%c211] : memref<216xf32, #tpu.memory_space<smem>>
    %955 = vector.broadcast %954 : f32 to vector<16x16xf32>
    %956 = arith.mulf %955, %949 : vector<16x16xf32>
    %957 = arith.addf %947, %956 : vector<16x16xf32>
    %c0_387 = arith.constant 0 : index
    %c0_388 = arith.constant 0 : index
    %c4_389 = arith.constant 4 : index
    %c8_390 = arith.constant 8 : index
    %958 = vector.load %arg1[%c0_387, %c0_388, %c4_389, %c8_390] : memref<1x4x24x128xf32, #tpu.memory_space<vmem>>, vector<1x1x16x16xf32>
    %959 = vector.shape_cast %958 : vector<1x1x16x16xf32> to vector<16x16xf32>
    %c149 = arith.constant 149 : index
    %960 = memref.load %arg2[%c149] : memref<216xf32, #tpu.memory_space<smem>>
    %961 = vector.broadcast %960 : f32 to vector<16x16xf32>
    %962 = arith.mulf %961, %959 : vector<16x16xf32>
    %963 = arith.addf %953, %962 : vector<16x16xf32>
    %c185 = arith.constant 185 : index
    %964 = memref.load %arg2[%c185] : memref<216xf32, #tpu.memory_space<smem>>
    %965 = vector.broadcast %964 : f32 to vector<16x16xf32>
    %966 = arith.mulf %965, %959 : vector<16x16xf32>
    %967 = arith.addf %957, %966 : vector<16x16xf32>
    %c0_391 = arith.constant 0 : index
    %c1_392 = arith.constant 1 : index
    %c4_393 = arith.constant 4 : index
    %c8_394 = arith.constant 8 : index
    %968 = vector.load %arg1[%c0_391, %c1_392, %c4_393, %c8_394] : memref<1x4x24x128xf32, #tpu.memory_space<vmem>>, vector<1x1x16x16xf32>
    %969 = vector.shape_cast %968 : vector<1x1x16x16xf32> to vector<16x16xf32>
    %c158 = arith.constant 158 : index
    %970 = memref.load %arg2[%c158] : memref<216xf32, #tpu.memory_space<smem>>
    %971 = vector.broadcast %970 : f32 to vector<16x16xf32>
    %972 = arith.mulf %971, %969 : vector<16x16xf32>
    %973 = arith.addf %963, %972 : vector<16x16xf32>
    %c194 = arith.constant 194 : index
    %974 = memref.load %arg2[%c194] : memref<216xf32, #tpu.memory_space<smem>>
    %975 = vector.broadcast %974 : f32 to vector<16x16xf32>
    %976 = arith.mulf %975, %969 : vector<16x16xf32>
    %977 = arith.addf %967, %976 : vector<16x16xf32>
    %c0_395 = arith.constant 0 : index
    %c2_396 = arith.constant 2 : index
    %c4_397 = arith.constant 4 : index
    %c8_398 = arith.constant 8 : index
    %978 = vector.load %arg1[%c0_395, %c2_396, %c4_397, %c8_398] : memref<1x4x24x128xf32, #tpu.memory_space<vmem>>, vector<1x1x16x16xf32>
    %979 = vector.shape_cast %978 : vector<1x1x16x16xf32> to vector<16x16xf32>
    %c167 = arith.constant 167 : index
    %980 = memref.load %arg2[%c167] : memref<216xf32, #tpu.memory_space<smem>>
    %981 = vector.broadcast %980 : f32 to vector<16x16xf32>
    %982 = arith.mulf %981, %979 : vector<16x16xf32>
    %983 = arith.addf %973, %982 : vector<16x16xf32>
    %c203 = arith.constant 203 : index
    %984 = memref.load %arg2[%c203] : memref<216xf32, #tpu.memory_space<smem>>
    %985 = vector.broadcast %984 : f32 to vector<16x16xf32>
    %986 = arith.mulf %985, %979 : vector<16x16xf32>
    %987 = arith.addf %977, %986 : vector<16x16xf32>
    %c0_399 = arith.constant 0 : index
    %c3_400 = arith.constant 3 : index
    %c4_401 = arith.constant 4 : index
    %c8_402 = arith.constant 8 : index
    %988 = vector.load %arg1[%c0_399, %c3_400, %c4_401, %c8_402] : memref<1x4x24x128xf32, #tpu.memory_space<vmem>>, vector<1x1x16x16xf32>
    %989 = vector.shape_cast %988 : vector<1x1x16x16xf32> to vector<16x16xf32>
    %c176 = arith.constant 176 : index
    %990 = memref.load %arg2[%c176] : memref<216xf32, #tpu.memory_space<smem>>
    %991 = vector.broadcast %990 : f32 to vector<16x16xf32>
    %992 = arith.mulf %991, %989 : vector<16x16xf32>
    %993 = arith.addf %983, %992 : vector<16x16xf32>
    %c212 = arith.constant 212 : index
    %994 = memref.load %arg2[%c212] : memref<216xf32, #tpu.memory_space<smem>>
    %995 = vector.broadcast %994 : f32 to vector<16x16xf32>
    %996 = arith.mulf %995, %989 : vector<16x16xf32>
    %997 = arith.addf %987, %996 : vector<16x16xf32>
    %c0_403 = arith.constant 0 : index
    %c0_404 = arith.constant 0 : index
    %c8_405 = arith.constant 8 : index
    %c0_406 = arith.constant 0 : index
    %998 = vector.load %arg1[%c0_403, %c0_404, %c8_405, %c0_406] : memref<1x4x24x128xf32, #tpu.memory_space<vmem>>, vector<1x1x16x16xf32>
    %999 = vector.shape_cast %998 : vector<1x1x16x16xf32> to vector<16x16xf32>
    %c150 = arith.constant 150 : index
    %1000 = memref.load %arg2[%c150] : memref<216xf32, #tpu.memory_space<smem>>
    %1001 = vector.broadcast %1000 : f32 to vector<16x16xf32>
    %1002 = arith.mulf %1001, %999 : vector<16x16xf32>
    %1003 = arith.addf %993, %1002 : vector<16x16xf32>
    %c186 = arith.constant 186 : index
    %1004 = memref.load %arg2[%c186] : memref<216xf32, #tpu.memory_space<smem>>
    %1005 = vector.broadcast %1004 : f32 to vector<16x16xf32>
    %1006 = arith.mulf %1005, %999 : vector<16x16xf32>
    %1007 = arith.addf %997, %1006 : vector<16x16xf32>
    %c0_407 = arith.constant 0 : index
    %c1_408 = arith.constant 1 : index
    %c8_409 = arith.constant 8 : index
    %c0_410 = arith.constant 0 : index
    %1008 = vector.load %arg1[%c0_407, %c1_408, %c8_409, %c0_410] : memref<1x4x24x128xf32, #tpu.memory_space<vmem>>, vector<1x1x16x16xf32>
    %1009 = vector.shape_cast %1008 : vector<1x1x16x16xf32> to vector<16x16xf32>
    %c159 = arith.constant 159 : index
    %1010 = memref.load %arg2[%c159] : memref<216xf32, #tpu.memory_space<smem>>
    %1011 = vector.broadcast %1010 : f32 to vector<16x16xf32>
    %1012 = arith.mulf %1011, %1009 : vector<16x16xf32>
    %1013 = arith.addf %1003, %1012 : vector<16x16xf32>
    %c195 = arith.constant 195 : index
    %1014 = memref.load %arg2[%c195] : memref<216xf32, #tpu.memory_space<smem>>
    %1015 = vector.broadcast %1014 : f32 to vector<16x16xf32>
    %1016 = arith.mulf %1015, %1009 : vector<16x16xf32>
    %1017 = arith.addf %1007, %1016 : vector<16x16xf32>
    %c0_411 = arith.constant 0 : index
    %c2_412 = arith.constant 2 : index
    %c8_413 = arith.constant 8 : index
    %c0_414 = arith.constant 0 : index
    %1018 = vector.load %arg1[%c0_411, %c2_412, %c8_413, %c0_414] : memref<1x4x24x128xf32, #tpu.memory_space<vmem>>, vector<1x1x16x16xf32>
    %1019 = vector.shape_cast %1018 : vector<1x1x16x16xf32> to vector<16x16xf32>
    %c168 = arith.constant 168 : index
    %1020 = memref.load %arg2[%c168] : memref<216xf32, #tpu.memory_space<smem>>
    %1021 = vector.broadcast %1020 : f32 to vector<16x16xf32>
    %1022 = arith.mulf %1021, %1019 : vector<16x16xf32>
    %1023 = arith.addf %1013, %1022 : vector<16x16xf32>
    %c204 = arith.constant 204 : index
    %1024 = memref.load %arg2[%c204] : memref<216xf32, #tpu.memory_space<smem>>
    %1025 = vector.broadcast %1024 : f32 to vector<16x16xf32>
    %1026 = arith.mulf %1025, %1019 : vector<16x16xf32>
    %1027 = arith.addf %1017, %1026 : vector<16x16xf32>
    %c0_415 = arith.constant 0 : index
    %c3_416 = arith.constant 3 : index
    %c8_417 = arith.constant 8 : index
    %c0_418 = arith.constant 0 : index
    %1028 = vector.load %arg1[%c0_415, %c3_416, %c8_417, %c0_418] : memref<1x4x24x128xf32, #tpu.memory_space<vmem>>, vector<1x1x16x16xf32>
    %1029 = vector.shape_cast %1028 : vector<1x1x16x16xf32> to vector<16x16xf32>
    %c177 = arith.constant 177 : index
    %1030 = memref.load %arg2[%c177] : memref<216xf32, #tpu.memory_space<smem>>
    %1031 = vector.broadcast %1030 : f32 to vector<16x16xf32>
    %1032 = arith.mulf %1031, %1029 : vector<16x16xf32>
    %1033 = arith.addf %1023, %1032 : vector<16x16xf32>
    %c213 = arith.constant 213 : index
    %1034 = memref.load %arg2[%c213] : memref<216xf32, #tpu.memory_space<smem>>
    %1035 = vector.broadcast %1034 : f32 to vector<16x16xf32>
    %1036 = arith.mulf %1035, %1029 : vector<16x16xf32>
    %1037 = arith.addf %1027, %1036 : vector<16x16xf32>
    %c0_419 = arith.constant 0 : index
    %c0_420 = arith.constant 0 : index
    %c8_421 = arith.constant 8 : index
    %c4_422 = arith.constant 4 : index
    %1038 = vector.load %arg1[%c0_419, %c0_420, %c8_421, %c4_422] : memref<1x4x24x128xf32, #tpu.memory_space<vmem>>, vector<1x1x16x16xf32>
    %1039 = vector.shape_cast %1038 : vector<1x1x16x16xf32> to vector<16x16xf32>
    %c151 = arith.constant 151 : index
    %1040 = memref.load %arg2[%c151] : memref<216xf32, #tpu.memory_space<smem>>
    %1041 = vector.broadcast %1040 : f32 to vector<16x16xf32>
    %1042 = arith.mulf %1041, %1039 : vector<16x16xf32>
    %1043 = arith.addf %1033, %1042 : vector<16x16xf32>
    %c187 = arith.constant 187 : index
    %1044 = memref.load %arg2[%c187] : memref<216xf32, #tpu.memory_space<smem>>
    %1045 = vector.broadcast %1044 : f32 to vector<16x16xf32>
    %1046 = arith.mulf %1045, %1039 : vector<16x16xf32>
    %1047 = arith.addf %1037, %1046 : vector<16x16xf32>
    %c0_423 = arith.constant 0 : index
    %c1_424 = arith.constant 1 : index
    %c8_425 = arith.constant 8 : index
    %c4_426 = arith.constant 4 : index
    %1048 = vector.load %arg1[%c0_423, %c1_424, %c8_425, %c4_426] : memref<1x4x24x128xf32, #tpu.memory_space<vmem>>, vector<1x1x16x16xf32>
    %1049 = vector.shape_cast %1048 : vector<1x1x16x16xf32> to vector<16x16xf32>
    %c160 = arith.constant 160 : index
    %1050 = memref.load %arg2[%c160] : memref<216xf32, #tpu.memory_space<smem>>
    %1051 = vector.broadcast %1050 : f32 to vector<16x16xf32>
    %1052 = arith.mulf %1051, %1049 : vector<16x16xf32>
    %1053 = arith.addf %1043, %1052 : vector<16x16xf32>
    %c196 = arith.constant 196 : index
    %1054 = memref.load %arg2[%c196] : memref<216xf32, #tpu.memory_space<smem>>
    %1055 = vector.broadcast %1054 : f32 to vector<16x16xf32>
    %1056 = arith.mulf %1055, %1049 : vector<16x16xf32>
    %1057 = arith.addf %1047, %1056 : vector<16x16xf32>
    %c0_427 = arith.constant 0 : index
    %c2_428 = arith.constant 2 : index
    %c8_429 = arith.constant 8 : index
    %c4_430 = arith.constant 4 : index
    %1058 = vector.load %arg1[%c0_427, %c2_428, %c8_429, %c4_430] : memref<1x4x24x128xf32, #tpu.memory_space<vmem>>, vector<1x1x16x16xf32>
    %1059 = vector.shape_cast %1058 : vector<1x1x16x16xf32> to vector<16x16xf32>
    %c169 = arith.constant 169 : index
    %1060 = memref.load %arg2[%c169] : memref<216xf32, #tpu.memory_space<smem>>
    %1061 = vector.broadcast %1060 : f32 to vector<16x16xf32>
    %1062 = arith.mulf %1061, %1059 : vector<16x16xf32>
    %1063 = arith.addf %1053, %1062 : vector<16x16xf32>
    %c205 = arith.constant 205 : index
    %1064 = memref.load %arg2[%c205] : memref<216xf32, #tpu.memory_space<smem>>
    %1065 = vector.broadcast %1064 : f32 to vector<16x16xf32>
    %1066 = arith.mulf %1065, %1059 : vector<16x16xf32>
    %1067 = arith.addf %1057, %1066 : vector<16x16xf32>
    %c0_431 = arith.constant 0 : index
    %c3_432 = arith.constant 3 : index
    %c8_433 = arith.constant 8 : index
    %c4_434 = arith.constant 4 : index
    %1068 = vector.load %arg1[%c0_431, %c3_432, %c8_433, %c4_434] : memref<1x4x24x128xf32, #tpu.memory_space<vmem>>, vector<1x1x16x16xf32>
    %1069 = vector.shape_cast %1068 : vector<1x1x16x16xf32> to vector<16x16xf32>
    %c178 = arith.constant 178 : index
    %1070 = memref.load %arg2[%c178] : memref<216xf32, #tpu.memory_space<smem>>
    %1071 = vector.broadcast %1070 : f32 to vector<16x16xf32>
    %1072 = arith.mulf %1071, %1069 : vector<16x16xf32>
    %1073 = arith.addf %1063, %1072 : vector<16x16xf32>
    %c214 = arith.constant 214 : index
    %1074 = memref.load %arg2[%c214] : memref<216xf32, #tpu.memory_space<smem>>
    %1075 = vector.broadcast %1074 : f32 to vector<16x16xf32>
    %1076 = arith.mulf %1075, %1069 : vector<16x16xf32>
    %1077 = arith.addf %1067, %1076 : vector<16x16xf32>
    %c0_435 = arith.constant 0 : index
    %c0_436 = arith.constant 0 : index
    %c8_437 = arith.constant 8 : index
    %c8_438 = arith.constant 8 : index
    %1078 = vector.load %arg1[%c0_435, %c0_436, %c8_437, %c8_438] : memref<1x4x24x128xf32, #tpu.memory_space<vmem>>, vector<1x1x16x16xf32>
    %1079 = vector.shape_cast %1078 : vector<1x1x16x16xf32> to vector<16x16xf32>
    %c152 = arith.constant 152 : index
    %1080 = memref.load %arg2[%c152] : memref<216xf32, #tpu.memory_space<smem>>
    %1081 = vector.broadcast %1080 : f32 to vector<16x16xf32>
    %1082 = arith.mulf %1081, %1079 : vector<16x16xf32>
    %1083 = arith.addf %1073, %1082 : vector<16x16xf32>
    %c188 = arith.constant 188 : index
    %1084 = memref.load %arg2[%c188] : memref<216xf32, #tpu.memory_space<smem>>
    %1085 = vector.broadcast %1084 : f32 to vector<16x16xf32>
    %1086 = arith.mulf %1085, %1079 : vector<16x16xf32>
    %1087 = arith.addf %1077, %1086 : vector<16x16xf32>
    %c0_439 = arith.constant 0 : index
    %c1_440 = arith.constant 1 : index
    %c8_441 = arith.constant 8 : index
    %c8_442 = arith.constant 8 : index
    %1088 = vector.load %arg1[%c0_439, %c1_440, %c8_441, %c8_442] : memref<1x4x24x128xf32, #tpu.memory_space<vmem>>, vector<1x1x16x16xf32>
    %1089 = vector.shape_cast %1088 : vector<1x1x16x16xf32> to vector<16x16xf32>
    %c161 = arith.constant 161 : index
    %1090 = memref.load %arg2[%c161] : memref<216xf32, #tpu.memory_space<smem>>
    %1091 = vector.broadcast %1090 : f32 to vector<16x16xf32>
    %1092 = arith.mulf %1091, %1089 : vector<16x16xf32>
    %1093 = arith.addf %1083, %1092 : vector<16x16xf32>
    %c197 = arith.constant 197 : index
    %1094 = memref.load %arg2[%c197] : memref<216xf32, #tpu.memory_space<smem>>
    %1095 = vector.broadcast %1094 : f32 to vector<16x16xf32>
    %1096 = arith.mulf %1095, %1089 : vector<16x16xf32>
    %1097 = arith.addf %1087, %1096 : vector<16x16xf32>
    %c0_443 = arith.constant 0 : index
    %c2_444 = arith.constant 2 : index
    %c8_445 = arith.constant 8 : index
    %c8_446 = arith.constant 8 : index
    %1098 = vector.load %arg1[%c0_443, %c2_444, %c8_445, %c8_446] : memref<1x4x24x128xf32, #tpu.memory_space<vmem>>, vector<1x1x16x16xf32>
    %1099 = vector.shape_cast %1098 : vector<1x1x16x16xf32> to vector<16x16xf32>
    %c170 = arith.constant 170 : index
    %1100 = memref.load %arg2[%c170] : memref<216xf32, #tpu.memory_space<smem>>
    %1101 = vector.broadcast %1100 : f32 to vector<16x16xf32>
    %1102 = arith.mulf %1101, %1099 : vector<16x16xf32>
    %1103 = arith.addf %1093, %1102 : vector<16x16xf32>
    %c206 = arith.constant 206 : index
    %1104 = memref.load %arg2[%c206] : memref<216xf32, #tpu.memory_space<smem>>
    %1105 = vector.broadcast %1104 : f32 to vector<16x16xf32>
    %1106 = arith.mulf %1105, %1099 : vector<16x16xf32>
    %1107 = arith.addf %1097, %1106 : vector<16x16xf32>
    %c0_447 = arith.constant 0 : index
    %c3_448 = arith.constant 3 : index
    %c8_449 = arith.constant 8 : index
    %c8_450 = arith.constant 8 : index
    %1108 = vector.load %arg1[%c0_447, %c3_448, %c8_449, %c8_450] : memref<1x4x24x128xf32, #tpu.memory_space<vmem>>, vector<1x1x16x16xf32>
    %1109 = vector.shape_cast %1108 : vector<1x1x16x16xf32> to vector<16x16xf32>
    %c179 = arith.constant 179 : index
    %1110 = memref.load %arg2[%c179] : memref<216xf32, #tpu.memory_space<smem>>
    %1111 = vector.broadcast %1110 : f32 to vector<16x16xf32>
    %1112 = arith.mulf %1111, %1109 : vector<16x16xf32>
    %1113 = arith.addf %1103, %1112 : vector<16x16xf32>
    %c215 = arith.constant 215 : index
    %1114 = memref.load %arg2[%c215] : memref<216xf32, #tpu.memory_space<smem>>
    %1115 = vector.broadcast %1114 : f32 to vector<16x16xf32>
    %1116 = arith.mulf %1115, %1109 : vector<16x16xf32>
    %1117 = arith.addf %1107, %1116 : vector<16x16xf32>
    %c4_451 = arith.constant 4 : index
    %1118 = memref.load %arg3[%c4_451] : memref<6xf32, #tpu.memory_space<smem>>
    %1119 = vector.broadcast %1118 : f32 to vector<16x16xf32>
    %1120 = arith.addf %1113, %1119 : vector<16x16xf32>
    %cst_452 = arith.constant 0.000000e+00 : f32
    %1121 = vector.broadcast %cst_452 : f32 to vector<16x16xf32>
    %1122 = arith.maximumf %1120, %1121 : vector<16x16xf32>
    %1123 = arith.truncf %1122 : vector<16x16xf32> to vector<16x16xbf16>
    %c5_453 = arith.constant 5 : index
    %1124 = memref.load %arg3[%c5_453] : memref<6xf32, #tpu.memory_space<smem>>
    %1125 = vector.broadcast %1124 : f32 to vector<16x16xf32>
    %1126 = arith.addf %1117, %1125 : vector<16x16xf32>
    %cst_454 = arith.constant 0.000000e+00 : f32
    %1127 = vector.broadcast %cst_454 : f32 to vector<16x16xf32>
    %1128 = arith.maximumf %1126, %1127 : vector<16x16xf32>
    %1129 = arith.truncf %1128 : vector<16x16xf32> to vector<16x16xbf16>
    %1130 = tpu.concatenate %1123, %1129 in 0 : vector<16x16xbf16>, vector<16x16xbf16> -> vector<32x16xbf16>
    %c0_455 = arith.constant 0 : index
    %c0_456 = arith.constant 0 : index
    %c0_457 = arith.constant 0 : index
    %1131 = vector.load %arg6[%c0_455, %c0_456, %c0_457] : memref<1x32x16xbf16, #tpu.memory_space<vmem>>, vector<1x32x16xbf16>
    %1132 = vector.shape_cast %1131 : vector<1x32x16xbf16> to vector<32x16xbf16>
    %1133 = vector.shape_cast %1130 : vector<32x16xbf16> to vector<1x32x16xbf16>
    tpu.vector_store %arg6[%c0_455, %c0_456, %c0_457], %1133 {strides = array<i32>} : memref<1x32x16xbf16, #tpu.memory_space<vmem>>, vector<1x32x16xbf16>,
    return
  }
  func.func @transform_0(%arg0: i32) -> (i32, i32, i32, i32) {
    %c0_i32 = arith.constant 0 : i32
    %c0_i32_0 = arith.constant 0 : i32
    %c0_i32_1 = arith.constant 0 : i32
    %c0_i32_2 = arith.constant 0 : i32
    return %arg0, %c0_i32, %c0_i32_0, %c0_i32_1 : i32, i32, i32, i32
  }
  func.func @transform_1(%arg0: i32) -> i32 {
    %c0_i32 = arith.constant 0 : i32
    %c0_i32_0 = arith.constant 0 : i32
    return %c0_i32 : i32
  }
  func.func @transform_2(%arg0: i32) -> i32 {
    %c0_i32 = arith.constant 0 : i32
    %c0_i32_0 = arith.constant 0 : i32
    return %c0_i32 : i32
  }
  func.func @transform_3(%arg0: i32) -> (i32, i32, i32) {
    %c0_i32 = arith.constant 0 : i32
    %c0_i32_0 = arith.constant 0 : i32
    %c0_i32_1 = arith.constant 0 : i32
    return %arg0, %c0_i32, %c0_i32_0 : i32, i32, i32
  }
  func.func @transform_4(%arg0: i32) -> (i32, i32, i32) {
    %c0_i32 = arith.constant 0 : i32
    %c0_i32_0 = arith.constant 0 : i32
    %c0_i32_1 = arith.constant 0 : i32
    return %arg0, %c0_i32, %c0_i32_0 : i32, i32, i32
  }
  func.func @transform_5(%arg0: i32) -> (i32, i32, i32) {
    %c0_i32 = arith.constant 0 : i32
    %c0_i32_0 = arith.constant 0 : i32
    %c0_i32_1 = arith.constant 0 : i32
    return %arg0, %c0_i32, %c0_i32_0 : i32, i32, i32
  }
}

</mosaic_0001>

<bundles_post_ra>
// kernel: tpu_custom_call.1
= control target key start
LH: loop header
LB: loop body
LE: loop exit
PB: predicated region body
PF: predicated region fallthrough
CT: control target
= control target key end

     0   :  { %11 = vsyncpa [#allocation3], 0  ;;  %s5535_s0 = inlined_call_operand.hbm [shape: f32[2,4,24,128], index: 0, kind: input, shape index: {}]   ;;  %s5536_s1 = inlined_call_operand.hbm [shape: f32[216], index: 1, kind: input, shape index: {}]   ;;  %s5537_s2 = inlined_call_operand.vmem [shape: f32[6], index: 2, kind: input, shape index: {}]   ;;  %s5538_s3 = inlined_call_operand.vmem [shape: bf16[2,32,16], index: 3, kind: output, shape index: {0}]   ;;  %s5539_s4 = inlined_call_operand.vmem [shape: bf16[2,32,16], index: 4, kind: output, shape index: {1}]   ;;  %s5540_s5 = inlined_call_operand.vmem [shape: bf16[2,32,16], index: 5, kind: output, shape index: {2}]  }
   0x1   :  { %13 = vsyncpa [#allocation3 + $0x1], 0 }
   0x2   :  { %14 = vsyncpa [#allocation4], 0 }
   0x3   :  { %15 = vsyncpa [#allocation5], 0  ;;  %s3615_s18 = smov 0   ;;  %s3617_s19 = smov 0  }
   0x4   :  { %s3619_s20 = smov 0   ;;  %s3621_s21 = smov 0  }
   0x5 LB: > { %s3634_s22 = sadd.s32 4294967295, %s3574_s21   ;;  %s3637_s23 = sadd.s32 1, %s3574_s21   ;;  %s3574_s21 = sphi %s3621_s21, %s5688_s21   ;;  %s3570_s20 = sphi %s3619_s20, %s5687_s20   ;;  %s3566_s19 = sphi %s3617_s19, %s5686_s19   ;;  %s3562_s18 = sphi %s3615_s18, %s5685_s18  }
   0x6   : > { %s25_s24 = ssub.s32 %s3574_s21, %s3637_s23  ;;  %s28_s25 = sadd.s32 1, %s3570_s20 }
   0x7   : > { %p26_p0 = scmp.eq.s32.totalorder %s25_s24, 0  ;;  %p35_p1 = scmp.ne.s32.totalorder %s3570_s20, %s3566_s19 }
   0x8   : > { %p36_p2 = scmp.eq.s32.totalorder %s3574_s21, 0  ;;  %p41_p3 = scmp.ne.s32.totalorder %s3566_s19, %s3562_s18 }
   0x9   : > { %s3647_s26 = scalar_select %p26_p0, %s3570_s20, %s28_s25  }
   0xa   : > { %p3649_p4 = por %p36_p2, %p35_p1  ;;  %p42_p5 = scmp.eq.s32.totalorder %s3634_s22, 0 }
   0xb   : > { %p3105_p6 = scmp.ge.s32.totalorder %s3574_s21, 1  ;;  %p172_p7 = scmp.lt.s32.totalorder %s3574_s21, 3 }
   0xc   : > { %p3658_p8 = por %p42_p5, %p41_p3  ;;  %s184_s7 = sshll.u32 %s5536_s1, 4  ;;  %s185_s7 = int_to_ptr.hbm [resolvable:$true] %s184_s7 }
   0xd   : > { %p3662_p9 = pnand %p3105_p6, %p172_p7  ;;  %p3424_p11 = scmp.lt.s32.totalorder %s3574_s21, 2 }
   0xe   : > { %s194_s10 = sshll.u32 %s5537_s2, 4  ;;  %s205_s12 = sand.u32 1, %s3570_s20   ;;  %s195_s10 = int_to_ptr.vmem [resolvable:$true] %s194_s10 }
   0xf   : > { %p3411_p10 = pneg %p3662_p9  ;;  %p3679_p13 = pnand %p3424_p11, %p3649_p4 }
  0x10   : > { %s3576_s13 = smov [#allocation6]   ;;  %s3577_s14 = smov [#allocation7]  }
  0x11   : > { %p3412_p12 = pnand %p3411_p10, %p42_p5  ;;  %s3398_s15 = smul.u32 96, %s205_s12 }
  0x12   : > { %s3399_s16 = smul.u32 96, %s3574_s21  ;;  %s206_s27 = scalar_lea.sflag [#allocation3], %s205_s12 }
  0x13   : > { %3414 = dma.hbm_to_smem (!%p3412_p12), %s185_s7, 32, %s3576_s13, [#allocation4]  }
  0x14   : > { %3417 = dma.vmem_to_smem (!%p3412_p12), %s195_s10, 16, %s3577_s14, [#allocation5]  }
  0x15   : > { %s214_s24 = scalar_lea.hbm %s5535_s0, %s3399_s16  ;;  %s209_s25 = scalar_lea.vmem [#allocation2], %s3398_s15 }
  0x16   : > { %s217_s30 = sshll.u32 %s209_s25, 4  ;;  %s215_s6 = sshll.u32 %s214_s24, 4  ;;  %s218_s30 = int_to_ptr.vmem [resolvable:$true] %s217_s30  ;;  %s216_s6 = int_to_ptr.hbm [resolvable:$true] %s215_s6 }
  0x17   : > { %s3502_s8 = sshra.s32 %s216_s6, 4  ;;  %p3506_p1 = pneg %p3679_p13  ;;  %s3503_s8 = int_to_ptr.hbm [resolvable:$true] %s3502_s8 }
  0x18   : > { %s3504_s9 = scalar_lea.hbm %s3503_s8, 96  ;;  %s3509_s10 = scalar_lea.hbm %s5535_s0, 192 }
  0x19   : > { %p3505_p0 = scmp.ne.s32.totalorder %s3503_s8, %s3504_s9  ;;  %p3510_p4 = scmp.lt.s32.totalorder %s3503_s8, %s5535_s0 }
  0x1a   : > { %p3511_p6 = scmp.lt.s32.totalorder %s3509_s10, %s3504_s9 }
  0x1b   : > { %p3507_p2 = pnand %p3506_p1, %p3505_p0 }
  0x1c   : > { %p3512_p7 = por %p3511_p6, %p3510_p4 }
  0x1d   : > { %p3508_p3 = pneg %p3507_p2 }
  0x1f   : > { %p3513_p10 = pnand %p3512_p7, %p3508_p3 }
  0x21   : > { %3516 = shalt.err (!%p3513_p10)
}
  0x22   : > { %s3578_s12 = smov 128   ;;  %s3579_s15 = smov 8  }
  0x23   : > { %3421 = dma.hbm_to_vmem [thread:$0]  (!%p3679_p13), %s216_s6, 1536, %s218_s30, %s206_s27, %s3578_s12, %s3578_s12, %s3579_s15  }
  0x24   : > { %229 = sbr.rel (%p3662_p9) target bundleno = 1198 (0x4ae), region = 32 }
  0x29   : > { %s231_s16 = sand.u32 1, %s3566_s19  }
  0x2a   : > { %s3400_s17 = smul.u32 96, %s231_s16  ;;  %s232_s18 = scalar_lea.sflag [#allocation3], %s231_s16 }
  0x2c   : > { %s3701_s24 = scalar_lea.vmem [#allocation2], %s3400_s17 }
  0x2d   : > { %3549 = dma.done.wait (%p3658_p8), %s232_s18, 1536  }
  0x2e   : > { %3551 = vsyncadd (%p3658_p8), %s232_s18, 4294965760 }
  0x2f   : > { %3553 = dma.done.wait (%p42_p5), [#allocation4], 32  }
  0x30   : > { %3555 = vsyncadd (%p42_p5), [#allocation4], 4294967264 }
  0x31   : > { %3557 = dma.done.wait (%p42_p5), [#allocation5], 16  }
  0x32   : > { %3559 = vsyncadd (%p42_p5), [#allocation5], 4294967280 }
  0x33   : > { %251 = sfence }
  0x34   : > { %s3133_s29 = sld [smem:[#allocation6 + $0x25]]  ;;  %v3716_v0 = vld [vmem:[%s3701_s24 + $0x3] sm:$0xff]  ;;  %v3719_v2 = vld [vmem:[%s3701_s24 + $0x1b] sm:$0xff]  ;;  %s3580_s25 = smov 127   ;;  %v3726_v8 = vld [vmem:[%s3701_s24 + $0xb] sm:$0xff]  ;;  %vm1182_vm0 = vcmask 125952  }
  0x35   : > { %s3132_s11 = sld [smem:[#allocation6 + $0x1]]  ;;  %v3733_v11 = vld [vmem:[%s3701_s24 + $0x23] sm:$0xff]  ;;  %v3742_v16 = vld [vmem:[%s3701_s24 + $0x33] sm:$0xff]  ;;  %v3748_v20 = vld [vmem:[%s3701_s24 + $0x3b] sm:$0xff]  ;;  %s3581_s13 = smov 126  }
  0x36   : > { %s3134_s28 = sld [smem:[#allocation6 + $0xa]]  ;;  %v3757_v24 = vld [vmem:[%s3701_s24 + $0x53] sm:$0xff]  ;;  %v3760_v26 = vld [vmem:[%s3701_s24 + $0x4b] sm:$0xff]  ;;  %p284_p5 = scmp.lt.s32.totalorder %s3634_s22, 1 }
  0x37   : > { %s3135_s30 = sld [smem:[#allocation6 + $0x2e]]  ;;  %v3802_v56 = vld [vmem:[%s3701_s24 + $0x4] sm:$0xff]  ;;  %v3808_v60 = vld [vmem:[%s3701_s24 + $0xc] sm:$0xff] }
  0x38   : > { %s3136_s6 = sld [smem:[#allocation6 + $0x13]]  ;;  %s5690_s22 = smov (!%p284_p5, %s3634_s22), 1 }
  0x39   : > { %s3137_s27 = sld [smem:[#allocation6 + $0x37]] }
  0x3a   : > { %v373_v1 = vstv %s3133_s29  ;;  %s3138_s8 = sld [smem:[#allocation6 + $0x1c]] }
  0x3b   : > { %v374_v3 = vmul.f32 %v373_v1, %v3716_v0  ;;  %v359_v4 = vstv %s3132_s11  ;;  %v375_v9 = vmul.f32 %v373_v1, %v3726_v8  ;;  %s3139_s9 = sld [smem:[#allocation6 + $0x40]]  ;;  %v3817_v1 = vld [vmem:[%s3701_s24 + $0x24] sm:$0xff] }
  0x3c   : > { %v360_v5 = vmul.f32 %v359_v4, %v3716_v0  ;;  %v387_v6 = vstv %s3134_s28  ;;  %v361_v10 = vmul.f32 %v359_v4, %v3726_v8  ;;  %s3140_s7 = sld [smem:[#allocation6 + $0x2]]  ;;  %5580 = vst [vmem:[#allocation11_spill] sm:$0xff] %v3817_v1  ;;  %v3820_v4 = vld [vmem:[%s3701_s24 + $0x1c] sm:$0xff] }
  0x3d   : > { %378 = vrot.lane.b32.xlu1 %v374_v3, %s3580_s25  ;;  %v388_v7 = vmul.f32 %v3719_v2, %v387_v6  ;;  %v389_v12 = vmul.f32 %v3733_v11, %v387_v6  ;;  %v401_v13 = vstv %s3135_s30  ;;  %s3141_s21 = sld [smem:[#allocation6 + $0x26]] }
  0x3e   : > { %364 = vrot.lane.b32.xlu0 %v360_v5, %s3580_s25  ;;  %v403_v14 = vmul.f32 %v3733_v11, %v401_v13  ;;  %v402_v15 = vmul.f32 %v3719_v2, %v401_v13  ;;  %v415_v17 = vstv %s3136_s6  ;;  %s3142_s10 = sld [smem:[#allocation6 + $0xb]] }
  0x3f   : > { %392 = vrot.lane.b32.xlu2 %v388_v7, %s3580_s25  ;;  %v416_v18 = vmul.f32 %v3742_v16, %v415_v17  ;;  %v429_v19 = vstv %s3137_s27  ;;  %v417_v22 = vmul.f32 %v3748_v20, %v415_v17  ;;  %s3143_s14 = sld [smem:[#allocation6 + $0x2f]] }
  0x40   : > { %v430_v21 = vmul.f32 %v3742_v16, %v429_v19  ;;  %v431_v23 = vmul.f32 %v3748_v20, %v429_v19  ;;  %v443_v25 = vstv %s3138_s8  ;;  %s3144_s12 = sld [smem:[#allocation6 + $0x14]] }
  0x41   : > { %v445_v27 = vmul.f32 %v3757_v24, %v443_v25  ;;  %v444_v28 = vmul.f32 %v3760_v26, %v443_v25  ;;  %v457_v29 = vstv %s3139_s9  ;;  %s3145_s15 = sld [smem:[#allocation6 + $0x38]] }
  0x42   : > { %v458_v30 = vmul.f32 %v3760_v26, %v457_v29  ;;  %v471_v31 = vstv %s3140_s7  ;;  %v459_v33 = vmul.f32 %v3757_v24, %v457_v29  ;;  %s3146_s16 = sld [smem:[#allocation6 + $0x1d]] }
  0x43   : > { %v472_v32 = vmul.f32 %v471_v31, %v3716_v0  ;;  %v473_v34 = vmul.f32 %v471_v31, %v3726_v8  ;;  %v485_v35 = vstv %s3141_s21  ;;  %s3147_s17 = sld [smem:[#allocation6 + $0x41]] }
  0x44   : > { %v487_v36 = vmul.f32 %v485_v35, %v3726_v8  ;;  %v486_v37 = vmul.f32 %v485_v35, %v3716_v0  ;;  %v499_v38 = vstv %s3142_s10  ;;  %s3162_s18 = sld [smem:[#allocation6 + $0x4]] }
  0x45   : > { %380 = vrot.lane.b32.xlu1 %v375_v9, %s3580_s25  ;;  %v500_v39 = vmul.f32 %v3719_v2, %v499_v38  ;;  %v513_v40 = vstv %s3143_s14  ;;  %v501_v42 = vmul.f32 %v3733_v11, %v499_v38  ;;  %s3163_s29 = sld [smem:[#allocation6 + $0x28]] }
  0x46   : > { %366 = vrot.lane.b32.xlu0 %v361_v10, %s3580_s25  ;;  %v514_v41 = vmul.f32 %v3719_v2, %v513_v40  ;;  %v515_v43 = vmul.f32 %v3733_v11, %v513_v40  ;;  %v527_v44 = vstv %s3144_s12  ;;  %s3164_s11 = sld [smem:[#allocation6 + $0xd]] }
  0x47   : > { %394 = vrot.lane.b32.xlu2 %v389_v12, %s3580_s25  ;;  %v529_v45 = vmul.f32 %v3748_v20, %v527_v44  ;;  %v528_v46 = vmul.f32 %v3742_v16, %v527_v44  ;;  %v541_v47 = vstv %s3145_s15  ;;  %s3165_s28 = sld [smem:[#allocation6 + $0x31]]  ;;  %v3831_v12 = vld [vmem:[%s3701_s24 + $0x34] sm:$0xff] }
  0x48   : > { %v542_v48 = vmul.f32 %v3742_v16, %v541_v47  ;;  %v555_v49 = vstv %s3146_s16  ;;  %v543_v51 = vmul.f32 %v3748_v20, %v541_v47  ;;  %s3166_s30 = sld [smem:[#allocation6 + $0x16]] }
  0x49   : > { %v556_v50 = vmul.f32 %v3760_v26, %v555_v49  ;;  %v557_v52 = vmul.f32 %v3757_v24, %v555_v49  ;;  %v569_v53 = vstv %s3147_s17  ;;  %s3167_s6 = sld [smem:[#allocation6 + $0x3a]] }
  0x4a   : > { %v571_v54 = vmul.f32 %v3757_v24, %v569_v53  ;;  %v570_v55 = vmul.f32 %v3760_v26, %v569_v53  ;;  %v639_v57 = vstv %s3162_s18  ;;  %s3168_s27 = sld [smem:[#allocation6 + $0x1f]] }
  0x4b   : > { %v640_v58 = vmul.f32 %v639_v57, %v3802_v56  ;;  %v653_v59 = vstv %s3163_s29  ;;  %v641_v62 = vmul.f32 %v639_v57, %v3808_v60  ;;  %s3169_s8 = sld [smem:[#allocation6 + $0x43]] }
  0x4c   : > { %v654_v61 = vmul.f32 %v653_v59, %v3802_v56  ;;  %v655_v63 = vmul.f32 %v653_v59, %v3808_v60  ;;  %v667_v3 = vstv %s3164_s11  ;;  %s3170_s9 = sld [smem:[#allocation6 + $0x5]] }
  0x4d   : > { %408 = vrot.lane.b32.xlu1 %v403_v14, %s3580_s25  ;;  %v669_v5 = vmul.f32 %v3817_v1, %v667_v3  ;;  %v668_v7 = vmul.f32 %v3820_v4, %v667_v3  ;;  %v681_v9 = vstv %s3165_s28  ;;  %s3171_s7 = sld [smem:[#allocation6 + $0x29]] }
  0x4e   : > { %406 = vrot.lane.b32.xlu0 %v402_v15, %s3580_s25  ;;  %v682_v10 = vmul.f32 %v3820_v4, %v681_v9  ;;  %v695_v13 = vstv %s3166_s30  ;;  %v683_v17 = vmul.f32 %v3817_v1, %v681_v9  ;;  %s3172_s21 = sld [smem:[#allocation6 + $0xe]] }
  0x4f   : > { %420 = vrot.lane.b32.xlu2 %v416_v18, %s3580_s25  ;;  %v696_v14 = vmul.f32 %v3831_v12, %v695_v13  ;;  %v3839_v18 = vld [vmem:[%s3701_s24 + $0x3c] sm:$0xff]  ;;  %s3173_s10 = sld [smem:[#allocation6 + $0x32]] }
  0x50   : > { %5581 = vst [vmem:[#allocation12_spill] sm:$0xff] %v3839_v18  ;;  %v697_v19 = vmul.f32 %v3839_v18, %v695_v13  ;;  %s3174_s14 = sld [smem:[#allocation6 + $0x17]] }
  0x51   : > { %s3175_s12 = sld [smem:[#allocation6 + $0x3b]] }
  0x52   : > { %v751_v38 = vstv %s3170_s9  ;;  %s3176_s15 = sld [smem:[#allocation6 + $0x20]] }
  0x53   : > { %v765_v44 = vstv %s3171_s7  ;;  %s3177_s16 = sld [smem:[#allocation6 + $0x44]] }
  0x54   : > { %s3192_s17 = sld [smem:[#allocation6 + $0x7]] }
  0x55   : > { %434 = vrot.lane.b32.xlu1 %v430_v21, %s3580_s25  ;;  %v709_v21 = vstv %s3167_s6  ;;  %v793_v53 = vstv %s3173_s10  ;;  %s3193_s18 = sld [smem:[#allocation6 + $0x2b]] }
  0x56   : > { %422 = vrot.lane.b32.xlu0 %v417_v22, %s3580_s25  ;;  %v711_v22 = vmul.f32 %v3839_v18, %v709_v21  ;;  %v710_v25 = vmul.f32 %v3831_v12, %v709_v21  ;;  %v795_v57 = vmul.f32 %v3817_v1, %v793_v53  ;;  %v794_v59 = vmul.f32 %v3820_v4, %v793_v53  ;;  %s3194_s29 = sld [smem:[#allocation6 + $0x10]] }
  0x57   : > { %436 = vrot.lane.b32.xlu2 %v431_v23, %s3580_s25  ;;  %s3195_s11 = sld [smem:[#allocation6 + $0x34]] }
  0x58   : > { %s3196_s28 = sld [smem:[#allocation6 + $0x19]] }
  0x59   : > { %s3197_s30 = sld [smem:[#allocation6 + $0x3d]] }
  0x5a   : > { %s3198_s6 = sld [smem:[#allocation6 + $0x22]] }
  0x5b   : > { %s3201_s9 = sld [smem:[#allocation6 + $0x2c]] }
  0x5c   : > { %s3202_s7 = sld [smem:[#allocation6 + $0x11]] }
  0x5d   : > { %450 = vrot.lane.b32.xlu1 %v445_v27, %s3580_s25  ;;  %v3850_v27 = vld [vmem:[%s3701_s24 + $0x4c] sm:$0xff]  ;;  %s4048_s10 = sld [smem:[#allocation6]] }
  0x5e   : > { %448 = vrot.lane.b32.xlu0 %v444_v28, %s3580_s25  ;;  %v723_v28 = vstv %s3168_s27  ;;  %s3199_s27 = sld [smem:[#allocation6 + $0x46]] }
  0x5f   : > { %462 = vrot.lane.b32.xlu2 %v458_v30, %s3580_s25  ;;  %v724_v29 = vmul.f32 %v3850_v27, %v723_v28  ;;  %v737_v30 = vstv %s3169_s8  ;;  %s3200_s8 = sld [smem:[#allocation6 + $0x8]] }
  0x65   : > { %476 = vrot.lane.b32.xlu1 %v472_v32, %s3581_s13  ;;  %v3858_v32 = vld [vmem:[%s3701_s24 + $0x54] sm:$0xff] }
  0x66   : > { %464 = vrot.lane.b32.xlu0 %v459_v33, %s3580_s25  ;;  %5582 = vst [vmem:[#allocation13_spill] sm:$0xff] %v3858_v32 }
  0x67   : > { %478 = vrot.lane.b32.xlu2 %v473_v34, %s3581_s13  ;;  %v738_v34 = vmul.f32 %v3850_v27, %v737_v30 }
  0x6d   : > { %492 = vrot.lane.b32.xlu1 %v487_v36, %s3581_s13  ;;  %v725_v36 = vmul.f32 %v3858_v32, %v723_v28  ;;  %v849_v28 = vstv %s3177_s16  ;;  %s4065_s16 = sld [smem:[#allocation6 + $0x12]] }
  0x6e   : > { %490 = vrot.lane.b32.xlu0 %v486_v37, %s3581_s13  ;;  %v739_v37 = vmul.f32 %v3858_v32, %v737_v30  ;;  %v3931_v30 = vld [vmem:[%s3701_s24 + $0x5] sm:$0xff] }
  0x6f   : > { %504 = vrot.lane.b32.xlu2 %v500_v39, %s3581_s13  ;;  %5583 = vst [vmem:[#allocation14_spill] sm:$0xff] %v3931_v30 }
  0x75   : > { %518 = vrot.lane.b32.xlu1 %v514_v41, %s3581_s13  ;;  %v753_v41 = vmul.f32 %v751_v38, %v3808_v60 }
  0x76   : > { %506 = vrot.lane.b32.xlu0 %v501_v42, %s3581_s13 }
  0x77   : > { %520 = vrot.lane.b32.xlu2 %v515_v43, %s3581_s13  ;;  %v752_v43 = vmul.f32 %v751_v38, %v3802_v56 }
  0x7d   : > { %534 = vrot.lane.b32.xlu1 %v529_v45, %s3581_s13  ;;  %v766_v45 = vmul.f32 %v765_v44, %v3802_v56 }
  0x7e   : > { %532 = vrot.lane.b32.xlu0 %v528_v46, %s3581_s13  ;;  %v779_v46 = vstv %s3172_s21  ;;  %s3203_s21 = sld [smem:[#allocation6 + $0x35]] }
  0x7f   : > { %546 = vrot.lane.b32.xlu2 %v542_v48, %s3581_s13  ;;  %v780_v49 = vmul.f32 %v3820_v4, %v779_v46 }
  0x85   : > { %560 = vrot.lane.b32.xlu1 %v556_v50, %s3581_s13 }
  0x86   : > { %548 = vrot.lane.b32.xlu0 %v543_v51, %s3581_s13  ;;  %v767_v51 = vmul.f32 %v765_v44, %v3808_v60  ;;  %v3943_v44 = vld [vmem:[%s3701_s24 + $0xd] sm:$0xff] }
  0x87   : > { %562 = vrot.lane.b32.xlu2 %v557_v52, %s3581_s13  ;;  %v781_v52 = vmul.f32 %v3817_v1, %v779_v46  ;;  %5585 = vst [vmem:[#allocation16_spill] sm:$0xff] %v3943_v44  ;;  %v933_v46 = vstv %s3193_s18  ;;  %s4074_s18 = sld [smem:[#allocation6 + $0x1b]] }
  0x8d   : > { %576 = vrot.lane.b32.xlu1 %v571_v54, %s3581_s13 }
  0x8e   : > { %574 = vrot.lane.b32.xlu0 %v570_v55, %s3581_s13 }
  0x8f   : > { %644 = vrot.lane.b32.xlu2 %v640_v58, %s3580_s25 }
  0x95   : > { %658 = vrot.lane.b32.xlu1 %v654_v61, %s3580_s25  ;;  %v807_v61 = vstv %s3174_s14  ;;  %s3205_s14 = sld [smem:[#allocation6 + $0x3e]] }
  0x96   : > { %646 = vrot.lane.b32.xlu0 %v641_v62, %s3580_s25  ;;  %v808_v62 = vmul.f32 %v3831_v12, %v807_v61 }
  0x97   : > { %660 = vrot.lane.b32.xlu2 %v655_v63, %s3580_s25  ;;  %v821_v63 = vstv %s3175_s12  ;;  %s4052_s12 = sld [smem:[#allocation6 + $0x9]] }
  0x98   : > { %v823_v13 = vmul.f32 %v3839_v18, %v821_v63 }
  0x99   : > { %v3824_v6 = vpop.permute.xlu2 %392 }
  0x9d   : > { %674 = vrot.lane.b32.xlu1 %v669_v5, %s3580_s25 }
  0x9e   : > { %672 = vrot.lane.b32.xlu0 %v668_v7, %s3580_s25  ;;  %v822_v7 = vmul.f32 %v3831_v12, %v821_v63  ;;  %v961_v63 = vstv %s3195_s11  ;;  %s4090_s11 = sld [smem:[#allocation6 + $0x2d]] }
  0x9f   : > { %686 = vrot.lane.b32.xlu2 %v682_v10, %s3580_s25  ;;  %v809_v10 = vmul.f32 %v3839_v18, %v807_v61  ;;  %v947_v61 = vstv %s3194_s29  ;;  %v1031_v18 = vstv %s3200_s8  ;;  %s4084_s29 = sld [smem:[#allocation6 + $0x24]] }
  0xa0   : > { %s4164_s8 = sld [smem:[#allocation6 + $0x27]] }
  0xa1   : > { %v3835_v15 = vpop.permute.xlu2 %394 }
  0xa5   : > { %700 = vrot.lane.b32.xlu1 %v696_v14, %s3580_s25  ;;  %v835_v14 = vstv %s3176_s15  ;;  %s4063_s15 = sld [smem:[#allocation6 + $0x23]] }
  0xa6   : > { %688 = vrot.lane.b32.xlu0 %v683_v17, %s3580_s25  ;;  %v837_v21 = vmul.f32 %v3858_v32, %v835_v14 }
  0xa7   : > { %702 = vrot.lane.b32.xlu2 %v697_v19, %s3580_s25 }
  0xa9   : > { %v3846_v23 = vpop.permute.xlu2 %420 }
  0xad   : > { %716 = vrot.lane.b32.xlu1 %v711_v22, %s3580_s25 }
  0xae   : > { %714 = vrot.lane.b32.xlu0 %v710_v25, %s3580_s25  ;;  %v836_v25 = vmul.f32 %v3850_v27, %v835_v14 }
  0xaf   : > { %v3855_v31 = vpop.permute.xlu1 %378  ;;  %728 = vrot.lane.b32.xlu2 %v724_v29, %s3580_s25  ;;  %v850_v29 = vmul.f32 %v3850_v27, %v849_v28 }
  0xb0   : > { %v3861_v33 = vpop.permute.xlu0 %364 }
  0xb1   : > { %v3864_v35 = vpop.permute.xlu2 %436 }
  0xb5   : > { %742 = vrot.lane.b32.xlu1 %v738_v34, %s3580_s25  ;;  %v919_v34 = vstv %s3192_s17  ;;  %s4070_s17 = sld [smem:[#allocation6 + $0x47]] }
  0xb6   : > { %730 = vrot.lane.b32.xlu0 %v725_v36, %s3580_s25  ;;  %v920_v38 = vmul.f32 %v919_v34, %v3931_v30 }
  0xb7   : > { %v3870_v39 = vpop.permute.xlu1 %380  ;;  %744 = vrot.lane.b32.xlu2 %v739_v37, %s3580_s25 }
  0xb8   : > { %v3873_v40 = vpop.permute.xlu0 %366 }
  0xb9   : > { %v3876_v42 = vpop.permute.xlu2 %462 }
  0xbd   : > { %758 = vrot.lane.b32.xlu1 %v753_v41, %s3581_s13 }
  0xbe   : > { %756 = vrot.lane.b32.xlu0 %v752_v43, %s3581_s13  ;;  %v851_v43 = vmul.f32 %v3858_v32, %v849_v28  ;;  %v4009_v32 = vld [vmem:[%s3701_s24 + $0x55] sm:$0xff] }
  0xbf   : > { %v3882_v47 = vpop.permute.xlu1 %408  ;;  %770 = vrot.lane.b32.xlu2 %v766_v45, %s3581_s13  ;;  %v921_v45 = vmul.f32 %v919_v34, %v3943_v44  ;;  %v975_v34 = vstv %s3196_s28  ;;  %5597 = vst [vmem:[#allocation28_spill] sm:$0xff] %v4009_v32  ;;  %s4098_s28 = sld [smem:[#allocation6 + $0x36]] }
  0xc0   : > { %v3885_v48 = vpop.permute.xlu0 %406 }
  0xc1   : > { %v3888_v50 = vpop.permute.xlu2 %478 }
  0xc5   : > { %784 = vrot.lane.b32.xlu1 %v780_v49, %s3581_s13 }
  0xc6   : > { %772 = vrot.lane.b32.xlu0 %v767_v51, %s3581_s13 }
  0xc7   : > { %v3894_v54 = vpop.permute.xlu1 %434  ;;  %786 = vrot.lane.b32.xlu2 %v781_v52, %s3581_s13  ;;  %v935_v52 = vmul.f32 %v933_v46, %v3943_v44 }
  0xc8   : > { %v3897_v55 = vpop.permute.xlu0 %422 }
  0xc9   : > { %v3900_v58 = vpop.permute.xlu2 %504 }
  0xcd   : > { %800 = vrot.lane.b32.xlu1 %v795_v57, %s3581_s13  ;;  %v934_v57 = vmul.f32 %v933_v46, %v3931_v30 }
  0xce   : > { %798 = vrot.lane.b32.xlu0 %v794_v59, %s3581_s13  ;;  %v3958_v59 = vld [vmem:[%s3701_s24 + $0x1d] sm:$0xff] }
  0xcf   : > { %v3906_v3 = vpop.permute.xlu1 %450  ;;  %812 = vrot.lane.b32.xlu2 %v808_v62, %s3581_s13  ;;  %5587 = vst [vmem:[#allocation18_spill] sm:$0xff] %v3958_v59  ;;  %v948_v62 = vmul.f32 %v3958_v59, %v947_v61  ;;  %v962_v14 = vmul.f32 %v3958_v59, %v961_v63 }
  0xd0   : > { %v3909_v5 = vpop.permute.xlu0 %448 }
  0xd1   : > { %v3912_v9 = vpop.permute.xlu2 %520 }
  0xd5   : > { %826 = vrot.lane.b32.xlu1 %v822_v7, %s3581_s13 }
  0xd6   : > { %814 = vrot.lane.b32.xlu0 %v809_v10, %s3581_s13  ;;  %v3966_v10 = vld [vmem:[%s3701_s24 + $0x25] sm:$0xff] }
  0xd7   : > { %v3918_v17 = vpop.permute.xlu1 %476  ;;  %828 = vrot.lane.b32.xlu2 %v823_v13, %s3581_s13  ;;  %5589 = vst [vmem:[#allocation20_spill] sm:$0xff] %v3966_v10  ;;  %v963_v28 = vmul.f32 %v3966_v10, %v961_v63  ;;  %v3997_v63 = vld [vmem:[%s3701_s24 + $0x4d] sm:$0xff] }
  0xd8   : > { %v3921_v19 = vpop.permute.xlu0 %464  ;;  %5594 = vst [vmem:[#allocation25_spill] sm:$0xff] %v3997_v63 }
  0xd9   : > { %v3924_v22 = vpop.permute.xlu2 %546 }
  0xdd   : > { %842 = vrot.lane.b32.xlu1 %v837_v21, %s3581_s13 }
  0xde   : > { %840 = vrot.lane.b32.xlu0 %v836_v25, %s3581_s13  ;;  %v949_v25 = vmul.f32 %v3966_v10, %v947_v61  ;;  %v989_v61 = vstv %s3197_s30  ;;  %s3131_s30 = sld [smem:[#allocation6 + $0x3f]] }
  0xdf   : > { %v3933_v36 = vpop.permute.xlu1 %492  ;;  %854 = vrot.lane.b32.xlu2 %v850_v29, %s3581_s13  ;;  %v3979_v29 = vld [vmem:[%s3701_s24 + $0x3d] sm:$0xff] }
  0xe0   : > { %v3936_v37 = vpop.permute.xlu0 %490  ;;  %5591 = vst [vmem:[#allocation22_spill] sm:$0xff] %v3979_v29  ;;  %v977_v46 = vmul.f32 %v3979_v29, %v975_v34 }
  0xe1   : > { %v3939_v41 = vpop.permute.xlu2 %562 }
  0xe2   : > { %5584 = vst [vmem:[#allocation15_spill] sm:$0xff] %v3939_v41 }
  0xe5   : > { %924 = vrot.lane.b32.xlu1 %v920_v38, %s3580_s25 }
  0xe6   : > { %856 = vrot.lane.b32.xlu0 %v851_v43, %s3581_s13  ;;  %v3984_v43 = vld [vmem:[%s3701_s24 + $0x35] sm:$0xff] }
  0xe7   : > { %v3948_v49 = vpop.permute.xlu1 %518  ;;  %926 = vrot.lane.b32.xlu2 %v921_v45, %s3580_s25  ;;  %5592 = vst [vmem:[#allocation23_spill] sm:$0xff] %v3984_v43 }
  0xe8   : > { %v3951_v51 = vpop.permute.xlu0 %506 }
  0xe9   : > { %v3954_v53 = vpop.permute.xlu2 %644 }
  0xea   : > { %5586 = vst [vmem:[#allocation17_spill] sm:$0xff] %v3954_v53 }
  0xed   : > { %940 = vrot.lane.b32.xlu1 %v935_v52, %s3580_s25 }
  0xee   : > { %938 = vrot.lane.b32.xlu0 %v934_v57, %s3580_s25  ;;  %v976_v57 = vmul.f32 %v3984_v43, %v975_v34 }
  0xef   : > { %v3963_v7 = vpop.permute.xlu1 %534  ;;  %952 = vrot.lane.b32.xlu2 %v948_v62, %s3580_s25  ;;  %v990_v62 = vmul.f32 %v3984_v43, %v989_v61 }
  0xf0   : > { %5588 = vst [vmem:[#allocation19_spill] sm:$0xff] %v3963_v7  ;;  %v3969_v13 = vpop.permute.xlu0 %532 }
  0xf1   : > { %v3972_v21 = vpop.permute.xlu2 %660 }
  0xf2   : > { %5590 = vst [vmem:[#allocation21_spill] sm:$0xff] %v3972_v21  ;;  %v991_v21 = vmul.f32 %v3979_v29, %v989_v61 }
  0xf5   : > { %966 = vrot.lane.b32.xlu1 %v962_v14, %s3580_s25  ;;  %v1003_v14 = vstv %s3198_s6  ;;  %s4147_s6 = sld [smem:[#allocation6 + $0x3]] }
  0xf6   : > { %954 = vrot.lane.b32.xlu0 %v949_v25, %s3580_s25 }
  0xf7   : > { %v3981_v38 = vpop.permute.xlu1 %560  ;;  %968 = vrot.lane.b32.xlu2 %v963_v28, %s3580_s25 }
  0xf8   : > { %v3987_v45 = vpop.permute.xlu0 %548 }
  0xf9   : > { %v3990_v52 = vpop.permute.xlu2 %686 }
  0xfa   : > { %5593 = vst [vmem:[#allocation24_spill] sm:$0xff] %v3990_v52  ;;  %v1004_v52 = vmul.f32 %v3997_v63, %v1003_v14 }
  0xfd   : > { %982 = vrot.lane.b32.xlu1 %v977_v46, %s3580_s25  ;;  %v1005_v46 = vmul.f32 %v4009_v32, %v1003_v14  ;;  %v1032_v14 = vmul.f32 %v1031_v18, %v3931_v30 }
  0xfe   : > { %980 = vrot.lane.b32.xlu0 %v976_v57, %s3580_s25  ;;  %v1017_v57 = vstv %s3199_s27  ;;  %s4156_s27 = sld [smem:[#allocation6 + $0xc]] }
  0xff   : > { %v3999_v25 = vpop.permute.xlu1 %576  ;;  %994 = vrot.lane.b32.xlu2 %v990_v62, %s3580_s25  ;;  %v1018_v41 = vmul.f32 %v3997_v63, %v1017_v57 }
 0x100   : > { %v4002_v28 = vpop.permute.xlu0 %574 }
 0x101   : > { %5595 = vst [vmem:[#allocation26_spill] sm:$0xff] %v4002_v28  ;;  %v4005_v34 = vpop.permute.xlu2 %702  ;;  %v323_v28 = vstv %s4090_s11  ;;  %s4305_s11 = sld [smem:[#allocation6 + $0x45]] }
 0x102   : > { %5596 = vst [vmem:[#allocation27_spill] sm:$0xff] %v4005_v34  ;;  %v1019_v34 = vmul.f32 %v4009_v32, %v1017_v57  ;;  %v1033_v57 = vmul.f32 %v1031_v18, %v3943_v44 }
 0x105   : > { %1008 = vrot.lane.b32.xlu1 %v1004_v52, %s3580_s25 }
 0x106   : > { %996 = vrot.lane.b32.xlu0 %v991_v21, %s3580_s25  ;;  %v1045_v21 = vstv %s3201_s9  ;;  %s4170_s9 = sld [smem:[#allocation6 + $0x15]] }
 0x107   : > { %v4014_v62 = vpop.permute.xlu1 %658  ;;  %1010 = vrot.lane.b32.xlu2 %v1005_v46, %s3580_s25 }
 0x108   : > { %5598 = vst [vmem:[#allocation29_spill] sm:$0xff] %v4014_v62  ;;  %v4017_v53 = vpop.permute.xlu0 %646 }
 0x109   : > { %5599 = vst [vmem:[#allocation30_spill] sm:$0xff] %v4017_v53  ;;  %v4020_v61 = vpop.permute.xlu2 %728  ;;  %v1046_v53 = vmul.f32 %v1045_v21, %v3931_v30 }
 0x10a   : > { %5600 = vst [vmem:[#allocation31_spill] sm:$0xff] %v4020_v61  ;;  %v1047_v61 = vmul.f32 %v1045_v21, %v3943_v44 }
 0x10d   : > { %1024 = vrot.lane.b32.xlu1 %v1019_v34, %s3580_s25 }
 0x10e   : > { %1022 = vrot.lane.b32.xlu0 %v1018_v41, %s3580_s25  ;;  %v1059_v41 = vstv %s3202_s7  ;;  %s3204_s25 = sld [smem:[#allocation6 + $0x1a]] }
 0x10f   : > { %v4026_v52 = vpop.permute.xlu1 %674  ;;  %1036 = vrot.lane.b32.xlu2 %v1032_v14, %s3581_s13  ;;  %v1061_v30 = vmul.f32 %v3966_v10, %v1059_v41  ;;  %v1060_v18 = vmul.f32 %v3958_v59, %v1059_v41  ;;  %s4176_s7 = sld [smem:[#allocation6 + $0x30]] }
 0x110   : > { %5601 = vst [vmem:[#allocation32_spill] sm:$0xff] %v4026_v52  ;;  %v4029_v46 = vpop.permute.xlu0 %672 }
 0x111   : > { %5602 = vst [vmem:[#allocation33_spill] sm:$0xff] %v4029_v46  ;;  %v4032_v62 = vpop.permute.xlu2 %744 }
 0x112   : > { %5603 = vst [vmem:[#allocation34_spill] sm:$0xff] %v4032_v62  ;;  %v1073_v62 = vstv %s3203_s21  ;;  %s4185_s21 = sld [smem:[#allocation6 + $0x1e]] }
 0x113   : > { %v1074_v21 = vmul.f32 %v3958_v59, %v1073_v62  ;;  %v317_v59 = vstv %s4052_s12  ;;  %s4251_s12 = sld [smem:[#allocation6 + $0xf]] }
 0x115   : > { %1050 = vrot.lane.b32.xlu1 %v1046_v53, %s3581_s13  ;;  %v1087_v53 = vstv %s3204_s25  ;;  %s4194_s25 = sld [smem:[#allocation6 + $0x39]] }
 0x116   : > { %1038 = vrot.lane.b32.xlu0 %v1033_v57, %s3581_s13  ;;  %v1088_v41 = vmul.f32 %v3984_v43, %v1087_v53 }
 0x117   : > { %v4038_v34 = vpop.permute.xlu1 %700  ;;  %1052 = vrot.lane.b32.xlu2 %v1047_v61, %s3581_s13 }
 0x118   : > { %5604 = vst [vmem:[#allocation35_spill] sm:$0xff] %v4038_v34  ;;  %v4041_v14 = vpop.permute.xlu0 %688 }
 0x119   : > { %5605 = vst [vmem:[#allocation36_spill] sm:$0xff] %v4041_v14  ;;  %v4044_v52 = vpop.permute.xlu2 %770  ;;  %v347_v14 = vstv %s4074_s18  ;;  %s4282_s18 = sld [smem:[#allocation6 + $0x33]] }
 0x11a   : > { %5606 = vst [vmem:[#allocation37_spill] sm:$0xff] %v4044_v52  ;;  %v302_v52 = vstv %s4048_s10  ;;  %v348_v46 = vmul.f32 %v3760_v26, %v347_v14  ;;  %s4204_s10 = sld [smem:[#allocation6 + $0x42]] }
 0x11d   : > { %1066 = vrot.lane.b32.xlu1 %v1061_v30, %s3581_s13  ;;  %v1075_v30 = vmul.f32 %v3966_v10, %v1073_v62 }
 0x11e   : > { %1064 = vrot.lane.b32.xlu0 %v1060_v18, %s3581_s13  ;;  %v1089_v18 = vmul.f32 %v3979_v29, %v1087_v53 }
 0x11f   : > { %v4054_v61 = vpop.permute.xlu1 %716  ;;  %1078 = vrot.lane.b32.xlu2 %v1074_v21, %s3581_s13  ;;  %v1101_v21 = vstv %s3205_s14  ;;  %s4244_s14 = sld [smem:[#allocation6 + $0x6]] }
 0x120   : > { %5607 = vst [vmem:[#allocation38_spill] sm:$0xff] %v4054_v61  ;;  %v4057_v57 = vpop.permute.xlu0 %714  ;;  %v1103_v53 = vmul.f32 %v3979_v29, %v1101_v21  ;;  %v1115_v61 = vstv %s4063_s15  ;;  %s4264_s15 = sld [smem:[#allocation6 + $0x18]] }
 0x121   : > { %5608 = vst [vmem:[#allocation39_spill] sm:$0xff] %v4057_v57  ;;  %v4060_v44 = vpop.permute.xlu2 %786  ;;  %v1102_v57 = vmul.f32 %v3984_v43, %v1101_v21 }
 0x122   : > { %5609 = vst [vmem:[#allocation40_spill] sm:$0xff] %v4060_v44  ;;  %v303_v44 = vmul.f32 %v302_v52, %v3716_v0 }
 0x125   : > { %1092 = vrot.lane.b32.xlu1 %v1088_v41, %s3581_s13 }
 0x126   : > { %1080 = vrot.lane.b32.xlu0 %v1075_v30, %s3581_s13  ;;  %v318_v30 = vmul.f32 %v3719_v2, %v317_v59 }
 0x127   : > { %v4076_v62 = vpop.permute.xlu1 %742  ;;  %1094 = vrot.lane.b32.xlu2 %v1089_v18, %s3581_s13  ;;  %v332_v18 = vstv %s4065_s16  ;;  %s4268_s16 = sld [smem:[#allocation6 + $0x2a]] }
 0x128   : > { %5610 = vst [vmem:[#allocation41_spill] sm:$0xff] %v4076_v62  ;;  %v4079_v10 = vpop.permute.xlu0 %730  ;;  %v1116_v62 = vmul.f32 %v3997_v63, %v1115_v61  ;;  %v333_v29 = vmul.f32 %v3742_v16, %v332_v18 }
 0x129   : > { %5611 = vst [vmem:[#allocation42_spill] sm:$0xff] %v4079_v10  ;;  %v4082_v41 = vpop.permute.xlu2 %812  ;;  %v320_v10 = vadd.f32 %v318_v30, %v303_v44  ;;  %v308_v30 = vstv %s4084_s29  ;;  %s4296_s29 = sld [smem:[#allocation6 + $0x3c]] }
 0x12a   : > { %5612 = vst [vmem:[#allocation43_spill] sm:$0xff] %v4082_v41  ;;  %v1129_v41 = vstv %s4070_s17  ;;  %s4272_s17 = sld [smem:[#allocation6 + $0x21]] }
 0x12b   : > { %v1130_v34 = vmul.f32 %v3997_v63, %v1129_v41  ;;  %v335_v44 = vadd.f32 %v333_v29, %v320_v10  ;;  %v1131_v7 = vmul.f32 %v4009_v32, %v1129_v41  ;;  %v338_v63 = vstv %s4098_s28  ;;  %s4330_s28 = sld [smem:[#allocation7]] }
 0x12c   : > { %v340_v29 = vmul.f32 %v3748_v20, %v338_v63  ;;  %v324_v41 = vmul.f32 %v3719_v2, %v323_v28 }
 0x12d   : > { %1108 = vrot.lane.b32.xlu1 %v1103_v53, %s3581_s13 }
 0x12e   : > { %1106 = vrot.lane.b32.xlu0 %v1102_v57, %s3581_s13  ;;  %v1117_v57 = vmul.f32 %v4009_v32, %v1115_v61  ;;  %v309_v32 = vmul.f32 %v308_v30, %v3716_v0  ;;  %v334_v0 = vmul.f32 %v3748_v20, %v332_v18 }
 0x12f   : > { %v4101_v21 = vpop.permute.xlu1 %758  ;;  %1120 = vrot.lane.b32.xlu2 %v1116_v62, %s3581_s13  ;;  %v325_v62 = vmul.f32 %v3733_v11, %v323_v28 }
 0x130   : > { %5613 = vst [vmem:[#allocation44_spill] sm:$0xff] %v4101_v21  ;;  %v4104_v43 = vpop.permute.xlu0 %756  ;;  %v310_v21 = vmul.f32 %v308_v30, %v3726_v8 }
 0x131   : > { %5614 = vst [vmem:[#allocation45_spill] sm:$0xff] %v4104_v43  ;;  %v4107_v53 = vpop.permute.xlu2 %828  ;;  %v350_v43 = vadd.f32 %v348_v46, %v335_v44  ;;  %v304_v44 = vmul.f32 %v302_v52, %v3726_v8 }
 0x132   : > { %5615 = vst [vmem:[#allocation46_spill] sm:$0xff] %v4107_v53  ;;  %v327_v10 = vadd.f32 %v325_v62, %v310_v21  ;;  %v339_v21 = vmul.f32 %v3742_v16, %v338_v63  ;;  %v326_v62 = vadd.f32 %v324_v41, %v309_v32  ;;  %v349_v16 = vmul.f32 %v3757_v24, %v347_v14 }
 0x133   : > { %v370_v46 = vadd.f32 %v3861_v33, %v350_v43 }
 0x134   : > { %v341_v43 = vadd.f32 %v339_v21, %v326_v62  ;;  %v613_v21 = vstv %s4170_s9  ;;  %s3225_s9 = sld [smem:[#allocation6 + $0x52]] }
 0x135   : > { %1134 = vrot.lane.b32.xlu1 %v1130_v34, %s3581_s13  ;;  %v353_v34 = vstv %s3131_s30  ;;  %s4340_s30 = sld [smem:[#allocation7 + $0x1]] }
 0x136   : > { %1122 = vrot.lane.b32.xlu0 %v1117_v57, %s3581_s13  ;;  %v319_v57 = vmul.f32 %v3733_v11, %v317_v59  ;;  %v354_v8 = vmul.f32 %v3760_v26, %v353_v34 }
 0x137   : > { %v4119_v53 = vpop.permute.xlu1 %784  ;;  %1136 = vrot.lane.b32.xlu2 %v1131_v7, %s3581_s13  ;;  %v355_v7 = vmul.f32 %v3757_v24, %v353_v34 }
 0x138   : > { %5616 = vst [vmem:[#allocation47_spill] sm:$0xff] %v4119_v53  ;;  %v4123_v61 = vpop.permute.xlu0 %772  ;;  %v342_v53 = vadd.f32 %v340_v29, %v327_v10  ;;  %v321_v2 = vadd.f32 %v319_v57, %v304_v44  ;;  %v356_v20 = vadd.f32 %v354_v8, %v341_v43  ;;  %v627_v43 = vstv %s4185_s21  ;;  %s3226_s21 = sld [smem:[#allocation6 + $0x76]] }
 0x139   : > { %5617 = vst [vmem:[#allocation48_spill] sm:$0xff] %v4123_v61  ;;  %v4127_v1 = vpop.permute.xlu2 %854  ;;  %v398_v61 = vadd.f32 %v3824_v6, %v370_v46  ;;  %v599_v46 = vstv %s4156_s27  ;;  %s4348_s27 = sld [smem:[#allocation6 + $0x6d]] }
 0x13a   : > { %v357_v30 = vadd.f32 %v355_v7, %v342_v53  ;;  %v336_v52 = vadd.f32 %v334_v0, %v321_v2  ;;  %v591_v7 = vstv %s4164_s8  ;;  %v614_v2 = vmul.f32 %v3831_v12, %v613_v21  ;;  %s3223_s8 = sld [smem:[#allocation6 + $0x49]] }
 0x13b   : > { %v426_v59 = vadd.f32 %v3846_v23, %v398_v61  ;;  %v384_v23 = vadd.f32 %v3855_v31, %v356_v20  ;;  %v585_v61 = vstv %s4147_s6  ;;  %s3582_s6 = smov 125  }
 0x13c   : > { %v385_v6 = vadd.f32 %v3870_v39, %v357_v30  ;;  %v351_v18 = vadd.f32 %v349_v16, %v336_v52 }
 0x13d   : > { %v454_v32 = vadd.f32 %v3909_v5, %v426_v59  ;;  %v412_v14 = vadd.f32 %v3885_v48, %v384_v23  ;;  %v619_v23 = vstv %s4194_s25  ;;  %s3228_s25 = sld [smem:[#allocation6 + $0x7f]] }
 0x13e   : > { %v413_v63 = vadd.f32 %v3882_v47, %v385_v6  ;;  %v371_v47 = vadd.f32 %v3873_v40, %v351_v18 }
 0x13f   : > { %v4136_v28 = vpop.permute.xlu1 %800  ;;  %v482_v26 = vadd.f32 %v3918_v17, %v454_v32  ;;  %v440_v31 = vadd.f32 %v3894_v54, %v412_v14  ;;  %v5619_v32 = vld [vmem:[#allocation19_spill] sm:$0xff] }
 0x140   : > { %v4138_v33 = vpop.permute.xlu0 %798  ;;  %v441_v39 = vadd.f32 %v3864_v35, %v413_v63  ;;  %v399_v48 = vadd.f32 %v3835_v15, %v371_v47  ;;  %v600_v15 = vmul.f32 %v3820_v4, %v599_v46  ;;  %v592_v63 = vmul.f32 %v591_v7, %v3802_v56  ;;  %v5622_v14 = vld [vmem:[#allocation15_spill] sm:$0xff] }
 0x141   : > { %v4141_v11 = vpop.permute.xlu2 %926  ;;  %v510_v5 = vadd.f32 %v3900_v58, %v482_v26  ;;  %v586_v58 = vmul.f32 %v585_v61, %v3802_v56  ;;  %v5620_v26 = vld [vmem:[#allocation26_spill] sm:$0xff]  ;;  %v5623_v56 = vld [vmem:[#allocation17_spill] sm:$0xff] }
 0x142   : > { %v469_v17 = vadd.f32 %v3921_v19, %v441_v39  ;;  %v427_v54 = vadd.f32 %v3897_v55, %v399_v48 }
 0x143   : > { %v538_v29 = vadd.f32 %v3969_v13, %v510_v5  ;;  %v468_v13 = vadd.f32 %v3876_v42, %v440_v31  ;;  %v5621_v5 = vld [vmem:[#allocation12_spill] sm:$0xff] }
 0x144   : > { %v497_v35 = vadd.f32 %v3933_v36, %v469_v17  ;;  %v455_v44 = vadd.f32 %v3906_v3, %v427_v54  ;;  %v621_v47 = vmul.f32 %v5621_v5, %v619_v23  ;;  %v5624_v54 = vld [vmem:[#allocation13_spill] sm:$0xff] }
 0x145   : > { %v566_v40 = vadd.f32 %v3981_v38, %v538_v29  ;;  %v496_v57 = vadd.f32 %v3936_v37, %v468_v13  ;;  %v605_v37 = vstv %s4176_s7  ;;  %s4362_s7 = sld [smem:[#allocation6 + $0x5b]] }
 0x146   : > { %v525_v38 = vadd.f32 %v3912_v9, %v497_v35  ;;  %v593_v9 = vmul.f32 %v591_v7, %v3808_v60  ;;  %v483_v3 = vadd.f32 %v3888_v50, %v455_v44  ;;  %v5618_v50 = vld [vmem:[#allocation11_spill] sm:$0xff]  ;;  %v606_v29 = vmul.f32 %v3820_v4, %v605_v37  ;;  %v5625_v4 = vld [vmem:[#allocation33_spill] sm:$0xff] }
 0x147   : > { %v4151_v53 = vpop.permute.xlu1 %826  ;;  %v588_v34 = vadd.f32 %v586_v58, %v566_v40  ;;  %v524_v55 = vadd.f32 %v3948_v49, %v496_v57  ;;  %v607_v16 = vmul.f32 %v5618_v50, %v605_v37  ;;  %v633_v35 = vstv %s4204_s10  ;;  %s4386_s10 = sld [smem:[#allocation6 + $0x88]] }
 0x148   : > { %v4153_v10 = vpop.permute.xlu0 %814  ;;  %v553_v42 = vadd.f32 %v3987_v45, %v525_v38  ;;  %v511_v49 = vadd.f32 %v3951_v51, %v483_v3  ;;  %v587_v51 = vmul.f32 %v585_v61, %v3808_v60  ;;  %v635_v13 = vmul.f32 %v5624_v54, %v633_v35 }
 0x149   : > { %v4158_v24 = vpop.permute.xlu2 %952  ;;  %v602_v62 = vadd.f32 %v600_v15, %v588_v34  ;;  %v552_v45 = vadd.f32 %v3924_v22, %v524_v55  ;;  %v601_v60 = vmul.f32 %v5618_v50, %v599_v46  ;;  %v620_v34 = vmul.f32 %v3831_v12, %v619_v23  ;;  %v5627_v12 = vld [vmem:[#allocation21_spill] sm:$0xff] }
 0x14a   : > { %v581_v0 = vadd.f32 %v3999_v25, %v553_v42  ;;  %v628_v25 = vmul.f32 %v3850_v27, %v627_v43  ;;  %v539_v20 = vadd.f32 %v5619_v32, %v511_v49  ;;  %v5626_v42 = vld [vmem:[#allocation35_spill] sm:$0xff]  ;;  %v629_v50 = vmul.f32 %v5624_v54, %v627_v43  ;;  %v5633_v23 = vld [vmem:[#allocation29_spill] sm:$0xff]  ;;  %v5634_v43 = vld [vmem:[#allocation30_spill] sm:$0xff] }
 0x14b   : > { %v616_v52 = vadd.f32 %v614_v2, %v602_v62  ;;  %v580_v18 = vadd.f32 %v5620_v26, %v552_v45  ;;  %v634_v2 = vmul.f32 %v3850_v27, %v633_v35  ;;  %v5628_v49 = vld [vmem:[#allocation31_spill] sm:$0xff]  ;;  %v5638_v54 = vld [vmem:[#allocation32_spill] sm:$0xff] }
 0x14c   : > { %v595_v6 = vadd.f32 %v593_v9, %v581_v0  ;;  %v567_v17 = vadd.f32 %v5622_v14, %v539_v20  ;;  %v615_v0 = vmul.f32 %v5621_v5, %v613_v21  ;;  %v5631_v20 = vld [vmem:[#allocation38_spill] sm:$0xff]  ;;  %v5632_v26 = vld [vmem:[#allocation47_spill] sm:$0xff]  ;;  %v865_v14 = vstv %s4244_s14  ;;  %s3229_s14 = sld [smem:[#allocation6 + $0x64]] }
 0x14d   : > { %v630_v22 = vadd.f32 %v628_v25, %v616_v52  ;;  %v594_v31 = vadd.f32 %v592_v63, %v580_v18 }
 0x14e   : > { %v609_v39 = vadd.f32 %v607_v16, %v595_v6  ;;  %v589_v61 = vadd.f32 %v587_v51, %v567_v17  ;;  %v5629_v16 = vld [vmem:[#allocation36_spill] sm:$0xff]  ;;  %v5630_v6 = vld [vmem:[#allocation45_spill] sm:$0xff]  ;;  %v5635_v17 = vld [vmem:[#allocation34_spill] sm:$0xff] }
 0x14f   : > { %v4178_v41 = vpop.permute.xlu1 %842  ;;  %v650_v48 = vadd.f32 %v5623_v56, %v630_v22  ;;  %v608_v15 = vadd.f32 %v606_v29, %v594_v31  ;;  %v5636_v31 = vld [vmem:[#allocation43_spill] sm:$0xff]  ;;  %v5637_v56 = vld [vmem:[#allocation24_spill] sm:$0xff] }
 0x150   : > { %v4180_v19 = vpop.permute.xlu0 %840  ;;  %v623_v38 = vadd.f32 %v621_v47, %v609_v39  ;;  %v603_v62 = vadd.f32 %v601_v60, %v589_v61  ;;  %v5640_v61 = vld [vmem:[#allocation14_spill] sm:$0xff] }
 0x151   : > { %v4187_v36 = vpop.permute.xlu2 %968  ;;  %v678_v57 = vadd.f32 %v5625_v4, %v650_v48  ;;  %v622_v9 = vadd.f32 %v620_v34, %v608_v15  ;;  %v866_v15 = vmul.f32 %v865_v14, %v5640_v61  ;;  %v5641_v4 = vld [vmem:[#allocation39_spill] sm:$0xff] }
 0x152   : > { %v637_v7 = vadd.f32 %v635_v13, %v623_v38  ;;  %v617_v52 = vadd.f32 %v615_v0, %v603_v62  ;;  %v5639_v38 = vld [vmem:[#allocation48_spill] sm:$0xff] }
 0x153   : > { %v706_v55 = vadd.f32 %v5626_v42, %v678_v57  ;;  %v636_v25 = vadd.f32 %v634_v2, %v622_v9  ;;  %v5643_v2 = vld [vmem:[#allocation41_spill] sm:$0xff] }
 0x154   : > { %v665_v37 = vadd.f32 %v5627_v12, %v637_v7  ;;  %v631_v22 = vadd.f32 %v629_v50, %v617_v52  ;;  %v879_v7 = vstv %s4251_s12  ;;  %v893_v50 = vstv %s4264_s15  ;;  %s3231_s12 = sld [smem:[#allocation6 + $0x4a]] }
 0x155   : > { %v734_v45 = vadd.f32 %v5628_v49, %v706_v55  ;;  %v664_v51 = vadd.f32 %v5633_v23, %v636_v25  ;;  %v5642_v55 = vld [vmem:[#allocation27_spill] sm:$0xff]  ;;  %v5645_v25 = vld [vmem:[#allocation42_spill] sm:$0xff]  ;;  %s3233_s15 = sld [smem:[#allocation6 + $0x53]] }
 0x156   : > { %v693_v27 = vadd.f32 %v5629_v16, %v665_v37  ;;  %v651_v47 = vadd.f32 %v5634_v43, %v631_v22  ;;  %v5644_v37 = vld [vmem:[#allocation18_spill] sm:$0xff]  ;;  %v5649_v23 = vld [vmem:[#allocation23_spill] sm:$0xff]  ;;  %v5650_v22 = vld [vmem:[#allocation16_spill] sm:$0xff] }
 0x157   : > { %v4206_v30 = vpop.permute.xlu1 %924  ;;  %v762_v32 = vadd.f32 %v5630_v6, %v734_v45  ;;  %v692_v48 = vadd.f32 %v5637_v56, %v664_v51  ;;  %v880_v49 = vmul.f32 %v5644_v37, %v879_v7  ;;  %v5646_v16 = vld [vmem:[#allocation46_spill] sm:$0xff]  ;;  %v894_v51 = vmul.f32 %v5649_v23, %v893_v50  ;;  %v5652_v56 = vld [vmem:[#allocation25_spill] sm:$0xff] }
 0x158   : > { %v4208_v8 = vpop.permute.xlu0 %856  ;;  %v721_v63 = vadd.f32 %v5631_v20, %v693_v27  ;;  %v679_v13 = vadd.f32 %v5638_v54, %v651_v47  ;;  %v5647_v27 = vld [vmem:[#allocation37_spill] sm:$0xff] }
 0x159   : > { %v4213_v59 = vpop.permute.xlu2 %994  ;;  %v790_v18 = vadd.f32 %v5632_v26, %v762_v32  ;;  %v720_v57 = vadd.f32 %v5641_v4, %v692_v48  ;;  %v5648_v32 = vld [vmem:[#allocation44_spill] sm:$0xff]  ;;  %v907_v26 = vstv %s4272_s17  ;;  %s3232_s17 = sld [smem:[#allocation6 + $0x6e]] }
 0x15a   : > { %v749_v29 = vadd.f32 %v5635_v17, %v721_v63  ;;  %v707_v62 = vadd.f32 %v5642_v55, %v679_v13  ;;  %v871_v63 = vstv %s4268_s16  ;;  %v908_v48 = vmul.f32 %v5652_v56, %v907_v26  ;;  %s3583_s16 = smov 124  }
 0x15b   : > { %v818_v35 = vadd.f32 %v5636_v31, %v790_v18  ;;  %v748_v9 = vadd.f32 %v5643_v2, %v720_v57  ;;  %v873_v43 = vmul.f32 %v871_v63, %v5650_v22  ;;  %v872_v57 = vmul.f32 %v871_v63, %v5640_v61 }
 0x15c   : > { %v777_v60 = vadd.f32 %v5639_v38, %v749_v29  ;;  %v735_v52 = vadd.f32 %v5645_v25, %v707_v62  ;;  %v5651_v29 = vld [vmem:[#allocation40_spill] sm:$0xff]  ;;  %v899_v62 = vstv %s4296_s29  ;;  %s3236_s29 = sld [smem:[#allocation6 + $0x80]] }
 0x15d   : > { %v846_v34 = vadd.f32 %v4180_v19, %v818_v35  ;;  %v776_v6 = vadd.f32 %v5647_v27, %v748_v9  ;;  %v885_v35 = vstv %s4282_s18  ;;  %s3234_s18 = sld [smem:[#allocation6 + $0x77]] }
 0x15e   : > { %v805_v42 = vadd.f32 %v4136_v28, %v777_v60  ;;  %v763_v20 = vadd.f32 %v5648_v32, %v735_v52  ;;  %v5653_v60 = vld [vmem:[#allocation20_spill] sm:$0xff]  ;;  %v886_v25 = vmul.f32 %v5644_v37, %v885_v35 }
 0x15f   : > { %v4226_v58 = vpop.permute.xlu1 %940  ;;  %v868_v45 = vadd.f32 %v866_v15, %v846_v34  ;;  %v804_v17 = vadd.f32 %v4138_v33, %v776_v6  ;;  %v887_v15 = vmul.f32 %v5653_v60, %v885_v35  ;;  %v881_v52 = vmul.f32 %v5653_v60, %v879_v7 }
 0x160   : > { %v4228_v40 = vpop.permute.xlu0 %938  ;;  %v833_v28 = vadd.f32 %v5646_v16, %v805_v42  ;;  %v791_v31 = vadd.f32 %v5651_v29, %v763_v20  ;;  %v867_v42 = vmul.f32 %v865_v14, %v5650_v22  ;;  %v913_v16 = vstv %s4305_s11  ;;  %v5655_v14 = vld [vmem:[#allocation28_spill] sm:$0xff]  ;;  %s3235_s11 = sld [smem:[#allocation6 + $0x5c]] }
 0x161   : > { %v4234_v44 = vpop.permute.xlu2 %1010  ;;  %v882_v18 = vadd.f32 %v880_v49, %v868_v45  ;;  %v832_v13 = vadd.f32 %v4151_v53, %v804_v17  ;;  %v5654_v49 = vld [vmem:[#allocation22_spill] sm:$0xff]  ;;  %v915_v6 = vmul.f32 %v5655_v14, %v913_v16  ;;  %v900_v7 = vmul.f32 %v5649_v23, %v899_v62 }
 0x162   : > { %v861_v47 = vadd.f32 %v4208_v8, %v833_v28  ;;  %v819_v8 = vadd.f32 %v4153_v10, %v791_v31  ;;  %v901_v45 = vmul.f32 %v5654_v49, %v899_v62  ;;  %v914_v29 = vmul.f32 %v5652_v56, %v913_v16 }
 0x163   : > { %v896_v38 = vadd.f32 %v894_v51, %v882_v18  ;;  %v860_v2 = vadd.f32 %v4127_v1, %v832_v13  ;;  %v895_v1 = vmul.f32 %v5654_v49, %v893_v50 }
 0x164   : > { %v875_v34 = vadd.f32 %v873_v43, %v861_v47  ;;  %v847_v55 = vadd.f32 %v4178_v41, %v819_v8  ;;  %v909_v43 = vmul.f32 %v5655_v14, %v907_v26 }
 0x165   : > { %v910_v53 = vadd.f32 %v908_v48, %v896_v38  ;;  %v874_v27 = vadd.f32 %v872_v57, %v860_v2 }
 0x166   : > { %v889_v9 = vadd.f32 %v887_v15, %v875_v34  ;;  %v869_v10 = vadd.f32 %v867_v42, %v847_v55  ;;  %v1143_v42 = vstv %s4330_s28  ;;  %s3237_s28 = sld [smem:[#allocation6 + $0x65]] }
 0x167   : > { %v4240_v3 = vpop.permute.xlu1 %966  ;;  %v930_v61 = vadd.f32 %v4206_v30, %v910_v53  ;;  %v888_v18 = vadd.f32 %v886_v25, %v874_v27 }
 0x168   : > { %v4242_v46 = vpop.permute.xlu0 %954  ;;  %v903_v41 = vadd.f32 %v901_v45, %v889_v9  ;;  %v883_v20 = vadd.f32 %v881_v52, %v869_v10  ;;  %v1151_v52 = vstv %s4340_s30  ;;  %s4431_s30 = sld [smem:[#allocation6 + $0x4c]] }
 0x169   : > { %v4253_v21 = vpop.permute.xlu2 %1036  ;;  %v958_v51 = vadd.f32 %v4158_v24, %v930_v61  ;;  %v902_v31 = vadd.f32 %v900_v7, %v888_v18 }
 0x16a   : > { %v917_v37 = vadd.f32 %v915_v6, %v903_v41  ;;  %v897_v47 = vadd.f32 %v895_v1, %v883_v20 }
 0x16b   : > { %v916_v48 = vadd.f32 %v914_v29, %v902_v31 }
 0x16c   : > { %v945_v17 = vadd.f32 %v4226_v58, %v917_v37  ;;  %v911_v24 = vadd.f32 %v909_v43, %v897_v47  ;;  %v1258_v43 = vstv %s4348_s27  ;;  %s3254_s27 = sld [smem:[#allocation6 + $0x70]] }
 0x16d   : > { %v944_v26 = vadd.f32 %v4228_v40, %v916_v48  ;;  %v4360_v48 = vld [vmem:[%s3701_s24 + $0xa] sm:$0xff] }
 0x16e   : > { %v973_v23 = vadd.f32 %v4187_v36, %v945_v17  ;;  %v931_v56 = vadd.f32 %v4141_v11, %v911_v24  ;;  %v1272_v24 = vstv %s3225_s9  ;;  %s4458_s9 = sshll.u32 %s5690_s22, 4  ;;  %s3255_s22 = sld [smem:[#allocation6 + $0x55]] }
 0x16f   : > { %v4258_v39 = vpop.permute.xlu1 %982 }
 0x170   : > { %v4260_v5 = vpop.permute.xlu0 %980  ;;  %v959_v57 = vadd.f32 %v4242_v46, %v931_v56 }
 0x171   : > { %v4284_v12 = vpop.permute.xlu2 %1052  ;;  %v986_v22 = vadd.f32 %v4260_v5, %v958_v51 }
 0x172   : > { %v987_v40 = vadd.f32 %v4258_v39, %v959_v57 }
 0x177   : > { %v1009_v0 = vpop.permute.xlu1 %1008 }
 0x178   : > { %v4287_v19 = vpop.permute.xlu0 %996  ;;  %v1014_v35 = vadd.f32 %v1009_v0, %v986_v22  ;;  %v972_v0 = vadd.f32 %v4240_v3, %v944_v26  ;;  %v4351_v22 = vld [vmem:[%s3701_s24 + $0x2] sm:$0xff]  ;;  %v4371_v26 = vld [vmem:[%s3701_s24 + $0x32] sm:$0xff] }
 0x179   : > { %v4310_v33 = vpop.permute.xlu2 %1078  ;;  %v1001_v38 = vadd.f32 %v4287_v19, %v973_v23  ;;  %v1259_v29 = vmul.f32 %v1258_v43, %v4351_v22 }
 0x17a   : > { %v1042_v5 = vadd.f32 %v4253_v21, %v1014_v35  ;;  %v1000_v21 = vadd.f32 %v4213_v59, %v972_v0  ;;  %v1244_v35 = vstv %s3223_s8  ;;  %s4454_s8 = sld [smem:[#allocation6 + $0x79]] }
 0x17b   : > { %v1246_v23 = vmul.f32 %v1244_v35, %v4360_v48 }
 0x17f   : > { %v1025_v54 = vpop.permute.xlu1 %1024 }
 0x180   : > { %v1023_v4 = vpop.permute.xlu0 %1022  ;;  %v1029_v15 = vadd.f32 %v1025_v54, %v1001_v38  ;;  %v1015_v54 = vadd.f32 %v4234_v44, %v987_v40  ;;  %v1300_v38 = vstv %s4362_s7  ;;  %v4395_v40 = vld [vmem:[%s3701_s24 + $0x4a] sm:$0xff]  ;;  %s4608_s7 = sld [smem:[#allocation6 + $0x58]] }
 0x181   : > { %v1095_v63 = vpop.permute.xlu2 %1094  ;;  %v1028_v55 = vadd.f32 %v1023_v4, %v1000_v21  ;;  %v1301_v0 = vmul.f32 %v4371_v26, %v1300_v38  ;;  %v1342_v21 = vstv %s4386_s10  ;;  %s3257_s10 = sld [smem:[#allocation6 + $0x5e]] }
 0x182   : > { %v1057_v19 = vadd.f32 %v4284_v12, %v1029_v15  ;;  %v1286_v15 = vstv %s3226_s21  ;;  %s3284_s21 = sld [smem:[#allocation6 + $0x73]] }
 0x187   : > { %v1051_v28 = vpop.permute.xlu1 %1050 }
 0x188   : > { %v1039_v32 = vpop.permute.xlu0 %1038  ;;  %v1056_v46 = vadd.f32 %v1051_v28, %v1028_v55  ;;  %v1343_v55 = vmul.f32 %v4395_v40, %v1342_v21 }
 0x189   : > { %v1121_v13 = vpop.permute.xlu2 %1120  ;;  %v1043_v25 = vadd.f32 %v1039_v32, %v1015_v54  ;;  %v4405_v54 = vld [vmem:[%s3701_s24 + $0x52] sm:$0xff] }
 0x18a   : > { %v1084_v59 = vadd.f32 %v4310_v33, %v1056_v46 }
 0x18f   : > { %v1067_v30 = vpop.permute.xlu1 %1066 }
 0x190   : > { %v1065_v50 = vpop.permute.xlu0 %1064  ;;  %v1071_v16 = vadd.f32 %v1067_v30, %v1043_v25 }
 0x191   : > { %v1070_v58 = vadd.f32 %v1065_v50, %v1042_v5  ;;  %v1137_v53 = vpop.permute.xlu2 %1136  ;;  %v4357_v50 = vld [vmem:[%s3701_s24 + $0x22] sm:$0xff]  ;;  %v1245_v5 = vmul.f32 %v1244_v35, %v4351_v22 }
 0x192   : > { %v1099_v44 = vadd.f32 %v1095_v63, %v1071_v16  ;;  %v1288_v57 = vmul.f32 %v4357_v50, %v1286_v15 }
 0x197   : > { %v1093_v60 = vpop.permute.xlu1 %1092 }
 0x198   : > { %v1098_v34 = vadd.f32 %v1093_v60, %v1070_v58  ;;  %v1081_v8 = vpop.permute.xlu0 %1080  ;;  %v4375_v58 = vld [vmem:[%s3701_s24 + $0x1a] sm:$0xff]  ;;  %v1260_v60 = vmul.f32 %v1258_v43, %v4360_v48 }
 0x199   : > { %v1085_v62 = vadd.f32 %v1081_v8, %v1057_v19  ;;  %v1273_v56 = vmul.f32 %v4375_v58, %v1272_v24  ;;  %v1314_v8 = vstv %s3228_s25  ;;  %s4465_s25 = scalar_lea.vmem %s5538_s3, %s4458_s9 }
 0x19a   : > { %v1126_v36 = vadd.f32 %v1121_v13, %v1098_v34  ;;  %v1274_v13 = vmul.f32 %v4357_v50, %v1272_v24  ;;  %v4384_v34 = vld [vmem:[%s3701_s24 + $0x3a] sm:$0xff]  ;;  %v1315_v19 = vmul.f32 %v4371_v26, %v1314_v8 }
 0x19c   : > { %v1144_v11 = vadd.f32 %v1143_v42, %v1126_v36  ;;  %v1316_v36 = vmul.f32 %v4384_v34, %v1314_v8 }
 0x19e   : > { %v1146_v3 = vmax.f32 %v1144_v11, 0.0  ;;  %v1302_v11 = vmul.f32 %v4384_v34, %v1300_v38  ;;  %v1580_v38 = vstv %s3257_s10  ;;  %s4638_s10 = sld [smem:[#allocation6 + $0x51]] }
 0x19f   : > { %v1109_v2 = vpop.permute.xlu1 %1108 }
 0x1a0   : > { %v1148_v9 = vpack.c.bf16 %v1146_v3, %v1146_v3  ;;  %v1113_v49 = vadd.f32 %v1109_v2, %v1085_v62  ;;  %v1107_v45 = vpop.permute.xlu0 %1106  ;;  %v1328_v62 = vstv %s3229_s14  ;;  %v1356_v3 = vstv %s3231_s12  ;;  %s4490_s14 = sld [smem:[#allocation6 + $0x67]] }
 0x1a1   : > { %v1112_v4 = vadd.f32 %v1107_v45, %v1084_v59  ;;  %v1330_v2 = vmul.f32 %v4405_v54, %v1328_v62  ;;  %v1358_v46 = vmul.f32 %v1356_v3, %v4360_v48  ;;  %v1344_v45 = vmul.f32 %v4405_v54, %v1342_v21  ;;  %s3258_s12 = sld [smem:[#allocation6 + $0x82]]  ;;  %v4507_v21 = vld [vmem:[%s3701_s24 + $0x34] sm:$0xff] }
 0x1a2   : > { %v1141_v10 = vadd.f32 %v1137_v53, %v1113_v49  ;;  %v1160_v39 = vunpack.c.l.b16 %v1148_v9  ;;  %v1329_v53 = vmul.f32 %v4395_v40, %v1328_v62  ;;  %v1384_v9 = vstv %s3233_s15  ;;  %5659 = vst [vmem:[#allocation12_spill] sm:$0xff] %v4507_v21  ;;  %s3260_s15 = sld [smem:[#allocation6 + $0x8b]] }
 0x1a3   : > { %v1357_v49 = vmul.f32 %v1356_v3, %v4351_v22  ;;  %v1385_v25 = vmul.f32 %v4375_v58, %v1384_v9 }
 0x1a4   : > { %v1153_v12 = vadd.f32 %v1151_v52, %v1141_v10  ;;  %v1166_v27 = vpack.c.b16 %v1160_v39, %v1160_v39  ;;  %v1398_v10 = vstv %s3234_s18  ;;  %s3261_s18 = sld [smem:[#allocation6 + $0x4d]] }
 0x1a5   : > { %v1400_v59 = vmul.f32 %v4357_v50, %v1398_v10 }
 0x1a6   : > { %v1155_v61 = vmax.f32 %v1153_v12, 0.0  ;;  %1170 = vrot.lane.b32.xlu0 %v1166_v27, %s3582_s6  ;;  %v1426_v12 = vstv %s3236_s29  ;;  %v1399_v27 = vmul.f32 %v4375_v58, %v1398_v10  ;;  %s3263_s29 = sld [smem:[#allocation6 + $0x56]] }
 0x1a7   : > { %v1135_v14 = vpop.permute.xlu1 %1134  ;;  %v1594_v3 = vstv %s3258_s12  ;;  %s4653_s12 = sld [smem:[#allocation6 + $0x5a]] }
 0x1a8   : > { %v1157_v28 = vpack.c.bf16 %v1155_v61, %v1155_v61  ;;  %v1140_v6 = vadd.f32 %v1135_v14, %v1112_v4  ;;  %v1123_v41 = vpop.permute.xlu0 %1122  ;;  %v1386_v4 = vmul.f32 %v4357_v50, %v1384_v9  ;;  %v1427_v61 = vmul.f32 %v4371_v26, %v1426_v12 }
 0x1a9   : > { %v1127_v32 = vadd.f32 %v1123_v41, %v1099_v44  ;;  %v1412_v44 = vstv %s3235_s11  ;;  %v1440_v14 = vstv %s3237_s28  ;;  %v1622_v9 = vstv %s3260_s15  ;;  %s4551_s11 = sld [smem:[#allocation6 + $0x5f]] }
 0x1aa   : > { %v1152_v20 = vadd.f32 %v1151_v52, %v1140_v6  ;;  %v1165_v1 = vunpack.c.l.b16 %v1157_v28  ;;  %v1370_v52 = vstv %s3232_s17  ;;  %v1414_v28 = vmul.f32 %v4384_v34, %v1412_v44  ;;  %s4522_s17 = sld [smem:[#allocation6 + $0x71]] }
 0x1ab   : > { %v1145_v18 = vadd.f32 %v1143_v42, %v1127_v32  ;;  %v1287_v42 = vmul.f32 %v4375_v58, %v1286_v15  ;;  %v1372_v39 = vmul.f32 %v1370_v52, %v4360_v48  ;;  %v1371_v16 = vmul.f32 %v1370_v52, %v4351_v22  ;;  %v4440_v32 = vld [vmem:[%s3701_s24 + $0x4] sm:$0xff]  ;;  %s3264_s28 = sld [smem:[#allocation6 + $0x7a]] }
 0x1ac   : > { %v1154_v33 = vmax.f32 %v1152_v20, 0.0  ;;  %v1169_v51 = vpack.c.b16 %v1165_v1, %v1165_v1  ;;  %v1413_v6 = vmul.f32 %v4371_v26, %v1412_v44  ;;  %v1442_v41 = vmul.f32 %v4405_v54, %v1440_v14  ;;  %s4660_s15 = sld [smem:[#allocation6 + $0x63]] }
 0x1ad   : > { %v1147_v37 = vmax.f32 %v1145_v18, 0.0  ;;  %v1524_v20 = vstv %s4431_s30  ;;  %v1441_v1 = vmul.f32 %v4395_v40, %v1440_v14  ;;  %v1428_v18 = vmul.f32 %v4384_v34, %v1426_v12  ;;  %s3266_s30 = sld [smem:[#allocation6 + $0x83]] }
 0x1ae   : > { %v1156_v7 = vpack.c.bf16 %v1154_v33, %v1154_v33  ;;  %1176 = vrot.lane.b32.xlu0 %v1169_v51, %s3582_s6  ;;  %v1525_v33 = vmul.f32 %v1524_v20, %v4440_v32 }
 0x1af   : > { %v1149_v63 = vpack.c.bf16 %v1147_v37, %v1147_v37  ;;  %v4452_v37 = vld [vmem:[%s3701_s24 + $0xc] sm:$0xff] }
 0x1b0   : > { %v1164_v47 = vunpack.c.l.b16 %v1156_v7  ;;  %v1538_v7 = vstv %s3254_s27  ;;  %v1526_v35 = vmul.f32 %v1524_v20, %v4452_v37  ;;  %s3267_s27 = sld [smem:[#allocation6 + $0x68]] }
 0x1b1   : > { %v1161_v30 = vunpack.c.l.b16 %v1149_v63 }
 0x1b2   : > { %v1168_v17 = vpack.c.b16 %v1164_v47, %v1164_v47  ;;  %v1540_v47 = vmul.f32 %v1538_v7, %v4452_v37 }
 0x1b3   : > { %v1167_v31 = vpack.c.b16 %v1161_v30, %v1161_v30 }
 0x1b4   : > { %1174 = vrot.lane.b32.xlu2 %v1168_v17, %s3582_s6  ;;  %v4473_v17 = vld [vmem:[%s3701_s24 + $0x1c] sm:$0xff] }
 0x1b5   : > { %1172 = vrot.lane.b32.xlu1 %v1167_v31, %s3582_s6  ;;  %s3238_s6 = sld [smem:[#allocation6 + $0x89]]  ;;  %5656 = vst [vmem:[#allocation11_spill] sm:$0xff] %v4473_v17  ;;  %v1539_v31 = vmul.f32 %v1538_v7, %v4440_v32 }
 0x1b6   : > { %1263 = vrot.lane.b32.xlu0 %v1259_v29, %s3581_s13  ;;  %v1566_v29 = vstv %s4454_s8  ;;  %s3283_s8 = sld [smem:[#allocation6 + $0x4f]] }
 0x1b7   : > { %v1567_v24 = vmul.f32 %v4473_v17, %v1566_v29 }
 0x1bb   : > { %v1454_v51 = vstv %s3238_s6  ;;  %s4578_s6 = sld [smem:[#allocation6 + $0x8c]] }
 0x1bc   : > { %1251 = vrot.lane.b32.xlu2 %v1246_v23, %s3581_s13  ;;  %v1456_v63 = vmul.f32 %v4405_v54, %v1454_v51  ;;  %v1455_v43 = vmul.f32 %v4395_v40, %v1454_v51  ;;  %v1552_v23 = vstv %s3255_s22  ;;  %v1692_v51 = vstv %s4551_s11  ;;  %s4636_s22 = sld [smem:[#allocation6 + $0x48]] }
 0x1bd   : > { %1249 = vrot.lane.b32.xlu1 %v1245_v5, %s3581_s13  ;;  %v1553_v15 = vmul.f32 %v4473_v17, %v1552_v23  ;;  %s4683_s11 = sld [smem:[#allocation6 + $0x6a]] }
 0x1be   : > { %1279 = vrot.lane.b32.xlu0 %v1274_v13, %s3581_s13  ;;  %v4485_v13 = vld [vmem:[%s3701_s24 + $0x3c] sm:$0xff] }
 0x1bf   : > { %5657 = vst [vmem:[#allocation19_spill] sm:$0xff] %v4485_v13  ;;  %v1582_v8 = vmul.f32 %v4485_v13, %v1580_v38 }
 0x1c4   : > { %1277 = vrot.lane.b32.xlu2 %v1273_v56, %s3581_s13  ;;  %v4488_v56 = vld [vmem:[%s3701_s24 + $0x24] sm:$0xff] }
 0x1c5   : > { %1265 = vrot.lane.b32.xlu1 %v1260_v60, %s3581_s13 }
 0x1c6   : > { %1305 = vrot.lane.b32.xlu0 %v1301_v0, %s3581_s13  ;;  %v1554_v0 = vmul.f32 %v4488_v56, %v1552_v23 }
 0x1cc   : > { %1293 = vrot.lane.b32.xlu2 %v1288_v57, %s3581_s13 }
 0x1cd   : > { %1291 = vrot.lane.b32.xlu1 %v1287_v42, %s3581_s13  ;;  %v4503_v42 = vld [vmem:[%s3701_s24 + $0x4c] sm:$0xff] }
 0x1ce   : > { %1321 = vrot.lane.b32.xlu0 %v1316_v36, %s3581_s13  ;;  %5658 = vst [vmem:[#allocation26_spill] sm:$0xff] %v4503_v42  ;;  %v1608_v36 = vstv %s4490_s14  ;;  %v1623_v12 = vmul.f32 %v4503_v42, %v1622_v9  ;;  %s4651_s14 = sld [smem:[#allocation6 + $0x85]] }
 0x1cf   : > { %v1609_v62 = vmul.f32 %v4503_v42, %v1608_v36 }
 0x1d4   : > { %1319 = vrot.lane.b32.xlu2 %v1315_v19, %s3581_s13 }
 0x1d5   : > { %1307 = vrot.lane.b32.xlu1 %v1302_v11, %s3581_s13  ;;  %v1581_v11 = vmul.f32 %v4507_v21, %v1580_v38 }
 0x1d6   : > { %1347 = vrot.lane.b32.xlu0 %v1343_v55, %s3581_s13  ;;  %v1568_v55 = vmul.f32 %v4488_v56, %v1566_v29 }
 0x1dc   : > { %1335 = vrot.lane.b32.xlu2 %v1330_v2, %s3581_s13 }
 0x1dd   : > { %1333 = vrot.lane.b32.xlu1 %v1329_v53, %s3581_s13 }
 0x1de   : > { %1363 = vrot.lane.b32.xlu0 %v1358_v46, %s3583_s16  ;;  %v4520_v46 = vld [vmem:[%s3701_s24 + $0x54] sm:$0xff] }
 0x1df   : > { %5660 = vst [vmem:[#allocation15_spill] sm:$0xff] %v4520_v46  ;;  %v1624_v52 = vmul.f32 %v4520_v46, %v1622_v9  ;;  %v4606_v9 = vld [vmem:[%s3701_s24 + $0xe] sm:$0xff] }
 0x1e4   : > { %1361 = vrot.lane.b32.xlu2 %v1357_v49, %s3583_s16 }
 0x1e5   : > { %1349 = vrot.lane.b32.xlu1 %v1344_v45, %s3581_s13  ;;  %v1596_v45 = vmul.f32 %v4485_v13, %v1594_v3 }
 0x1e6   : > { %1389 = vrot.lane.b32.xlu0 %v1385_v25, %s3583_s16  ;;  %v1595_v25 = vmul.f32 %v4507_v21, %v1594_v3 }
 0x1ec   : > { %1377 = vrot.lane.b32.xlu2 %v1372_v39, %s3583_s16 }
 0x1ed   : > { %1375 = vrot.lane.b32.xlu1 %v1371_v16, %s3583_s16  ;;  %v1650_v16 = vstv %s4522_s17  ;;  %s4664_s17 = sld [smem:[#allocation6 + $0x6c]] }
 0x1ee   : > { %1405 = vrot.lane.b32.xlu0 %v1400_v59, %s3583_s16 }
 0x1f4   : > { %1403 = vrot.lane.b32.xlu2 %v1399_v27, %s3583_s16  ;;  %v1610_v27 = vmul.f32 %v4520_v46, %v1608_v36 }
 0x1f5   : > { %1391 = vrot.lane.b32.xlu1 %v1386_v4, %s3583_s16  ;;  %v1651_v4 = vmul.f32 %v1650_v16, %v4440_v32 }
 0x1f6   : > { %1431 = vrot.lane.b32.xlu0 %v1427_v61, %s3583_s16  ;;  %v1636_v61 = vstv %s3261_s18  ;;  %s4667_s18 = sld [smem:[#allocation6 + $0x75]] }
 0x1f7   : > { %v1637_v20 = vmul.f32 %v1636_v61, %v4440_v32 }
 0x1fc   : > { %1419 = vrot.lane.b32.xlu2 %v1414_v28, %s3583_s16  ;;  %v1664_v28 = vstv %s3263_s29  ;;  %s4671_s29 = sld [smem:[#allocation6 + $0x61]] }
 0x1fd   : > { %1417 = vrot.lane.b32.xlu1 %v1413_v6, %s3583_s16 }
 0x1fe   : > { %1447 = vrot.lane.b32.xlu0 %v1442_v41, %s3583_s16  ;;  %v1638_v41 = vmul.f32 %v1636_v61, %v4452_v37  ;;  %v4623_v61 = vld [vmem:[%s3701_s24 + $0x1e] sm:$0xff] }
 0x204   : > { %1445 = vrot.lane.b32.xlu2 %v1441_v1, %s3583_s16  ;;  %v1666_v1 = vmul.f32 %v4488_v56, %v1664_v28 }
 0x205   : > { %1433 = vrot.lane.b32.xlu1 %v1428_v18, %s3583_s16 }
 0x206   : > { %1529 = vrot.lane.b32.xlu0 %v1525_v33, %s3581_s13 }
 0x20c   : > { %1461 = vrot.lane.b32.xlu2 %v1456_v63, %s3583_s16  ;;  %v1665_v63 = vmul.f32 %v4473_v17, %v1664_v28  ;;  %v1832_v28 = vstv %s4608_s7  ;;  %s4770_s7 = sld [smem:[#allocation6 + $0x4b]] }
 0x20d   : > { %1459 = vrot.lane.b32.xlu1 %v1455_v43, %s3583_s16  ;;  %v1652_v43 = vmul.f32 %v1650_v16, %v4452_v37 }
 0x20e   : > { %v1175_v30 = vpop.permute.xlu2 %1174  ;;  %1545 = vrot.lane.b32.xlu0 %v1540_v47, %s3581_s13  ;;  %v1693_v47 = vmul.f32 %v4507_v21, %v1692_v51 }
 0x20f   : > { %1185 = vst.msk [vmem:[%s4465_s25 + $0x8] sm:$0xf] %vm1182_vm0, %v1175_v30  ;;  %v1678_v30 = vstv %s3264_s28  ;;  %s4689_s28 = sld [smem:[#allocation6 + $0x7e]] }
 0x210   : > { %v1680_v23 = vmul.f32 %v4488_v56, %v1678_v30  ;;  %v1679_v38 = vmul.f32 %v4473_v17, %v1678_v30 }
 0x214   : > { %1543 = vrot.lane.b32.xlu2 %v1539_v31, %s3581_s13 }
 0x215   : > { %1531 = vrot.lane.b32.xlu1 %v1526_v35, %s3581_s13  ;;  %v1706_v35 = vstv %s3266_s30  ;;  %s4702_s30 = sld [smem:[#allocation6 + $0x87]] }
 0x216   : > { %1571 = vrot.lane.b32.xlu0 %v1567_v24, %s3581_s13  ;;  %v4482_v5 = vpop.permute.xlu2 %1251 }
 0x218   : > { %v1171_v60 = vpop.permute.xlu0 %1170 }
 0x219   : > { %1183 = vst.msk [vmem:[%s4465_s25] sm:$0xf] %vm1182_vm0, %v1171_v60  ;;  %v1708_v60 = vmul.f32 %v4485_v13, %v1706_v35 }
 0x21c   : > { %1559 = vrot.lane.b32.xlu2 %v1554_v0, %s3581_s13 }
 0x21d   : > { %1557 = vrot.lane.b32.xlu1 %v1553_v15, %s3581_s13 }
 0x21e   : > { %1587 = vrot.lane.b32.xlu0 %v1582_v8, %s3581_s13  ;;  %v4500_v57 = vpop.permute.xlu2 %1277  ;;  %v1734_v8 = vstv %s4578_s6  ;;  %s4722_s6 = sld [smem:[#allocation6 + $0x50]] }
 0x220   : > { %v1177_v19 = vpop.permute.xlu0 %1176 }
 0x221   : > { %1186 = vst.msk [vmem:[%s4465_s25 + $0xc] sm:$0xf] %vm1182_vm0, %v1177_v19  ;;  %v1707_v19 = vmul.f32 %v4507_v21, %v1706_v35  ;;  %v4648_v35 = vld [vmem:[%s3701_s24 + $0x26] sm:$0xff]  ;;  %v1232_v21 = vstv %s4660_s15  ;;  %s4818_s15 = sld [smem:[#allocation6 + $0x66]] }
 0x222   : > { %5664 = vst [vmem:[#allocation35_spill] sm:$0xff] %v4648_v35 }
 0x224   : > { %1585 = vrot.lane.b32.xlu2 %v1581_v11, %s3581_s13  ;;  %v1694_v11 = vmul.f32 %v4485_v13, %v1692_v51  ;;  %v1736_v51 = vmul.f32 %v4520_v46, %v1734_v8 }
 0x225   : > { %1573 = vrot.lane.b32.xlu1 %v1568_v55, %s3581_s13  ;;  %v1735_v55 = vmul.f32 %v4503_v42, %v1734_v8 }
 0x226   : > { %1613 = vrot.lane.b32.xlu0 %v1609_v62, %s3581_s13  ;;  %v4517_v2 = vpop.permute.xlu2 %1293  ;;  %v1720_v62 = vstv %s3267_s27  ;;  %s4739_s27 = sld [smem:[#allocation6 + $0x8e]] }
 0x227   : > { %v1173_v53 = vpop.permute.xlu1 %1172  ;;  %v1721_v16 = vmul.f32 %v4503_v42, %v1720_v62 }
 0x228   : > { %1184 = vst.msk [vmem:[%s4465_s25 + $0x4] sm:$0xf] %vm1182_vm0, %v1173_v53  ;;  %v4526_v49 = vpop.permute.xlu0 %1263  ;;  %s4629_s25 = sld [smem:[#allocation6 + $0x7c]] }
 0x22c   : > { %1601 = vrot.lane.b32.xlu2 %v1596_v45, %s3581_s13  ;;  %v1804_v45 = vstv %s3283_s8  ;;  %s4750_s8 = sld [smem:[#allocation6 + $0x74]] }
 0x22d   : > { %1599 = vrot.lane.b32.xlu1 %v1595_v25, %s3581_s13 }
 0x22e   : > { %1629 = vrot.lane.b32.xlu0 %v1624_v52, %s3581_s13  ;;  %v4534_v10 = vpop.permute.xlu2 %1319  ;;  %v1722_v52 = vmul.f32 %v4520_v46, %v1720_v62 }
 0x22f   : > { %v4536_v39 = vpop.permute.xlu1 %1249 }
 0x230   : > { %v4539_v59 = vpop.permute.xlu0 %1279 }
 0x234   : > { %1627 = vrot.lane.b32.xlu2 %v1623_v12, %s3581_s13  ;;  %v1806_v12 = vmul.f32 %v1804_v45, %v4606_v9 }
 0x235   : > { %1615 = vrot.lane.b32.xlu1 %v1610_v27, %s3581_s13 }
 0x236   : > { %1655 = vrot.lane.b32.xlu0 %v1651_v4, %s3583_s16  ;;  %v4547_v44 = vpop.permute.xlu2 %1335 }
 0x237   : > { %v4549_v14 = vpop.permute.xlu1 %1265 }
 0x238   : > { %v4553_v6 = vpop.permute.xlu0 %1305 }
 0x23c   : > { %1643 = vrot.lane.b32.xlu2 %v1638_v41, %s3583_s16  ;;  %v4627_v41 = vld [vmem:[%s3701_s24 + $0x6] sm:$0xff] }
 0x23d   : > { %1641 = vrot.lane.b32.xlu1 %v1637_v20, %s3583_s16 }
 0x23e   : > { %1671 = vrot.lane.b32.xlu0 %v1666_v1, %s3583_s16  ;;  %v4561_v18 = vpop.permute.xlu2 %1361  ;;  %v1805_v1 = vmul.f32 %v1804_v45, %v4627_v41 }
 0x23f   : > { %v4563_v33 = vpop.permute.xlu1 %1291 }
 0x240   : > { %v4566_v7 = vpop.permute.xlu0 %1321 }
 0x244   : > { %1669 = vrot.lane.b32.xlu2 %v1665_v63, %s3583_s16  ;;  %v1833_v63 = vmul.f32 %v4623_v61, %v1832_v28 }
 0x245   : > { %1657 = vrot.lane.b32.xlu1 %v1652_v43, %s3583_s16  ;;  %v1818_v43 = vstv %s3284_s21  ;;  %s4781_s21 = sld [smem:[#allocation6 + $0x7d]] }
 0x246   : > { %1697 = vrot.lane.b32.xlu0 %v1693_v47, %s3583_s16  ;;  %v4574_v29 = vpop.permute.xlu2 %1377  ;;  %v1819_v8 = vmul.f32 %v1818_v43, %v4627_v41 }
 0x247   : > { %v4576_v31 = vpop.permute.xlu1 %1307 }
 0x248   : > { %v4580_v24 = vpop.permute.xlu0 %1347 }
 0x24c   : > { %1685 = vrot.lane.b32.xlu2 %v1680_v23, %s3583_s16  ;;  %v1846_v23 = vstv %s4629_s25  ;;  %s4790_s25 = sld [smem:[#allocation6 + $0x54]] }
 0x24d   : > { %1683 = vrot.lane.b32.xlu1 %v1679_v38, %s3583_s16 }
 0x24e   : > { %1713 = vrot.lane.b32.xlu0 %v1708_v60, %s3583_s16  ;;  %v4588_v0 = vpop.permute.xlu2 %1403  ;;  %v1820_v60 = vmul.f32 %v1818_v43, %v4606_v9  ;;  %v1847_v43 = vmul.f32 %v4623_v61, %v1846_v23 }
 0x24f   : > { %5661 = vst [vmem:[#allocation17_spill] sm:$0xff] %v4588_v0  ;;  %v4590_v15 = vpop.permute.xlu1 %1333 }
 0x250   : > { %v4593_v36 = vpop.permute.xlu0 %1363 }
 0x254   : > { %1711 = vrot.lane.b32.xlu2 %v1707_v19, %s3583_s16  ;;  %v1848_v19 = vmul.f32 %v4648_v35, %v1846_v23  ;;  %v1196_v23 = vstv %s4664_s17  ;;  %s4826_s17 = sld [smem:[#allocation6 + $0x78]] }
 0x255   : > { %1699 = vrot.lane.b32.xlu1 %v1694_v11, %s3583_s16  ;;  %v1190_v11 = vstv %s4636_s22  ;;  %s4796_s22 = sld [smem:[#allocation6 + $0x5d]] }
 0x256   : > { %1739 = vrot.lane.b32.xlu0 %v1735_v55, %s3583_s16  ;;  %v4601_v3 = vpop.permute.xlu2 %1419  ;;  %v1204_v55 = vstv %s4638_s10  ;;  %v1192_v45 = vmul.f32 %v1190_v11, %v4360_v48  ;;  %s4800_s10 = sld [smem:[#allocation6 + $0x6f]] }
 0x257   : > { %v4603_v53 = vpop.permute.xlu1 %1349 }
 0x258   : > { %v4610_v25 = vpop.permute.xlu0 %1389 }
 0x25c   : > { %1727 = vrot.lane.b32.xlu2 %v1722_v52, %s3583_s16  ;;  %v1206_v52 = vmul.f32 %v4357_v50, %v1204_v55 }
 0x25d   : > { %1725 = vrot.lane.b32.xlu1 %v1721_v16, %s3583_s16 }
 0x25e   : > { %1811 = vrot.lane.b32.xlu0 %v1806_v12, %s3581_s13  ;;  %v4618_v27 = vpop.permute.xlu2 %1445  ;;  %v4680_v12 = vld [vmem:[%s3701_s24 + $0x36] sm:$0xff]  ;;  %v1208_v42 = vadd.f32 %v1206_v52, %v1192_v45  ;;  %v1860_v52 = vstv %s4671_s29  ;;  %s4857_s29 = sld [smem:[#allocation6 + $0x6b]] }
 0x25f   : > { %v4620_v4 = vpop.permute.xlu1 %1375 }
 0x260   : > { %5662 = vst [vmem:[#allocation13_spill] sm:$0xff] %v4620_v4  ;;  %v4631_v20 = vpop.permute.xlu0 %1405  ;;  %v1238_v4 = vstv %s4702_s30  ;;  %s4890_s30 = sld [smem:[#allocation6 + $0x8f]] }
 0x264   : > { %1809 = vrot.lane.b32.xlu2 %v1805_v1, %s3581_s13  ;;  %v5569_v1 = vstv %s4651_s14 }
 0x265   : > { %1741 = vrot.lane.b32.xlu1 %v1736_v51, %s3583_s16  ;;  %v1218_v51 = vstv %s4653_s12  ;;  %s4816_s12 = sld [smem:[#allocation6 + $0x62]] }
 0x266   : > { %1837 = vrot.lane.b32.xlu0 %v1833_v63, %s3581_s13  ;;  %v4643_v47 = vpop.permute.xlu2 %1461  ;;  %v1220_v46 = vmul.f32 %v4384_v34, %v1218_v51 }
 0x267   : > { %5663 = vst [vmem:[#allocation33_spill] sm:$0xff] %v4643_v47  ;;  %v4645_v30 = vpop.permute.xlu1 %1391  ;;  %v1234_v47 = vmul.f32 %v4405_v54, %v1232_v21 }
 0x268   : > { %v4655_v38 = vpop.permute.xlu0 %1431 }
 0x269   : > { %5665 = vst [vmem:[#allocation21_spill] sm:$0xff] %v4655_v38  ;;  %v1210_v38 = vstv %s4667_s18  ;;  %s4847_s18 = sld [smem:[#allocation6 + $0x81]] }
 0x26a   : > { %v1212_v45 = vmul.f32 %v4357_v50, %v1210_v38 }
 0x26c   : > { %1825 = vrot.lane.b32.xlu2 %v1820_v60, %s3581_s13  ;;  %v1191_v60 = vmul.f32 %v1190_v11, %v4351_v22 }
 0x26d   : > { %1823 = vrot.lane.b32.xlu1 %v1819_v8, %s3581_s13  ;;  %v1205_v8 = vmul.f32 %v4375_v58, %v1204_v55  ;;  %v1219_v55 = vmul.f32 %v4371_v26, %v1218_v51  ;;  %v1888_v51 = vstv %s4683_s11  ;;  %s4870_s11 = sld [smem:[#allocation6 + $0x8a]] }
 0x26e   : > { %1853 = vrot.lane.b32.xlu0 %v1848_v19, %s3581_s13  ;;  %v4673_v62 = vpop.permute.xlu2 %1543  ;;  %v1834_v19 = vmul.f32 %v4648_v35, %v1832_v28  ;;  %v1198_v28 = vmul.f32 %v1196_v23, %v4360_v48 }
 0x26f   : > { %5666 = vst [vmem:[#allocation31_spill] sm:$0xff] %v4673_v62  ;;  %v4677_v16 = vpop.permute.xlu1 %1417  ;;  %v1875_v62 = vmul.f32 %v4680_v12, %v5569_v1  ;;  %v1207_v11 = vadd.f32 %v1205_v8, %v1191_v60  ;;  %v1222_v1 = vadd.f32 %v1220_v46, %v1208_v42  ;;  %v4716_v60 = vld [vmem:[%s3701_s24 + $0x56] sm:$0xff]  ;;  %v4720_v8 = vld [vmem:[%s3701_s24 + $0x3e] sm:$0xff]  ;;  %v1233_v42 = vmul.f32 %v4395_v40, %v1232_v21 }
 0x270   : > { %v4686_v63 = vpop.permute.xlu0 %1447  ;;  %v1862_v50 = vmul.f32 %v4720_v8, %v1860_v52  ;;  %v1861_v46 = vmul.f32 %v4680_v12, %v1860_v52  ;;  %v1890_v13 = vmul.f32 %v4716_v60, %v1888_v51 }
 0x271   : > { %v1236_v17 = vadd.f32 %v1234_v47, %v1222_v1  ;;  %v1916_v47 = vstv %s4722_s6  ;;  %s4935_s6 = sld [smem:[#allocation6 + $0x4e]] }
 0x272   : > { %v1917_v52 = vmul.f32 %v1916_v47, %v4627_v41 }
 0x274   : > { %1851 = vrot.lane.b32.xlu2 %v1847_v43, %s3581_s13 }
 0x275   : > { %1839 = vrot.lane.b32.xlu1 %v1834_v19, %s3581_s13  ;;  %v1221_v19 = vadd.f32 %v1219_v55, %v1207_v11  ;;  %v1240_v55 = vmul.f32 %v4405_v54, %v1238_v4 }
 0x276   : > { %1879 = vrot.lane.b32.xlu0 %v1875_v62, %s3581_s13  ;;  %v4710_v43 = vpop.permute.xlu2 %1559  ;;  %v1224_v62 = vstv %s4689_s28  ;;  %s4883_s28 = sld [smem:[#allocation6 + $0x86]] }
 0x277   : > { %5667 = vst [vmem:[#allocation36_spill] sm:$0xff] %v4710_v43  ;;  %v4713_v0 = vpop.permute.xlu1 %1433  ;;  %v1214_v43 = vadd.f32 %v1212_v45, %v1198_v28  ;;  %v1226_v35 = vmul.f32 %v4384_v34, %v1224_v62  ;;  %v1235_v11 = vadd.f32 %v1233_v42, %v1221_v19  ;;  %v1225_v1 = vmul.f32 %v4371_v26, %v1224_v62 }
 0x278   : > { %5668 = vst [vmem:[#allocation45_spill] sm:$0xff] %v4713_v0  ;;  %v4724_v48 = vpop.permute.xlu0 %1529  ;;  %v1197_v0 = vmul.f32 %v1196_v23, %v4351_v22  ;;  %v1256_v22 = vadd.f32 %v4482_v5, %v1236_v17  ;;  %v5670_v17 = vstv %s4651_s14  ;;  %s4807_s14 = sld [smem:[#allocation6 + $0x59]] }
 0x279   : > { %5669 = vst [vmem:[#allocation38_spill] sm:$0xff] %v4724_v48  ;;  %v1211_v48 = vmul.f32 %v4375_v58, %v1210_v38  ;;  %v1228_v21 = vadd.f32 %v1226_v35, %v1214_v43  ;;  %v4748_v38 = vld [vmem:[%s3701_s24 + $0x4e] sm:$0xff]  ;;  %v1255_v23 = vadd.f32 %v4536_v39, %v1235_v11  ;;  %v1876_v5 = vmul.f32 %v4720_v8, %v5670_v17 }
 0x27a   : > { %v1284_v28 = vadd.f32 %v4539_v59, %v1256_v22  ;;  %v1239_v43 = vmul.f32 %v4395_v40, %v1238_v4  ;;  %v1902_v59 = vstv %s4739_s27  ;;  %v1930_v4 = vstv %s4750_s8  ;;  %s4939_s27 = sld [smem:[#allocation6 + $0x57]] }
 0x27b   : > { %v1213_v35 = vadd.f32 %v1211_v48, %v1197_v0  ;;  %v1242_v45 = vadd.f32 %v1240_v55, %v1228_v21  ;;  %v1484_v17 = vstv %s4790_s25  ;;  %s4941_s8 = sld [smem:[#allocation6 + $0x60]] }
 0x27c   : > { %1867 = vrot.lane.b32.xlu2 %v1862_v50, %s3581_s13  ;;  %v1312_v0 = vadd.f32 %v4576_v31, %v1284_v28  ;;  %s3274_s25 = sld [smem:[#allocation6 + $0x7b]] }
 0x27d   : > { %1865 = vrot.lane.b32.xlu1 %v1861_v46, %s3581_s13  ;;  %v1227_v26 = vadd.f32 %v1225_v1, %v1213_v35  ;;  %v1270_v39 = vadd.f32 %v4549_v14, %v1242_v45  ;;  %v1904_v14 = vmul.f32 %v4716_v60, %v1902_v59  ;;  %v1903_v46 = vmul.f32 %v4748_v38, %v1902_v59 }
 0x27e   : > { %1895 = vrot.lane.b32.xlu0 %v1890_v13, %s3581_s13  ;;  %v4741_v34 = vpop.permute.xlu2 %1585  ;;  %v1889_v13 = vmul.f32 %v4748_v38, %v1888_v51  ;;  %v1283_v51 = vadd.f32 %v4500_v57, %v1255_v23  ;;  %v1340_v50 = vadd.f32 %v4547_v44, %v1312_v0  ;;  %v1932_v44 = vmul.f32 %v1930_v4, %v4606_v9  ;;  %v5671_v0 = vld [vmem:[#allocation13_spill] sm:$0xff] }
 0x27f   : > { %v4744_v58 = vpop.permute.xlu1 %1459  ;;  %v1241_v57 = vadd.f32 %v1239_v43, %v1227_v26  ;;  %v1958_v35 = vstv %s4781_s21  ;;  %v5672_v43 = vld [vmem:[#allocation45_spill] sm:$0xff]  ;;  %v1972_v59 = vstv %s4816_s12  ;;  %s3270_s21 = sld [smem:[#allocation6 + $0x72]] }
 0x280   : > { %v4753_v54 = vpop.permute.xlu0 %1545  ;;  %v1311_v31 = vadd.f32 %v4553_v6, %v1283_v51  ;;  %v1368_v42 = vadd.f32 %v4593_v36, %v1340_v50  ;;  %v1298_v6 = vadd.f32 %v4517_v2, %v1270_v39  ;;  %s3300_s12 = sld [smem:[#allocation7 + $0x3]] }
 0x281   : > { %v1269_v21 = vadd.f32 %v4526_v49, %v1241_v57  ;;  %v5674_v57 = vld [vmem:[#allocation19_spill] sm:$0xff] }
 0x282   : > { %v1339_v19 = vadd.f32 %v4590_v15, %v1311_v31  ;;  %v1396_v11 = vadd.f32 %v4645_v30, %v1368_v42  ;;  %v1326_v55 = vadd.f32 %v4566_v7, %v1298_v6  ;;  %v1470_v30 = vstv %s4770_s7  ;;  %v5673_v31 = vld [vmem:[#allocation11_spill] sm:$0xff]  ;;  %s4943_s7 = sld [smem:[#allocation6 + $0x69]] }
 0x283   : > { %v1297_v2 = vadd.f32 %v4563_v33, %v1269_v21  ;;  %v1485_v50 = vmul.f32 %v5673_v31, %v1484_v17  ;;  %v5675_v42 = vld [vmem:[#allocation35_spill] sm:$0xff] }
 0x284   : > { %1893 = vrot.lane.b32.xlu2 %v1889_v13, %s3581_s13  ;;  %v1367_v15 = vadd.f32 %v4561_v18, %v1339_v19  ;;  %v1354_v36 = vadd.f32 %v4603_v53, %v1326_v55  ;;  %v1424_v18 = vadd.f32 %v4601_v3, %v1396_v11  ;;  %v1931_v53 = vmul.f32 %v1930_v4, %v4627_v41  ;;  %v5676_v55 = vld [vmem:[#allocation17_spill] sm:$0xff] }
 0x285   : > { %1881 = vrot.lane.b32.xlu1 %v1876_v5, %s3581_s13  ;;  %v1472_v13 = vmul.f32 %v1470_v30, %v4452_v37  ;;  %v1918_v3 = vmul.f32 %v1916_v47, %v4606_v9  ;;  %v1325_v23 = vadd.f32 %v4534_v10, %v1297_v2  ;;  %v1959_v5 = vmul.f32 %v4623_v61, %v1958_v35 }
 0x286   : > { %1921 = vrot.lane.b32.xlu0 %v1917_v52, %s3583_s16  ;;  %v4774_v48 = vpop.permute.xlu2 %1601  ;;  %v1395_v7 = vadd.f32 %v4610_v25, %v1367_v15  ;;  %v1452_v25 = vadd.f32 %v4686_v63, %v1424_v18  ;;  %v1382_v28 = vadd.f32 %v4574_v29, %v1354_v36  ;;  %v1471_v63 = vmul.f32 %v1470_v30, %v4440_v32  ;;  %v5677_v36 = vld [vmem:[#allocation33_spill] sm:$0xff] }
 0x287   : > { %v4778_v40 = vpop.permute.xlu1 %1531  ;;  %v1486_v10 = vmul.f32 %v4488_v56, %v1484_v17  ;;  %v1498_v52 = vstv %s4796_s22  ;;  %v1512_v4 = vstv %s4818_s15  ;;  %v1490_v11 = vstv %s4826_s17  ;;  %v5678_v18 = vld [vmem:[#allocation21_spill] sm:$0xff]  ;;  %s3278_s22 = sld [smem:[#allocation6 + $0x84]] }
 0x288   : > { %v4783_v62 = vpop.permute.xlu0 %1571  ;;  %v1423_v1 = vadd.f32 %v4677_v16, %v1395_v7  ;;  %v1353_v16 = vadd.f32 %v4580_v24, %v1325_v23  ;;  %v1410_v45 = vadd.f32 %v4631_v20, %v1382_v28  ;;  %v1474_v29 = vadd.f32 %v1472_v13, %v1452_v25  ;;  %v5680_v23 = vld [vmem:[#allocation15_spill] sm:$0xff]  ;;  %s4991_s15 = sld [smem:[#allocation6 + $0xb5]] }
 0x289   : > { %v1944_v20 = vstv %s4807_s14  ;;  %v1974_v7 = vmul.f32 %v4720_v8, %v1972_v59  ;;  %v1514_v28 = vmul.f32 %v5680_v23, %v1512_v4  ;;  %s4981_s14 = sld [smem:[#allocation7 + $0x2]] }
 0x28a   : > { %v1451_v47 = vadd.f32 %v4618_v27, %v1423_v1  ;;  %v1381_v26 = vadd.f32 %v5671_v0, %v1353_v16  ;;  %v1438_v24 = vadd.f32 %v5672_v43, %v1410_v45  ;;  %v1476_v27 = vstv %s4800_s10  ;;  %v5679_v1 = vld [vmem:[#allocation12_spill] sm:$0xff]  ;;  %s3282_s10 = sld [smem:[#allocation6 + $0x8d]] }
 0x28b   : > { %v1945_v21 = vmul.f32 %v4623_v61, %v1944_v20  ;;  %v1478_v2 = vmul.f32 %v1476_v27, %v4452_v37  ;;  %v1499_v13 = vmul.f32 %v5679_v1, %v1498_v52  ;;  %v1504_v45 = vstv %s4847_s18  ;;  %s3315_s17 = sld [smem:[#allocation6 + $0x91]] }
 0x28c   : > { %1909 = vrot.lane.b32.xlu2 %v1904_v14, %s3581_s13  ;;  %v1500_v14 = vmul.f32 %v5674_v57, %v1498_v52  ;;  %v1473_v6 = vadd.f32 %v1471_v63, %v1451_v47  ;;  %v1409_v15 = vadd.f32 %v5676_v55, %v1381_v26  ;;  %v1466_v30 = vadd.f32 %v5677_v36, %v1438_v24  ;;  %v5683_v36 = vld [vmem:[#allocation38_spill] sm:$0xff]  ;;  %s3317_s18 = sld [smem:[#allocation6 + $0x9a]] }
 0x28d   : > { %1907 = vrot.lane.b32.xlu1 %v1903_v46, %s3581_s13  ;;  %v1946_v46 = vmul.f32 %v5675_v42, %v1944_v20  ;;  %v2000_v47 = vstv %s4857_s29  ;;  %v1506_v26 = vmul.f32 %v5674_v57, %v1504_v45  ;;  %v1960_v24 = vmul.f32 %v5675_v42, %v1958_v35  ;;  %s5010_s29 = sld [smem:[#allocation6 + $0xa3]] }
 0x28e   : > { %1937 = vrot.lane.b32.xlu0 %v1932_v44, %s3583_s16  ;;  %v4809_v49 = vpop.permute.xlu2 %1627  ;;  %v1488_v44 = vadd.f32 %v1486_v10, %v1474_v29  ;;  %v1487_v25 = vadd.f32 %v1485_v50, %v1473_v6  ;;  %v1480_v37 = vadd.f32 %v1478_v2, %v1466_v30  ;;  %v5681_v10 = vld [vmem:[#allocation26_spill] sm:$0xff]  ;;  %v1518_v50 = vstv %s4870_s11  ;;  %s3318_s11 = sld [smem:[#allocation6 + $0xbe]] }
 0x28f   : > { %v4813_v22 = vpop.permute.xlu1 %1557  ;;  %v1513_v29 = vmul.f32 %v5681_v10, %v1512_v4  ;;  %v1986_v35 = vstv %s4883_s28  ;;  %s5034_s28 = sld [smem:[#allocation6 + $0xd0]] }
 0x290   : > { %v4820_v33 = vpop.permute.xlu0 %1587  ;;  %v1502_v17 = vadd.f32 %v1500_v14, %v1488_v44  ;;  %v1501_v0 = vadd.f32 %v1499_v13, %v1487_v25  ;;  %v2001_v14 = vmul.f32 %v4748_v38, %v2000_v47  ;;  %v1988_v2 = vmul.f32 %v4720_v8, %v1986_v35 }
 0x292   : > { %v1516_v43 = vadd.f32 %v1514_v28, %v1502_v17 }
 0x294   : > { %1935 = vrot.lane.b32.xlu2 %v1931_v53, %s3583_s16  ;;  %v1437_v53 = vadd.f32 %v5678_v18, %v1409_v15  ;;  %v1536_v4 = vadd.f32 %v4778_v40, %v1516_v43  ;;  %v2014_v15 = vstv %s4890_s30  ;;  %v1987_v18 = vmul.f32 %v4680_v12, %v1986_v35  ;;  %s3321_s30 = sld [smem:[#allocation6 + $0xac]] }
 0x295   : > { %1923 = vrot.lane.b32.xlu1 %v1918_v3, %s3583_s16  ;;  %v1492_v3 = vmul.f32 %v4488_v56, %v1490_v11  ;;  %v2016_v25 = vmul.f32 %v4716_v60, %v2014_v15 }
 0x296   : > { %1963 = vrot.lane.b32.xlu0 %v1959_v5, %s3583_s16  ;;  %v4851_v51 = vpop.permute.xlu2 %1643  ;;  %v1477_v5 = vmul.f32 %v1476_v27, %v4440_v32  ;;  %v1465_v16 = vadd.f32 %v4744_v58, %v1437_v53  ;;  %v1491_v32 = vmul.f32 %v5673_v31, %v1490_v11  ;;  %v1973_v58 = vmul.f32 %v4680_v12, %v1972_v59  ;;  %v5682_v11 = vld [vmem:[#allocation36_spill] sm:$0xff] }
 0x297   : > { %v4854_v39 = vpop.permute.xlu1 %1573  ;;  %v1494_v20 = vadd.f32 %v1492_v3, %v1480_v37  ;;  %v1515_v31 = vadd.f32 %v1513_v29, %v1501_v0  ;;  %v1520_v59 = vmul.f32 %v5680_v23, %v1518_v50  ;;  %v1519_v53 = vmul.f32 %v5681_v10, %v1518_v50  ;;  %v5684_v0 = vld [vmem:[#allocation31_spill] sm:$0xff] }
 0x298   : > { %v4862_v19 = vpop.permute.xlu0 %1613  ;;  %v1479_v27 = vadd.f32 %v1477_v5, %v1465_v16 }
 0x299   : > { %v1508_v6 = vadd.f32 %v1506_v26, %v1494_v20  ;;  %v1535_v30 = vadd.f32 %v5683_v36, %v1515_v31 }
 0x29a   : > { %v1493_v57 = vadd.f32 %v1491_v32, %v1479_v27 }
 0x29b   : > { %v1522_v13 = vadd.f32 %v1520_v59, %v1508_v6  ;;  %v1563_v3 = vadd.f32 %v4813_v22, %v1535_v30  ;;  %v2015_v22 = vmul.f32 %v4748_v38, %v2014_v15  ;;  %v1764_v6 = vstv %s4939_s27  ;;  %s5055_s27 = sld [smem:[#allocation6 + $0x9b]] }
 0x29c   : > { %1951 = vrot.lane.b32.xlu2 %v1946_v46, %s3583_s16  ;;  %v1505_v46 = vmul.f32 %v5679_v1, %v1504_v45  ;;  %v1766_v15 = vmul.f32 %v5675_v42, %v1764_v6 }
 0x29d   : > { %1949 = vrot.lane.b32.xlu1 %v1945_v21, %s3583_s16  ;;  %v1564_v21 = vadd.f32 %v5682_v11, %v1536_v4  ;;  %v1550_v17 = vadd.f32 %v4753_v54, %v1522_v13  ;;  %v1591_v37 = vadd.f32 %v4741_v34, %v1563_v3 }
 0x29e   : > { %1979 = vrot.lane.b32.xlu0 %v1974_v7, %s3583_s16  ;;  %v4885_v63 = vpop.permute.xlu2 %1669  ;;  %v1507_v1 = vadd.f32 %v1505_v46, %v1493_v57 }
 0x29f   : > { %v4887_v56 = vpop.permute.xlu1 %1599  ;;  %v1592_v7 = vadd.f32 %v4820_v33, %v1564_v21  ;;  %v1578_v45 = vadd.f32 %v4854_v39, %v1550_v17  ;;  %v1619_v29 = vadd.f32 %v4862_v19, %v1591_v37 }
 0x2a0   : > { %v1630_v52 = vpop.permute.xlu0 %1629  ;;  %v1521_v28 = vadd.f32 %v1519_v53, %v1507_v1 }
 0x2a1   : > { %v1606_v43 = vadd.f32 %v4774_v48, %v1578_v45 }
 0x2a2   : > { %v1549_v54 = vadd.f32 %v5684_v0, %v1521_v28 }
 0x2a4   : > { %1977 = vrot.lane.b32.xlu2 %v1973_v58, %s3583_s16  ;;  %v2002_v58 = vmul.f32 %v4716_v60, %v2000_v47  ;;  %v1577_v34 = vadd.f32 %v4783_v62, %v1549_v54  ;;  %v1765_v54 = vmul.f32 %v4623_v61, %v1764_v6 }
 0x2a5   : > { %1965 = vrot.lane.b32.xlu1 %v1960_v24, %s3583_s16 }
 0x2a6   : > { %2005 = vrot.lane.b32.xlu0 %v2001_v14, %s3583_s16  ;;  %v1686_v44 = vpop.permute.xlu2 %1685  ;;  %v1605_v19 = vadd.f32 %v4887_v56, %v1577_v34 }
 0x2a7   : > { %v1616_v55 = vpop.permute.xlu1 %1615 }
 0x2a8   : > { %v1656_v40 = vpop.permute.xlu0 %1655  ;;  %v1620_v23 = vadd.f32 %v1616_v55, %v1592_v7  ;;  %v1633_v4 = vadd.f32 %v4809_v49, %v1605_v19  ;;  %v1750_v49 = vstv %s4935_s6  ;;  %v1778_v55 = vstv %s4941_s8  ;;  %s3323_s6 = sld [smem:[#allocation6 + $0x92]] }
 0x2a9   : > { %v1780_v30 = vmul.f32 %v4720_v8, %v1778_v55  ;;  %s3324_s8 = sld [smem:[#allocation6 + $0xb6]] }
 0x2aa   : > { %v1648_v5 = vadd.f32 %v4851_v51, %v1620_v23  ;;  %v1634_v51 = vadd.f32 %v1630_v52, %v1606_v43  ;;  %v1661_v48 = vadd.f32 %v1656_v40, %v1633_v4 }
 0x2ac   : > { %1993 = vrot.lane.b32.xlu2 %v1988_v2, %s3583_s16  ;;  %v1792_v2 = vstv %s4943_s7  ;;  %s3584_s7 = smov 120  }
 0x2ad   : > { %1991 = vrot.lane.b32.xlu1 %v1987_v18, %s3583_s16  ;;  %v1794_v18 = vmul.f32 %v4716_v60, %v1792_v2 }
 0x2ae   : > { %2021 = vrot.lane.b32.xlu0 %v2016_v25, %s3583_s16  ;;  %v1712_v33 = vpop.permute.xlu2 %1711 }
 0x2af   : > { %v1642_v16 = vpop.permute.xlu1 %1641 }
 0x2b0   : > { %v1672_v10 = vpop.permute.xlu0 %1671  ;;  %v1647_v26 = vadd.f32 %v1642_v16, %v1619_v29 }
 0x2b1   : > { %v1676_v32 = vadd.f32 %v1672_v10, %v1648_v5 }
 0x2b2   : > { %v1675_v24 = vadd.f32 %v4885_v63, %v1647_v26 }
 0x2b4   : > { %2019 = vrot.lane.b32.xlu2 %v2015_v22, %s3583_s16 }
 0x2b5   : > { %2007 = vrot.lane.b32.xlu1 %v2002_v58, %s3583_s16  ;;  %v1751_v58 = vmul.f32 %v1750_v49, %v4627_v41 }
 0x2b6   : > { %v1728_v39 = vpop.permute.xlu2 %1727 }
 0x2b7   : > { %v1658_v20 = vpop.permute.xlu1 %1657 }
 0x2b8   : > { %v1662_v27 = vadd.f32 %v1658_v20, %v1634_v51  ;;  %v1698_v47 = vpop.permute.xlu0 %1697  ;;  %v1756_v51 = vstv %s3270_s21  ;;  %v1779_v20 = vmul.f32 %v4680_v12, %v1778_v55  ;;  %s3326_s21 = sld [smem:[#allocation6 + $0xbf]] }
 0x2b9   : > { %v1703_v50 = vadd.f32 %v1698_v47, %v1675_v24  ;;  %v1758_v19 = vmul.f32 %v1756_v51, %v4606_v9  ;;  %v1770_v47 = vstv %s3274_s25  ;;  %s5070_s25 = sld [smem:[#allocation6 + $0xc8]] }
 0x2ba   : > { %v1690_v14 = vadd.f32 %v1686_v44, %v1662_v27  ;;  %v1752_v44 = vmul.f32 %v1750_v49, %v4606_v9  ;;  %v1772_v4 = vmul.f32 %v5675_v42, %v1770_v47  ;;  %v1771_v9 = vmul.f32 %v4623_v61, %v1770_v47 }
 0x2be   : > { %v4937_v31 = vpop.permute.xlu2 %1809 }
 0x2bf   : > { %v1684_v62 = vpop.permute.xlu1 %1683 }
 0x2c0   : > { %v1689_v63 = vadd.f32 %v1684_v62, %v1661_v48  ;;  %v1714_v52 = vpop.permute.xlu0 %1713  ;;  %v1757_v62 = vmul.f32 %v1756_v51, %v4627_v41 }
 0x2c1   : > { %v1718_v59 = vadd.f32 %v1714_v52, %v1690_v14  ;;  %v1784_v52 = vstv %s3278_s22  ;;  %s3327_s22 = sld [smem:[#allocation6 + $0xa4]] }
 0x2c2   : > { %v1717_v56 = vadd.f32 %v1712_v33, %v1689_v63  ;;  %v1786_v6 = vmul.f32 %v4720_v8, %v1784_v52  ;;  %v1785_v41 = vmul.f32 %v4680_v12, %v1784_v52 }
 0x2c6   : > { %v4946_v57 = vpop.permute.xlu2 %1825 }
 0x2c7   : > { %v1700_v46 = vpop.permute.xlu1 %1699 }
 0x2c8   : > { %v1704_v35 = vadd.f32 %v1700_v46, %v1676_v32  ;;  %v1740_v11 = vpop.permute.xlu0 %1739 }
 0x2c9   : > { %v1745_v21 = vadd.f32 %v1740_v11, %v1717_v56 }
 0x2ca   : > { %v1732_v40 = vadd.f32 %v1728_v39, %v1704_v35 }
 0x2cc   : > { %v1754_v36 = vadd.f32 %v1752_v44, %v1732_v40  ;;  %v1798_v44 = vstv %s3282_s10  ;;  %s3329_s10 = sld [smem:[#allocation6 + $0xad]] }
 0x2cd   : > { %v1800_v55 = vmul.f32 %v4716_v60, %v1798_v44 }
 0x2ce   : > { %v1768_v7 = vadd.f32 %v1766_v15, %v1754_v36  ;;  %v4955_v1 = vpop.permute.xlu2 %1851 }
 0x2cf   : > { %v1726_v53 = vpop.permute.xlu1 %1725 }
 0x2d0   : > { %v1782_v13 = vadd.f32 %v1780_v30, %v1768_v7  ;;  %v1812_v25 = vpop.permute.xlu0 %1811  ;;  %v1731_v0 = vadd.f32 %v1726_v53, %v1703_v50  ;;  %v1793_v50 = vmul.f32 %v4748_v38, %v1792_v2  ;;  %v1799_v7 = vmul.f32 %v4748_v38, %v1798_v44 }
 0x2d2   : > { %v1796_v3 = vadd.f32 %v1794_v18, %v1782_v13  ;;  %v1753_v26 = vadd.f32 %v1751_v58, %v1731_v0 }
 0x2d4   : > { %v4957_v23 = vadd.f32 %v1812_v25, %v1796_v3  ;;  %v1767_v24 = vadd.f32 %v1765_v54, %v1753_v26 }
 0x2d6   : > { %v4959_v33 = vpop.permute.xlu2 %1867  ;;  %v1781_v14 = vadd.f32 %v1779_v20, %v1767_v24 }
 0x2d7   : > { %v1742_v28 = vpop.permute.xlu1 %1741 }
 0x2d8   : > { %v1838_v17 = vpop.permute.xlu0 %1837  ;;  %v1746_v27 = vadd.f32 %v1742_v28, %v1718_v59  ;;  %v1795_v49 = vadd.f32 %v1793_v50, %v1781_v14  ;;  %v1759_v59 = vadd.f32 %v1757_v62, %v1745_v21 }
 0x2da   : > { %v1760_v48 = vadd.f32 %v1758_v19, %v1746_v27  ;;  %v1815_v11 = vadd.f32 %v4937_v31, %v1795_v49  ;;  %v1773_v15 = vadd.f32 %v1771_v9, %v1759_v59 }
 0x2dc   : > { %v1774_v46 = vadd.f32 %v1772_v4, %v1760_v48  ;;  %v1843_v30 = vadd.f32 %v1838_v17, %v1815_v11  ;;  %v1787_v8 = vadd.f32 %v1785_v41, %v1773_v15  ;;  %v2036_v4 = vstv %s3300_s12  ;;  %s3330_s12 = sld [smem:[#allocation6 + $0xd1]] }
 0x2de   : > { %v1894_v16 = vpop.permute.xlu2 %1893  ;;  %v1788_v42 = vadd.f32 %v1786_v6, %v1774_v46  ;;  %v1801_v21 = vadd.f32 %v1799_v7, %v1787_v8  ;;  %v5000_v7 = vld [vmem:[%s3701_s24 + $0x8] sm:$0xff]  ;;  %v2128_v8 = vstv %s3315_s17  ;;  %s5106_s17 = sld [smem:[#allocation6 + $0xc1]] }
 0x2df   : > { %v1824_v37 = vpop.permute.xlu1 %1823 }
 0x2e0   : > { %v1854_v5 = vpop.permute.xlu0 %1853  ;;  %v1802_v36 = vadd.f32 %v1800_v55, %v1788_v42  ;;  %v1829_v25 = vadd.f32 %v1824_v37, %v1801_v21  ;;  %v2028_v37 = vstv %s4981_s14  ;;  %v2130_v21 = vmul.f32 %v2128_v8, %v5000_v7  ;;  %s5085_s14 = sld [smem:[#allocation6 + $0x94]] }
 0x2e2   : > { %v1830_v61 = vadd.f32 %v4946_v57, %v1802_v36  ;;  %v1857_v17 = vadd.f32 %v4955_v1, %v1829_v25  ;;  %v4996_v36 = vld [vmem:[%s3701_s24] sm:$0xff]  ;;  %v5013_v25 = vld [vmem:[%s3701_s24 + $0x18] sm:$0xff] }
 0x2e4   : > { %v1858_v12 = vadd.f32 %v1854_v5, %v1830_v61 }
 0x2e6   : > { %v1910_v22 = vpop.permute.xlu2 %1909 }
 0x2e7   : > { %v4961_v45 = vpop.permute.xlu1 %1839 }
 0x2e8   : > { %v1880_v10 = vpop.permute.xlu0 %1879  ;;  %v1844_v57 = vadd.f32 %v4961_v45, %v4957_v23 }
 0x2e9   : > { %v1885_v0 = vadd.f32 %v1880_v10, %v1857_v17  ;;  %v2170_v17 = vstv %s3318_s11  ;;  %s5251_s11 = sld [smem:[#allocation6 + $0xa7]] }
 0x2ee   : > { %v4967_v34 = vpop.permute.xlu2 %1935 }
 0x2ef   : > { %v1866_v29 = vpop.permute.xlu1 %1865 }
 0x2f0   : > { %v4963_v32 = vpop.permute.xlu0 %1895  ;;  %v1871_v18 = vadd.f32 %v1866_v29, %v1843_v30  ;;  %v2142_v30 = vstv %s4991_s15  ;;  %s3346_s15 = sld [smem:[#allocation6 + $0xb8]] }
 0x2f2   : > { %v1899_v13 = vadd.f32 %v1894_v16, %v1871_v18 }
 0x2f6   : > { %v1952_v35 = vpop.permute.xlu2 %1951 }
 0x2f7   : > { %v1882_v43 = vpop.permute.xlu1 %1881 }
 0x2f8   : > { %v1922_v39 = vpop.permute.xlu0 %1921  ;;  %v1886_v28 = vadd.f32 %v1882_v43, %v1858_v12  ;;  %v1872_v43 = vadd.f32 %v4959_v33, %v1844_v57  ;;  %v2171_v57 = vmul.f32 %v5013_v25, %v2170_v17 }
 0x2f9   : > { %v1927_v3 = vadd.f32 %v1922_v39, %v1899_v13  ;;  %v2156_v13 = vstv %s3317_s18  ;;  %s5108_s18 = sld [smem:[#allocation6 + $0x9d]] }
 0x2fa   : > { %v1914_v29 = vadd.f32 %v1910_v22, %v1886_v28  ;;  %v1900_v10 = vadd.f32 %v4963_v32, %v1872_v43  ;;  %v5022_v28 = vld [vmem:[%s3701_s24 + $0x30] sm:$0xff] }
 0x2fe   : > { %v1978_v53 = vpop.permute.xlu2 %1977 }
 0x2ff   : > { %v1908_v63 = vpop.permute.xlu1 %1907 }
 0x300   : > { %v1938_v56 = vpop.permute.xlu0 %1937  ;;  %v1913_v16 = vadd.f32 %v1908_v63, %v1885_v0 }
 0x301   : > { %v1942_v24 = vadd.f32 %v1938_v56, %v1914_v29 }
 0x302   : > { %v1941_v1 = vadd.f32 %v4967_v34, %v1913_v16 }
 0x306   : > { %v1994_v38 = vpop.permute.xlu2 %1993 }
 0x307   : > { %v1924_v40 = vpop.permute.xlu1 %1923 }
 0x308   : > { %v1964_v2 = vpop.permute.xlu0 %1963  ;;  %v1928_v45 = vadd.f32 %v1924_v40, %v1900_v10 }
 0x309   : > { %v1969_v22 = vadd.f32 %v1964_v2, %v1941_v1 }
 0x30a   : > { %v1956_v33 = vadd.f32 %v1952_v35, %v1928_v45 }
 0x30e   : > { %v2020_v23 = vpop.permute.xlu2 %2019 }
 0x30f   : > { %v1950_v31 = vpop.permute.xlu1 %1949 }
 0x310   : > { %v1980_v60 = vpop.permute.xlu0 %1979  ;;  %v1955_v58 = vadd.f32 %v1950_v31, %v1927_v3  ;;  %v5008_v31 = vld [vmem:[%s3701_s24 + $0x20] sm:$0xff]  ;;  %v2157_v3 = vmul.f32 %v5013_v25, %v2156_v13 }
 0x311   : > { %v1984_v32 = vadd.f32 %v1980_v60, %v1956_v33  ;;  %v2129_v60 = vmul.f32 %v2128_v8, %v4996_v36  ;;  %v2158_v12 = vmul.f32 %v5008_v31, %v2156_v13  ;;  %v2172_v29 = vmul.f32 %v5008_v31, %v2170_v17 }
 0x312   : > { %v1983_v54 = vadd.f32 %v1978_v53, %v1955_v58  ;;  %v2143_v53 = vmul.f32 %v2142_v30, %v4996_v36  ;;  %v2184_v58 = vstv %s5010_s29  ;;  %s3355_s29 = sld [smem:[#allocation6 + $0x9e]] }
 0x313   : > { %v2185_v0 = vmul.f32 %v5022_v28, %v2184_v58 }
 0x317   : > { %v1966_v26 = vpop.permute.xlu1 %1965 }
 0x318   : > { %v2006_v51 = vpop.permute.xlu0 %2005  ;;  %v1970_v5 = vadd.f32 %v1966_v26, %v1942_v24  ;;  %v5032_v26 = vld [vmem:[%s3701_s24 + $0x38] sm:$0xff]  ;;  %v2226_v24 = vstv %s5034_s28  ;;  %s5120_s28 = sld [smem:[#allocation6 + $0xb4]] }
 0x319   : > { %v2011_v20 = vadd.f32 %v2006_v51, %v1983_v54  ;;  %v5043_v51 = vld [vmem:[%s3701_s24 + $0x48] sm:$0xff] }
 0x31a   : > { %v1998_v27 = vadd.f32 %v1994_v38, %v1970_v5  ;;  %v2144_v38 = vmul.f32 %v2142_v30, %v5000_v7  ;;  %v2212_v5 = vstv %s3321_s30  ;;  %v2227_v43 = vmul.f32 %v5043_v51, %v2226_v24  ;;  %s5123_s30 = sld [smem:[#allocation6 + $0xbd]] }
 0x31b   : > { %v2029_v39 = vadd.f32 %v2028_v37, %v2011_v20  ;;  %v5047_v20 = vld [vmem:[%s3701_s24 + $0x50] sm:$0xff]  ;;  %v2213_v10 = vmul.f32 %v5043_v51, %v2212_v5 }
 0x31c   : > { %v2214_v1 = vmul.f32 %v5047_v20, %v2212_v5 }
 0x31d   : > { %v2031_v19 = vmax.f32 %v2029_v39, 0.0  ;;  %v2186_v39 = vmul.f32 %v5032_v26, %v2184_v58 }
 0x31f   : > { %v2033_v47 = vpack.c.bf16 %v2031_v19, %v2031_v19  ;;  %v1992_v50 = vpop.permute.xlu1 %1991  ;;  %v2240_v19 = vstv %s3323_s6  ;;  %s5130_s6 = sld [smem:[#allocation6 + $0xa6]] }
 0x320   : > { %v1997_v14 = vadd.f32 %v1992_v50, %v1969_v22  ;;  %v2022_v48 = vpop.permute.xlu0 %2021  ;;  %v2242_v22 = vmul.f32 %v2240_v19, %v5000_v7  ;;  %v2254_v50 = vstv %s3324_s8  ;;  %s5143_s8 = sld [smem:[#allocation6 + $0x90]]  ;;  %v2094_v58 = vstv %s5123_s30 }
 0x321   : > { %v2045_v62 = vunpack.c.l.b16 %v2033_v47  ;;  %v2026_v63 = vadd.f32 %v2022_v48, %v1998_v27  ;;  %v2241_v27 = vmul.f32 %v2240_v19, %v4996_v36  ;;  %v2268_v47 = vstv %s5055_s27  ;;  %s5140_s27 = sld [smem:[#allocation6 + $0xc6]] }
 0x322   : > { %v2025_v52 = vadd.f32 %v2020_v23, %v1997_v14  ;;  %v2228_v23 = vmul.f32 %v5047_v20, %v2226_v24  ;;  %v2269_v45 = vmul.f32 %v5013_v25, %v2268_v47  ;;  %v2256_v14 = vmul.f32 %v2254_v50, %v5000_v7  ;;  %s5270_s30 = sld [smem:[#allocation6 + $0xd4]] }
 0x323   : > { %v2051_v56 = vpack.c.b16 %v2045_v62, %v2045_v62  ;;  %v2038_v49 = vadd.f32 %v2036_v4, %v2026_v63  ;;  %v2255_v48 = vmul.f32 %v2254_v50, %v4996_v36 }
 0x324   : > { %v2037_v46 = vadd.f32 %v2036_v4, %v2025_v52  ;;  %v2282_v4 = vstv %s3326_s21  ;;  %v2310_v52 = vstv %s5070_s25  ;;  %s5145_s21 = sld [smem:[#allocation6 + $0x99]] }
 0x325   : > { %v2040_v34 = vmax.f32 %v2038_v49, 0.0  ;;  %2055 = vrot.lane.b32.xlu1 %v2051_v56, %s3581_s13  ;;  %v2284_v62 = vmul.f32 %v5008_v31, %v2282_v4  ;;  %v2283_v63 = vmul.f32 %v5013_v25, %v2282_v4  ;;  %v2296_v56 = vstv %s3327_s22  ;;  %s5148_s25 = sld [smem:[#allocation6 + $0xa2]] }
 0x326   : > { %v2039_v6 = vmax.f32 %v2037_v46, 0.0  ;;  %v2270_v49 = vmul.f32 %v5008_v31, %v2268_v47  ;;  %v2311_v33 = vmul.f32 %v5022_v28, %v2310_v52  ;;  %v2298_v46 = vmul.f32 %v5032_v26, %v2296_v56  ;;  %s5153_s22 = sld [smem:[#allocation6 + $0xcf]]  ;;  %v5193_v47 = vld [vmem:[%s3701_s24 + $0x4c] sm:$0xff] }
 0x327   : > { %v2042_v9 = vpack.c.bf16 %v2040_v34, %v2040_v34  ;;  %v2008_v59 = vpop.permute.xlu1 %2007  ;;  %v2324_v34 = vstv %s3329_s10  ;;  %s5162_s10 = sld [smem:[#allocation6 + $0xaf]]  ;;  %v2108_v5 = vstv %s5140_s27 }
 0x328   : > { %v2041_v44 = vpack.c.bf16 %v2039_v6, %v2039_v6  ;;  %v2012_v11 = vadd.f32 %v2008_v59, %v1984_v32  ;;  %v2297_v32 = vmul.f32 %v5022_v28, %v2296_v56  ;;  %v2326_v6 = vmul.f32 %v5047_v20, %v2324_v34  ;;  %v5094_v59 = vld [vmem:[%s3701_s24 + $0x4] sm:$0xff]  ;;  %s3375_s27 = sld [smem:[#allocation6 + $0x97]] }
 0x329   : > { %v2050_v55 = vunpack.c.l.b16 %v2042_v9  ;;  %v2325_v9 = vmul.f32 %v5043_v51, %v2324_v34 }
 0x32a   : > { %v2049_v42 = vunpack.c.l.b16 %v2041_v44  ;;  %v2030_v15 = vadd.f32 %v2028_v37, %v2012_v11  ;;  %v2408_v44 = vstv %s5085_s14  ;;  %v2338_v11 = vstv %s3330_s12  ;;  %s5167_s14 = sld [smem:[#allocation6 + $0xca]] }
 0x32b   : > { %v2054_v35 = vpack.c.b16 %v2050_v55, %v2050_v55  ;;  %v2312_v55 = vmul.f32 %v5032_v26, %v2310_v52  ;;  %s5183_s12 = sld [smem:[#allocation6 + $0xab]] }
 0x32c   : > { %v2053_v41 = vpack.c.b16 %v2049_v42, %v2049_v42  ;;  %v2032_v40 = vmax.f32 %v2030_v15, 0.0  ;;  %v2409_v42 = vmul.f32 %v2408_v44, %v5094_v59  ;;  %v2340_v15 = vmul.f32 %v5047_v20, %v2338_v11 }
 0x32d   : > { %2061 = vrot.lane.b32.xlu1 %v2054_v35, %s3581_s13  ;;  %v2422_v35 = vstv %s3346_s15  ;;  %v2492_v50 = vstv %s5162_s10  ;;  %s5198_s15 = sld [smem:[#allocation6 + $0xd3]] }
 0x32e   : > { %v2034_v2 = vpack.c.bf16 %v2032_v40, %v2032_v40  ;;  %2059 = vrot.lane.b32.xlu0 %v2053_v41, %s3581_s13  ;;  %v5104_v41 = vld [vmem:[%s3701_s24 + $0xc] sm:$0xff]  ;;  %v2339_v40 = vmul.f32 %v5043_v51, %v2338_v11  ;;  %v2423_v30 = vmul.f32 %v2422_v35, %v5094_v59  ;;  %s5314_s10 = sld [smem:[#allocation6 + $0xc0]] }
 0x32f   : > { %v2410_v13 = vmul.f32 %v2408_v44, %v5104_v41 }
 0x330   : > { %v2046_v18 = vunpack.c.l.b16 %v2034_v2  ;;  %v2424_v2 = vmul.f32 %v2422_v35, %v5104_v41  ;;  %v5221_v35 = vld [vmem:[%s3701_s24 + $0x54] sm:$0xff] }
 0x332   : > { %v2052_v61 = vpack.c.b16 %v2046_v18, %v2046_v18  ;;  %v5127_v18 = vld [vmem:[%s3701_s24 + $0x1c] sm:$0xff] }
 0x334   : > { %2057 = vrot.lane.b32.xlu2 %v2052_v61, %s3581_s13  ;;  %s3320_s13 = sld [smem:[#allocation6 + $0xc7]]  ;;  %v5135_v61 = vld [vmem:[%s3701_s24 + $0x24] sm:$0xff] }
 0x335   : > { %2147 = vrot.lane.b32.xlu1 %v2143_v53, %s3583_s16  ;;  %v2450_v53 = vstv %s5106_s17  ;;  %s5223_s17 = sld [smem:[#allocation6 + $0xb9]] }
 0x336   : > { %2135 = vrot.lane.b32.xlu0 %v2130_v21, %s3583_s16  ;;  %v2436_v21 = vstv %s5108_s18  ;;  %v2452_v56 = vmul.f32 %v5135_v61, %v2450_v53  ;;  %s5232_s18 = sld [smem:[#allocation6 + $0x95]] }
 0x33a   : > { %v2198_v54 = vstv %s3320_s13  ;;  %s5117_s13 = scalar_lea.vmem %s5539_s4, %s4458_s9 }
 0x33b   : > { %v2200_v16 = vmul.f32 %v5032_v26, %v2198_v54  ;;  %v2199_v37 = vmul.f32 %v5022_v28, %v2198_v54  ;;  %v5165_v54 = vld [vmem:[%s3701_s24 + $0x34] sm:$0xff] }
 0x33c   : > { %2133 = vrot.lane.b32.xlu2 %v2129_v60, %s3583_s16  ;;  %v2451_v60 = vmul.f32 %v5127_v18, %v2450_v53 }
 0x33d   : > { %2163 = vrot.lane.b32.xlu1 %v2158_v12, %s3583_s16  ;;  %v2438_v12 = vmul.f32 %v5135_v61, %v2436_v21 }
 0x33e   : > { %2161 = vrot.lane.b32.xlu0 %v2157_v3, %s3583_s16  ;;  %v2080_v3 = vstv %s5120_s28  ;;  %s3358_s28 = sld [smem:[#allocation6 + $0xcb]] }
 0x344   : > { %2149 = vrot.lane.b32.xlu2 %v2144_v38, %s3583_s16  ;;  %v2464_v38 = vstv %s5130_s6  ;;  %s5272_s6 = sld [smem:[#allocation6 + $0xb0]] }
 0x345   : > { %2189 = vrot.lane.b32.xlu1 %v2185_v0, %s3583_s16  ;;  %v5160_v0 = vld [vmem:[%s3701_s24 + $0x3c] sm:$0xff] }
 0x346   : > { %2177 = vrot.lane.b32.xlu0 %v2172_v29, %s3583_s16  ;;  %v2466_v24 = vmul.f32 %v5160_v0, %v2464_v38 }
 0x34c   : > { %2175 = vrot.lane.b32.xlu2 %v2171_v57, %s3583_s16  ;;  %v2437_v57 = vmul.f32 %v5127_v18, %v2436_v21 }
 0x34d   : > { %2205 = vrot.lane.b32.xlu1 %v2200_v16, %s3583_s16  ;;  %v2081_v16 = vmul.f32 %v2080_v3, %v4996_v36 }
 0x34e   : > { %2203 = vrot.lane.b32.xlu0 %v2199_v37, %s3583_s16  ;;  %v2095_v37 = vmul.f32 %v5013_v25, %v2094_v58 }
 0x350   : > { %v2097_v19 = vadd.f32 %v2095_v37, %v2081_v16  ;;  %v2534_v37 = vstv %s5223_s17  ;;  %s5329_s17 = sld [smem:[#allocation6 + $0xcd]] }
 0x354   : > { %2191 = vrot.lane.b32.xlu2 %v2186_v39, %s3583_s16  ;;  %v2465_v39 = vmul.f32 %v5165_v54, %v2464_v38 }
 0x355   : > { %2231 = vrot.lane.b32.xlu1 %v2227_v43, %s3583_s16  ;;  %v2074_v43 = vstv %s5143_s8  ;;  %s5291_s8 = sld [smem:[#allocation6 + $0xa0]] }
 0x356   : > { %2219 = vrot.lane.b32.xlu0 %v2214_v1, %s3583_s16  ;;  %v2088_v1 = vstv %s5145_s21  ;;  %s5293_s21 = sld [smem:[#allocation6 + $0xbb]] }
 0x357   : > { %v2089_v4 = vmul.f32 %v5013_v25, %v2088_v1 }
 0x35c   : > { %2217 = vrot.lane.b32.xlu2 %v2213_v10, %s3583_s16  ;;  %v2109_v10 = vmul.f32 %v5022_v28, %v2108_v5 }
 0x35d   : > { %2247 = vrot.lane.b32.xlu1 %v2242_v22, %s3584_s7  ;;  %v2122_v22 = vstv %s5153_s22  ;;  %s5309_s22 = sld [smem:[#allocation6 + $0xb7]] }
 0x35e   : > { %2245 = vrot.lane.b32.xlu0 %v2241_v27, %s3584_s7 }
 0x364   : > { %2233 = vrot.lane.b32.xlu2 %v2228_v23, %s3583_s16  ;;  %v2076_v23 = vmul.f32 %v2074_v43, %v5000_v7 }
 0x365   : > { %2273 = vrot.lane.b32.xlu1 %v2269_v45, %s3584_s7  ;;  %v2090_v45 = vmul.f32 %v5008_v31, %v2088_v1 }
 0x366   : > { %2261 = vrot.lane.b32.xlu0 %v2256_v14, %s3584_s7  ;;  %v2075_v14 = vmul.f32 %v2074_v43, %v4996_v36  ;;  %v2493_v36 = vmul.f32 %v5193_v47, %v2492_v50  ;;  %v2124_v43 = vmul.f32 %v5047_v20, %v2122_v22 }
 0x36c   : > { %2259 = vrot.lane.b32.xlu2 %v2255_v48, %s3584_s7  ;;  %v2102_v48 = vstv %s5148_s25  ;;  %s5304_s25 = sld [smem:[#allocation6 + $0xc4]] }
 0x36d   : > { %2289 = vrot.lane.b32.xlu1 %v2284_v62, %s3584_s7  ;;  %v2104_v34 = vmul.f32 %v5032_v26, %v2102_v48 }
 0x36e   : > { %2287 = vrot.lane.b32.xlu0 %v2283_v63, %s3584_s7  ;;  %v2478_v63 = vstv %s5167_s14  ;;  %s5316_s14 = sld [smem:[#allocation6 + $0x93]] }
 0x36f   : > { %v2480_v25 = vmul.f32 %v5160_v0, %v2478_v63 }
 0x374   : > { %2275 = vrot.lane.b32.xlu2 %v2270_v49, %s3584_s7  ;;  %v2111_v49 = vadd.f32 %v2109_v10, %v2097_v19  ;;  %v2520_v19 = vstv %s5232_s18  ;;  %s5331_s18 = sld [smem:[#allocation6 + $0xa5]] }
 0x375   : > { %2315 = vrot.lane.b32.xlu1 %v2311_v33, %s3584_s7  ;;  %v2123_v33 = vmul.f32 %v5043_v51, %v2122_v22  ;;  %v2548_v22 = vstv %s3355_s29  ;;  %s5335_s29 = sld [smem:[#allocation6 + $0xae]] }
 0x376   : > { %2303 = vrot.lane.b32.xlu0 %v2298_v46, %s3584_s7  ;;  %v2092_v46 = vadd.f32 %v2090_v45, %v2076_v23 }
 0x377   : > { %v2125_v44 = vadd.f32 %v2123_v33, %v2111_v49  ;;  %v2521_v49 = vmul.f32 %v2520_v19, %v5094_v59 }
 0x378   : > { %v2106_v11 = vadd.f32 %v2104_v34, %v2092_v46  ;;  %v2549_v46 = vmul.f32 %v5127_v18, %v2548_v22  ;;  %v2576_v34 = vstv %s5251_s11  ;;  %s5339_s11 = sld [smem:[#allocation6 + $0xc9]] }
 0x37c   : > { %2301 = vrot.lane.b32.xlu2 %v2297_v32, %s3584_s7  ;;  %v2091_v32 = vadd.f32 %v2089_v4, %v2075_v14  ;;  %v2535_v14 = vmul.f32 %v2534_v37, %v5094_v59 }
 0x37d   : > { %2331 = vrot.lane.b32.xlu1 %v2326_v6, %s3584_s7  ;;  %v2103_v6 = vmul.f32 %v5022_v28, %v2102_v48  ;;  %v2522_v48 = vmul.f32 %v2520_v19, %v5104_v41 }
 0x37e   : > { %2329 = vrot.lane.b32.xlu0 %v2325_v9, %s3584_s7  ;;  %v2116_v9 = vstv %s5183_s12  ;;  %s5319_s12 = sld [smem:[#allocation6 + $0x9c]] }
 0x37f   : > { %v2117_v28 = vmul.f32 %v5043_v51, %v2116_v9 }
 0x384   : > { %2317 = vrot.lane.b32.xlu2 %v2312_v55, %s3584_s7  ;;  %v2118_v55 = vmul.f32 %v5047_v20, %v2116_v9 }
 0x385   : > { %2413 = vrot.lane.b32.xlu1 %v2409_v42, %s3583_s16 }
 0x386   : > { %2345 = vrot.lane.b32.xlu0 %v2340_v15, %s3584_s7  ;;  %v2506_v15 = vstv %s5198_s15  ;;  %s5322_s15 = sld [smem:[#allocation6 + $0xa9]] }
 0x387   : > { %v2507_v51 = vmul.f32 %v5193_v47, %v2506_v15 }
 0x38c   : > { %2343 = vrot.lane.b32.xlu2 %v2339_v40, %s3584_s7  ;;  %v2105_v40 = vadd.f32 %v2103_v6, %v2091_v32 }
 0x38d   : > { %2429 = vrot.lane.b32.xlu1 %v2424_v2, %s3583_s16  ;;  %v2082_v2 = vmul.f32 %v2080_v3, %v5000_v7 }
 0x38e   : > { %2427 = vrot.lane.b32.xlu0 %v2423_v30, %s3583_s16  ;;  %v2058_v8 = vpop.permute.xlu2 %2057  ;;  %v2096_v30 = vmul.f32 %v5008_v31, %v2094_v58 }
 0x38f   : > { %2068 = vst.msk [vmem:[%s5117_s13 + $0x4] sm:$0xf] %vm1182_vm0, %v2058_v8 }
 0x390   : > { %v2098_v3 = vadd.f32 %v2096_v30, %v2082_v2  ;;  %v2590_v2 = vstv %s3358_s28  ;;  %s5358_s28 = sld [smem:[#allocation6 + $0xd2]] }
 0x394   : > { %2415 = vrot.lane.b32.xlu2 %v2410_v13, %s3583_s16  ;;  %v2479_v13 = vmul.f32 %v5165_v54, %v2478_v63 }
 0x395   : > { %2455 = vrot.lane.b32.xlu1 %v2451_v60, %s3583_s16  ;;  %v2508_v60 = vmul.f32 %v5221_v35, %v2506_v15 }
 0x396   : > { %2443 = vrot.lane.b32.xlu0 %v2438_v12, %s3583_s16  ;;  %v5156_v17 = vpop.permute.xlu2 %2133  ;;  %v2120_v12 = vadd.f32 %v2118_v55, %v2106_v11  ;;  %v2536_v11 = vmul.f32 %v2534_v37, %v5104_v41  ;;  %v2578_v37 = vmul.f32 %v5160_v0, %v2576_v34 }
 0x397   : > { %v2056_v29 = vpop.permute.xlu1 %2055 }
 0x398   : > { %2067 = vst.msk [vmem:[%s5117_s13] sm:$0xf] %vm1182_vm0, %v2056_v29  ;;  %v2119_v29 = vadd.f32 %v2117_v28, %v2105_v40 }
 0x39c   : > { %2441 = vrot.lane.b32.xlu2 %v2437_v57, %s3583_s16  ;;  %v2110_v57 = vmul.f32 %v5032_v26, %v2108_v5  ;;  %v2494_v5 = vmul.f32 %v5221_v35, %v2492_v50 }
 0x39d   : > { %2471 = vrot.lane.b32.xlu1 %v2466_v24, %s3583_s16  ;;  %v2139_v24 = vadd.f32 %v5156_v17, %v2119_v29  ;;  %v2618_v29 = vstv %s5270_s30  ;;  %s5383_s30 = sld [smem:[#allocation6 + $0x98]] }
 0x39e   : > { %2469 = vrot.lane.b32.xlu0 %v2465_v39, %s3583_s16  ;;  %v5190_v27 = vpop.permute.xlu2 %2149  ;;  %v2112_v39 = vadd.f32 %v2110_v57, %v2098_v3  ;;  %v2604_v57 = vstv %s5272_s6  ;;  %s5387_s6 = sld [smem:[#allocation6 + $0xd6]] }
 0x39f   : > { %v2062_v62 = vpop.permute.xlu1 %2061 }
 0x3a0   : > { %2070 = vst.msk [vmem:[%s5117_s13 + $0xc] sm:$0xf] %vm1182_vm0, %v2062_v62  ;;  %v2060_v52 = vpop.permute.xlu0 %2059  ;;  %v2126_v62 = vadd.f32 %v2124_v43, %v2112_v39  ;;  %v2619_v39 = vmul.f32 %v5193_v47, %v2618_v29 }
 0x3a1   : > { %2069 = vst.msk [vmem:[%s5117_s13 + $0x8] sm:$0xf] %vm1182_vm0, %v2060_v52  ;;  %s5254_s13 = sld [smem:[#allocation6 + $0xc2]] }
 0x3a2   : > { %v2154_v50 = vadd.f32 %v5190_v27, %v2126_v62 }
 0x3a4   : > { %2457 = vrot.lane.b32.xlu2 %v2452_v56, %s3583_s16 }
 0x3a5   : > { %2497 = vrot.lane.b32.xlu1 %v2493_v36, %s3583_s16  ;;  %v2550_v36 = vmul.f32 %v5135_v61, %v2548_v22 }
 0x3a6   : > { %2485 = vrot.lane.b32.xlu0 %v2480_v25, %s3583_s16  ;;  %v2176_v42 = vpop.permute.xlu2 %2175 }
 0x3a7   : > { %v2148_v8 = vpop.permute.xlu1 %2147  ;;  %v2562_v6 = vstv %s5254_s13  ;;  %s5349_s13 = sld [smem:[#allocation6 + $0xb2]] }
 0x3a8   : > { %v2153_v53 = vadd.f32 %v2148_v8, %v2125_v44  ;;  %v2136_v21 = vpop.permute.xlu0 %2135  ;;  %v2564_v40 = vmul.f32 %v5135_v61, %v2562_v6 }
 0x3a9   : > { %v2140_v58 = vadd.f32 %v2136_v21, %v2120_v12  ;;  %v2563_v21 = vmul.f32 %v5127_v18, %v2562_v6  ;;  %v2730_v6 = vstv %s5304_s25  ;;  %s3387_s25 = sld [smem:[#allocation6 + $0xaa]] }
 0x3aa   : > { %v2181_v38 = vadd.f32 %v2176_v42, %v2153_v53  ;;  %v2577_v42 = vmul.f32 %v5165_v54, %v2576_v34 }
 0x3ac   : > { %2483 = vrot.lane.b32.xlu2 %v2479_v13, %s3583_s16 }
 0x3ad   : > { %2513 = vrot.lane.b32.xlu1 %v2508_v60, %s3583_s16  ;;  %v2592_v60 = vmul.f32 %v5160_v0, %v2590_v2 }
 0x3ae   : > { %2511 = vrot.lane.b32.xlu0 %v2507_v51, %s3583_s16  ;;  %v2192_v16 = vpop.permute.xlu2 %2191 }
 0x3af   : > { %v2164_v1 = vpop.permute.xlu1 %2163 }
 0x3b0   : > { %v2168_v10 = vadd.f32 %v2164_v1, %v2140_v58  ;;  %v2162_v23 = vpop.permute.xlu0 %2161  ;;  %v2606_v1 = vmul.f32 %v5221_v35, %v2604_v57 }
 0x3b1   : > { %v2167_v45 = vadd.f32 %v2162_v23, %v2139_v24  ;;  %v5289_v23 = vld [vmem:[%s3701_s24 + $0x10] sm:$0xff] }
 0x3b2   : > { %v2196_v4 = vadd.f32 %v2192_v16, %v2168_v10  ;;  %v2688_v10 = vstv %s3375_s27  ;;  %s3384_s27 = sld [smem:[#allocation6 + $0xbc]] }
 0x3b3   : > { %v2690_v62 = vmul.f32 %v2688_v10, %v5289_v23  ;;  %v2689_v22 = vmul.f32 %v2688_v10, %v5000_v7 }
 0x3b4   : > { %2499 = vrot.lane.b32.xlu2 %v2494_v5, %s3583_s16 }
 0x3b5   : > { %2539 = vrot.lane.b32.xlu1 %v2535_v14, %s3584_s7 }
 0x3b6   : > { %2527 = vrot.lane.b32.xlu0 %v2522_v48, %s3584_s7  ;;  %v2218_v17 = vpop.permute.xlu2 %2217 }
 0x3b7   : > { %v2190_v63 = vpop.permute.xlu1 %2189 }
 0x3b8   : > { %v2195_v52 = vadd.f32 %v2190_v63, %v2167_v45  ;;  %v2178_v56 = vpop.permute.xlu0 %2177  ;;  %v2716_v63 = vstv %s5291_s8  ;;  %s5410_s8 = sld [smem:[#allocation6 + $0xc5]] }
 0x3b9   : > { %v2182_v33 = vadd.f32 %v2178_v56, %v2154_v50  ;;  %v2702_v56 = vstv %s5293_s21  ;;  %s5412_s21 = sld [smem:[#allocation6 + $0xa1]] }
 0x3ba   : > { %v2223_v25 = vadd.f32 %v2218_v17, %v2195_v52  ;;  %v2704_v34 = vmul.f32 %v2702_v56, %v5289_v23 }
 0x3bc   : > { %2525 = vrot.lane.b32.xlu2 %v2521_v49, %s3584_s7 }
 0x3bd   : > { %2555 = vrot.lane.b32.xlu1 %v2550_v36, %s3584_s7  ;;  %v2620_v36 = vmul.f32 %v5221_v35, %v2618_v29 }
 0x3be   : > { %2553 = vrot.lane.b32.xlu0 %v2549_v46, %s3584_s7  ;;  %v2234_v27 = vpop.permute.xlu2 %2233  ;;  %v2717_v46 = vmul.f32 %v5008_v31, %v2716_v63 }
 0x3bf   : > { %v2206_v32 = vpop.permute.xlu1 %2205 }
 0x3c0   : > { %v2210_v9 = vadd.f32 %v2206_v32, %v2182_v33  ;;  %v2204_v44 = vpop.permute.xlu0 %2203 }
 0x3c1   : > { %v2209_v55 = vadd.f32 %v2204_v44, %v2181_v38  ;;  %v2591_v38 = vmul.f32 %v5165_v54, %v2590_v2  ;;  %v2731_v2 = vmul.f32 %v5008_v31, %v2730_v6 }
 0x3c2   : > { %v2238_v15 = vadd.f32 %v2234_v27, %v2210_v9  ;;  %v5327_v9 = vld [vmem:[%s3701_s24 + $0x28] sm:$0xff] }
 0x3c4   : > { %2541 = vrot.lane.b32.xlu2 %v2536_v11, %s3584_s7 }
 0x3c5   : > { %2581 = vrot.lane.b32.xlu1 %v2577_v42, %s3584_s7  ;;  %v2703_v42 = vmul.f32 %v2702_v56, %v5000_v7 }
 0x3c6   : > { %2569 = vrot.lane.b32.xlu0 %v2564_v40, %s3584_s7  ;;  %v2260_v28 = vpop.permute.xlu2 %2259  ;;  %v2732_v40 = vmul.f32 %v5327_v9, %v2730_v6  ;;  %v2402_v6 = vstv %s5358_s28 }
 0x3c7   : > { %v2232_v30 = vpop.permute.xlu1 %2231 }
 0x3c8   : > { %v2237_v8 = vadd.f32 %v2232_v30, %v2209_v55  ;;  %v2220_v53 = vpop.permute.xlu0 %2219  ;;  %v2354_v30 = vstv %s5316_s14  ;;  %s5456_s14 = sld [smem:[#allocation6 + $0xba]] }
 0x3c9   : > { %v2224_v13 = vadd.f32 %v2220_v53, %v2196_v4  ;;  %v2605_v4 = vmul.f32 %v5193_v47, %v2604_v57  ;;  %v2368_v53 = vstv %s5319_s12  ;;  %v2355_v29 = vmul.f32 %v2354_v30, %v5094_v59  ;;  %v5355_v57 = vld [vmem:[%s3701_s24 + $0x40] sm:$0xff]  ;;  %s5458_s12 = sld [smem:[#allocation6 + $0xc3]] }
 0x3ca   : > { %v2265_v12 = vadd.f32 %v2260_v28, %v2237_v8  ;;  %v2360_v8 = vstv %s5309_s22  ;;  %s5430_s22 = sld [smem:[#allocation6 + $0xce]] }
 0x3cc   : > { %2567 = vrot.lane.b32.xlu2 %v2563_v21, %s3584_s7  ;;  %v2374_v21 = vstv %s5314_s10  ;;  %s3390_s10 = sld [smem:[#allocation6 + $0xd7]] }
 0x3cd   : > { %2597 = vrot.lane.b32.xlu1 %v2592_v60, %s3584_s7  ;;  %v2375_v10 = vmul.f32 %v5127_v18, %v2374_v21 }
 0x3ce   : > { %2595 = vrot.lane.b32.xlu0 %v2591_v38, %s3584_s7  ;;  %v2276_v51 = vpop.permute.xlu2 %2275  ;;  %v2361_v38 = vmul.f32 %v2360_v8, %v5094_v59 }
 0x3cf   : > { %v2248_v3 = vpop.permute.xlu1 %2247 }
 0x3d0   : > { %v2252_v58 = vadd.f32 %v2248_v3, %v2224_v13  ;;  %v2246_v16 = vpop.permute.xlu0 %2245  ;;  %v2356_v13 = vmul.f32 %v2354_v30, %v5104_v41  ;;  %v2382_v3 = vstv %s5331_s18  ;;  %s3365_s18 = sld [smem:[#allocation6 + $0x9f]] }
 0x3d1   : > { %v2251_v24 = vadd.f32 %v2246_v16, %v2223_v25  ;;  %v2370_v16 = vmul.f32 %v5135_v61, %v2368_v53 }
 0x3d2   : > { %v2280_v43 = vadd.f32 %v2276_v51, %v2252_v58  ;;  %v2744_v58 = vstv %s5322_s15  ;;  %s5464_s15 = sld [smem:[#allocation6 + $0xd5]] }
 0x3d4   : > { %2583 = vrot.lane.b32.xlu2 %v2578_v37, %s3584_s7 }
 0x3d5   : > { %2623 = vrot.lane.b32.xlu1 %v2619_v39, %s3584_s7  ;;  %v2718_v39 = vmul.f32 %v5327_v9, %v2716_v63 }
 0x3d6   : > { %2611 = vrot.lane.b32.xlu0 %v2606_v1, %s3584_s7  ;;  %v2302_v19 = vpop.permute.xlu2 %2301 }
 0x3d7   : > { %v2274_v5 = vpop.permute.xlu1 %2273 }
 0x3d8   : > { %v2279_v45 = vadd.f32 %v2274_v5, %v2251_v24  ;;  %v2262_v14 = vpop.permute.xlu0 %2261 }
 0x3d9   : > { %v2266_v48 = vadd.f32 %v2262_v14, %v2238_v15  ;;  %v2746_v14 = vmul.f32 %v5355_v57, %v2744_v58 }
 0x3da   : > { %v5297_v17 = vadd.f32 %v2302_v19, %v2279_v45  ;;  %v2396_v19 = vstv %s5335_s29  ;;  %v2384_v45 = vmul.f32 %v5160_v0, %v2382_v3  ;;  %s3369_s29 = sld [smem:[#allocation6 + $0xa8]] }
 0x3dc   : > { %2609 = vrot.lane.b32.xlu2 %v2605_v4, %s3584_s7 }
 0x3dd   : > { %2695 = vrot.lane.b32.xlu1 %v2690_v62, %s3583_s16  ;;  %v2383_v62 = vmul.f32 %v5165_v54, %v2382_v3  ;;  %v2786_v3 = vstv %s5387_s6  ;;  %s298_s6 = scalar_lea.vmem %s5540_s5, %s4458_s9 }
 0x3de   : > { %2693 = vrot.lane.b32.xlu0 %v2689_v22, %s3583_s16  ;;  %v2318_v50 = vpop.permute.xlu2 %2317  ;;  %v2388_v22 = vstv %s5339_s11  ;;  %s3373_s11 = sld [smem:[#allocation6 + $0xb1]] }
 0x3df   : > { %v2290_v52 = vpop.permute.xlu1 %2289 }
 0x3e0   : > { %v2294_v49 = vadd.f32 %v2290_v52, %v2266_v48  ;;  %v2288_v33 = vpop.permute.xlu0 %2287 }
 0x3e1   : > { %v2293_v25 = vadd.f32 %v2288_v33, %v2265_v12  ;;  %v2758_v12 = vstv %s5329_s17  ;;  %v5380_v33 = vld [vmem:[%s3701_s24 + $0x58] sm:$0xff]  ;;  %s3361_s17 = sld [smem:[#allocation6 + $0x96]] }
 0x3e2   : > { %v5311_v27 = vadd.f32 %v2318_v50, %v2294_v49  ;;  %v2759_v59 = vmul.f32 %v5032_v26, %v2758_v12  ;;  %v2772_v49 = vstv %s5349_s13  ;;  %s3392_s13 = sld [smem:[#allocation7 + $0x5]] }
 0x3e4   : > { %2625 = vrot.lane.b32.xlu2 %v2620_v36, %s3584_s7  ;;  %v2389_v36 = vmul.f32 %v5165_v54, %v2388_v22  ;;  %v2774_v54 = vmul.f32 %v5380_v33, %v2772_v49 }
 0x3e5   : > { %2721 = vrot.lane.b32.xlu1 %v2717_v46, %s3583_s16 }
 0x3e6   : > { %2709 = vrot.lane.b32.xlu0 %v2704_v34, %s3583_s16  ;;  %v2344_v32 = vpop.permute.xlu2 %2343 }
 0x3e7   : > { %v2316_v44 = vpop.permute.xlu1 %2315 }
 0x3e8   : > { %v2321_v11 = vadd.f32 %v2316_v44, %v2293_v25  ;;  %v2304_v55 = vpop.permute.xlu0 %2303 }
 0x3e9   : > { %v2308_v15 = vadd.f32 %v2304_v55, %v2280_v43  ;;  %v2369_v43 = vmul.f32 %v5127_v18, %v2368_v53  ;;  %v2397_v18 = vmul.f32 %v5193_v47, %v2396_v19  ;;  %v2745_v55 = vmul.f32 %v5032_v26, %v2744_v58 }
 0x3ea   : > { %v2349_v28 = vadd.f32 %v2344_v32, %v2321_v11  ;;  %v2362_v32 = vmul.f32 %v2360_v8, %v5104_v41  ;;  %v2403_v41 = vmul.f32 %v5193_v47, %v2402_v6  ;;  %v2390_v53 = vmul.f32 %v5160_v0, %v2388_v22 }
 0x3eb   : > { %v2760_v58 = vmul.f32 %v5355_v57, %v2758_v12  ;;  %v2842_v22 = vstv %s5410_s8 }
 0x3ec   : > { %2707 = vrot.lane.b32.xlu2 %v2703_v42, %s3583_s16  ;;  %v2363_v4 = vadd.f32 %v2361_v38, %v2349_v28  ;;  %v2800_v38 = vstv %s5383_s30 }
 0x3ed   : > { %2737 = vrot.lane.b32.xlu1 %v2732_v40, %s3583_s16 }
 0x3ee   : > { %2735 = vrot.lane.b32.xlu0 %v2731_v2, %s3583_s16  ;;  %v2416_v60 = vpop.permute.xlu2 %2415  ;;  %v2377_v25 = vadd.f32 %v2375_v10, %v2363_v4  ;;  %v2773_v2 = vmul.f32 %v5047_v20, %v2772_v49  ;;  %v2843_v49 = vmul.f32 %v5008_v31, %v2842_v22 }
 0x3ef   : > { %v2332_v51 = vpop.permute.xlu1 %2331 }
 0x3f0   : > { %v2336_v37 = vadd.f32 %v2332_v51, %v2308_v15  ;;  %v2330_v24 = vpop.permute.xlu0 %2329  ;;  %v2376_v15 = vmul.f32 %v5135_v61, %v2374_v21 }
 0x3f1   : > { %v2335_v1 = vadd.f32 %v2330_v24, %v5297_v17  ;;  %v2398_v17 = vmul.f32 %v5221_v35, %v2396_v19  ;;  %v2801_v24 = vmul.f32 %v2800_v38, %v5000_v7  ;;  %v2814_v19 = vstv %s3384_s27 }
 0x3f2   : > { %v2358_v5 = vadd.f32 %v2356_v13, %v2336_v37  ;;  %v2391_v13 = vadd.f32 %v2389_v36, %v2377_v25 }
 0x3f3   : > { %v2357_v48 = vadd.f32 %v2355_v29, %v2335_v1 }
 0x3f4   : > { %v2372_v50 = vadd.f32 %v2370_v16, %v2358_v5  ;;  %2723 = vrot.lane.b32.xlu2 %v2718_v39, %s3583_s16  ;;  %v2405_v29 = vadd.f32 %v2403_v41, %v2391_v13  ;;  %v2788_v39 = vmul.f32 %v5380_v33, %v2786_v3  ;;  %v2787_v5 = vmul.f32 %v5047_v20, %v2786_v3 }
 0x3f5   : > { %v2371_v63 = vadd.f32 %v2369_v43, %v2357_v48  ;;  %2763 = vrot.lane.b32.xlu1 %v2759_v59, %s3583_s16  ;;  %v2815_v48 = vmul.f32 %v2814_v19, %v5000_v7 }
 0x3f6   : > { %v2386_v52 = vadd.f32 %v2384_v45, %v2372_v50  ;;  %2751 = vrot.lane.b32.xlu0 %v2746_v14, %s3583_s16  ;;  %v2442_v56 = vpop.permute.xlu2 %2441  ;;  %v2816_v14 = vmul.f32 %v2814_v19, %v5289_v23 }
 0x3f7   : > { %v2414_v46 = vpop.permute.xlu1 %2413  ;;  %v2385_v34 = vadd.f32 %v2383_v62, %v2371_v63 }
 0x3f8   : > { %v2400_v44 = vadd.f32 %v2398_v17, %v2386_v52  ;;  %v2346_v11 = vpop.permute.xlu0 %2345  ;;  %v2828_v17 = vstv %s5412_s21  ;;  %v2802_v52 = vmul.f32 %v2800_v38, %v5289_v23 }
 0x3f9   : > { %v2399_v42 = vadd.f32 %v2397_v18, %v2385_v34  ;;  %v2350_v40 = vadd.f32 %v2346_v11, %v5311_v27  ;;  %v2404_v27 = vmul.f32 %v5221_v35, %v2402_v6  ;;  %v2830_v7 = vmul.f32 %v5327_v9, %v2828_v17 }
 0x3fa   : > { %v2420_v28 = vadd.f32 %v2416_v60, %v2400_v44  ;;  %v2829_v44 = vmul.f32 %v5008_v31, %v2828_v17  ;;  %v2844_v31 = vmul.f32 %v5327_v9, %v2842_v22  ;;  %v3468_v17 = vld [vmem:[%s3701_s24 + $0x8] sm:$0xff] }
 0x3fb   : > { %v2419_v30 = vadd.f32 %v2414_v46, %v2399_v42  ;;  %v2364_v8 = vadd.f32 %v2362_v32, %v2350_v40  ;;  %v2856_v46 = vstv %s3387_s25 }
 0x3fc   : > { %2749 = vrot.lane.b32.xlu2 %v2745_v55, %s3583_s16  ;;  %v2858_v55 = vmul.f32 %v5355_v57, %v2856_v46 }
 0x3fd   : > { %v2378_v61 = vadd.f32 %v2376_v15, %v2364_v8  ;;  %v2447_v21 = vadd.f32 %v2442_v56, %v2419_v30  ;;  %2779 = vrot.lane.b32.xlu1 %v2774_v54, %s3583_s16  ;;  %v2857_v15 = vmul.f32 %v5032_v26, %v2856_v46 }
 0x3fe   : > { %2777 = vrot.lane.b32.xlu0 %v2773_v2, %s3583_s16  ;;  %v2458_v60 = vpop.permute.xlu2 %2457  ;;  %v2870_v2 = vstv %s5430_s22 }
 0x3ff   : > { %v2430_v47 = vpop.permute.xlu1 %2429  ;;  %v2392_v51 = vadd.f32 %v2390_v53, %v2378_v61  ;;  %v2872_v61 = vmul.f32 %v5355_v57, %v2870_v2 }
 0x400   : > { %v2428_v0 = vpop.permute.xlu0 %2427 }
 0x401   : > { %v2406_v16 = vadd.f32 %v2404_v27, %v2392_v51  ;;  %v2433_v37 = vadd.f32 %v2428_v0, %v2405_v29  ;;  %v2898_v27 = vstv %s3390_s10  ;;  %v2871_v51 = vmul.f32 %v5032_v26, %v2870_v2 }
 0x402   : > { %v2900_v3 = vmul.f32 %v5380_v33, %v2898_v27 }
 0x403   : > { %v2434_v35 = vadd.f32 %v2430_v47, %v2406_v16 }
 0x404   : > { %2765 = vrot.lane.b32.xlu2 %v2760_v58, %s3583_s16  ;;  %v2899_v58 = vmul.f32 %v5047_v20, %v2898_v27  ;;  %v2634_v27 = vstv %s3361_s17 }
 0x405   : > { %v2462_v43 = vadd.f32 %v2458_v60, %v2434_v35  ;;  %2805 = vrot.lane.b32.xlu1 %v2801_v24, %s3584_s7 }
 0x406   : > { %2793 = vrot.lane.b32.xlu0 %v2788_v39, %s3583_s16  ;;  %v2484_v1 = vpop.permute.xlu2 %2483 }
 0x407   : > { %v2456_v12 = vpop.permute.xlu1 %2455 }
 0x408   : > { %v2461_v59 = vadd.f32 %v2456_v12, %v2433_v37  ;;  %v2444_v10 = vpop.permute.xlu0 %2443 }
 0x409   : > { %v2448_v45 = vadd.f32 %v2444_v10, %v2420_v28 }
 0x40a   : > { %v2489_v4 = vadd.f32 %v2484_v1, %v2461_v59 }
 0x40c   : > { %2791 = vrot.lane.b32.xlu2 %v2787_v5, %s3583_s16  ;;  %s5428_s16 = sld [smem:[#allocation6 + $0xb3]] }
 0x40d   : > { %2821 = vrot.lane.b32.xlu1 %v2816_v14, %s3584_s7 }
 0x40e   : > { %2819 = vrot.lane.b32.xlu0 %v2815_v48, %s3584_s7  ;;  %v2500_v62 = vpop.permute.xlu2 %2499 }
 0x40f   : > { %v2472_v50 = vpop.permute.xlu1 %2471 }
 0x410   : > { %v2476_v63 = vadd.f32 %v2472_v50, %v2448_v45  ;;  %v2470_v18 = vpop.permute.xlu0 %2469  ;;  %v2640_v50 = vstv %s5456_s14 }
 0x411   : > { %v2475_v56 = vadd.f32 %v2470_v18, %v2447_v21 }
 0x412   : > { %v2504_v36 = vadd.f32 %v2500_v62, %v2476_v63  ;;  %v2884_v54 = vstv %s5428_s16  ;;  %v2641_v63 = vmul.f32 %v3468_v17, %v2640_v50 }
 0x413   : > { %v2885_v53 = vmul.f32 %v5047_v20, %v2884_v54  ;;  %v2886_v35 = vmul.f32 %v5380_v33, %v2884_v54 }
 0x414   : > { %2807 = vrot.lane.b32.xlu2 %v2802_v52, %s3584_s7  ;;  %v2654_v52 = vstv %s5458_s12 }
 0x415   : > { %2847 = vrot.lane.b32.xlu1 %v2843_v49, %s3584_s7  ;;  %v3469_v49 = vld [vmem:[%s3701_s24 + $0x20] sm:$0xff] }
 0x416   : > { %2835 = vrot.lane.b32.xlu0 %v2830_v7, %s3584_s7  ;;  %v2526_v25 = vpop.permute.xlu2 %2525 }
 0x417   : > { %v2498_v34 = vpop.permute.xlu1 %2497 }
 0x418   : > { %v2503_v32 = vadd.f32 %v2498_v34, %v2475_v56  ;;  %v2486_v6 = vpop.permute.xlu0 %2485 }
 0x419   : > { %v2490_v11 = vadd.f32 %v2486_v6, %v2462_v43 }
 0x41a   : > { %v2531_v42 = vadd.f32 %v2526_v25, %v2503_v32  ;;  %v3470_v32 = vld [vmem:[%s3701_s24 + $0x38] sm:$0xff] }
 0x41c   : > { %2833 = vrot.lane.b32.xlu2 %v2829_v44, %s3584_s7  ;;  %v2682_v44 = vstv %s5464_s15 }
 0x41d   : > { %2863 = vrot.lane.b32.xlu1 %v2858_v55, %s3584_s7  ;;  %v2683_v55 = vmul.f32 %v5047_v20, %v2682_v44 }
 0x41e   : > { %2861 = vrot.lane.b32.xlu0 %v2857_v15, %s3584_s7  ;;  %v2542_v40 = vpop.permute.xlu2 %2541 }
 0x41f   : > { %v2514_v28 = vpop.permute.xlu1 %2513 }
 0x420   : > { %v2518_v41 = vadd.f32 %v2514_v28, %v2490_v11  ;;  %v2512_v30 = vpop.permute.xlu0 %2511 }
 0x421   : > { %v2517_v8 = vadd.f32 %v2512_v30, %v2489_v4 }
 0x422   : > { %v2546_v13 = vadd.f32 %v2542_v40, %v2518_v41 }
 0x424   : > { %2849 = vrot.lane.b32.xlu2 %v2844_v31, %s3584_s7 }
 0x425   : > { %2889 = vrot.lane.b32.xlu1 %v2885_v53, %s3584_s7 }
 0x426   : > { %2877 = vrot.lane.b32.xlu0 %v2872_v61, %s3584_s7  ;;  %v2568_v21 = vpop.permute.xlu2 %2567 }
 0x427   : > { %v2540_v60 = vpop.permute.xlu1 %2539 }
 0x428   : > { %v2545_v38 = vadd.f32 %v2540_v60, %v2517_v8  ;;  %v2528_v47 = vpop.permute.xlu0 %2527  ;;  %v2636_v60 = vmul.f32 %v2634_v27, %v5289_v23 }
 0x429   : > { %v2532_v29 = vadd.f32 %v2528_v47, %v2504_v36  ;;  %v2655_v36 = vmul.f32 %v3469_v49, %v2654_v52 }
 0x42a   : > { %v2573_v0 = vadd.f32 %v2568_v21, %v2545_v38 }
 0x42c   : > { %2875 = vrot.lane.b32.xlu2 %v2871_v51, %s3584_s7  ;;  %v2648_v51 = vstv %s3365_s18 }
 0x42d   : > { %2905 = vrot.lane.b32.xlu1 %v2900_v3, %s3584_s7  ;;  %v2650_v3 = vmul.f32 %v5327_v9, %v2648_v51 }
 0x42e   : > { %2903 = vrot.lane.b32.xlu0 %v2899_v58, %s3584_s7  ;;  %v2584_v16 = vpop.permute.xlu2 %2583 }
 0x42f   : > { %v2556_v37 = vpop.permute.xlu1 %2555 }
 0x430   : > { %v2560_v24 = vadd.f32 %v2556_v37, %v2532_v29  ;;  %v2554_v39 = vpop.permute.xlu0 %2553  ;;  %v2635_v37 = vmul.f32 %v3468_v17, %v2634_v27  ;;  %v3471_v17 = vld [vmem:[%s3701_s24 + $0x50] sm:$0xff]  ;;  %s5505_s24 = sld [smem:[#allocation7 + $0x4]] }
 0x431   : > { %v2559_v43 = vadd.f32 %v2554_v39, %v2531_v42 }
 0x432   : > { %v2588_v26 = vadd.f32 %v2584_v16, %v2560_v24  ;;  %v2662_v16 = vstv %s3369_s29 }
 0x433   : > { %v2664_v39 = vmul.f32 %v5355_v57, %v2662_v16 }
 0x434   : > { %2891 = vrot.lane.b32.xlu2 %v2886_v35, %s3584_s7  ;;  %s5460_s7 = sld [smem:[#allocation6 + $0xcc]] }
 0x436   : > { %v2610_v1 = vpop.permute.xlu2 %2609 }
 0x437   : > { %v2582_v19 = vpop.permute.xlu1 %2581 }
 0x438   : > { %v2587_v12 = vadd.f32 %v2582_v19, %v2559_v43  ;;  %v2570_v59 = vpop.permute.xlu0 %2569  ;;  %v2676_v43 = vstv %s3373_s11  ;;  %v2649_v19 = vmul.f32 %v3469_v49, %v2648_v51 }
 0x439   : > { %v2574_v10 = vadd.f32 %v2570_v59, %v2546_v13 }
 0x43a   : > { %v5454_v5 = vadd.f32 %v2610_v1, %v2587_v12  ;;  %v2668_v46 = vstv %s5460_s7  ;;  %v2678_v12 = vmul.f32 %v5380_v33, %v2676_v43 }
 0x43b   : > { %v2669_v6 = vmul.f32 %v3470_v32, %v2668_v46 }
 0x43e   : > { %v2626_v45 = vpop.permute.xlu2 %2625 }
 0x43f   : > { %v2598_v14 = vpop.permute.xlu1 %2597 }
 0x440   : > { %v2602_v4 = vadd.f32 %v2598_v14, %v2574_v10  ;;  %v2596_v48 = vpop.permute.xlu0 %2595  ;;  %v2642_v14 = vmul.f32 %v2640_v50, %v5289_v23  ;;  %v2670_v23 = vmul.f32 %v5355_v57, %v2668_v46 }
 0x441   : > { %v2601_v62 = vadd.f32 %v2596_v48, %v2573_v0  ;;  %v2663_v48 = vmul.f32 %v3470_v32, %v2662_v16 }
 0x442   : > { %v5462_v22 = vadd.f32 %v2626_v45, %v2602_v4 }
 0x444   : > { %v2644_v49 = vadd.f32 %v2642_v14, %v5462_v22 }
 0x446   : > { %v2708_v18 = vpop.permute.xlu2 %2707 }
 0x447   : > { %v2624_v56 = vpop.permute.xlu1 %2623 }
 0x448   : > { %v2629_v7 = vadd.f32 %v2624_v56, %v2601_v62  ;;  %v2612_v25 = vpop.permute.xlu0 %2611  ;;  %v2656_v56 = vmul.f32 %v5327_v9, %v2654_v52  ;;  %v2684_v9 = vmul.f32 %v5380_v33, %v2682_v44  ;;  %v2912_v44 = vstv %s5505_s24 }
 0x449   : > { %v2616_v38 = vadd.f32 %v2612_v25, %v2588_v26  ;;  %v2637_v26 = vadd.f32 %v2635_v37, %v5454_v5 }
 0x44a   : > { %v2643_v34 = vadd.f32 %v2641_v63, %v2629_v7  ;;  %v2677_v63 = vmul.f32 %v3471_v17, %v2676_v43  ;;  %v2658_v25 = vadd.f32 %v2656_v56, %v2644_v49 }
 0x44b   : > { %v2638_v0 = vadd.f32 %v2636_v60, %v2616_v38  ;;  %v2651_v45 = vadd.f32 %v2649_v19, %v2637_v26 }
 0x44c   : > { %v2657_v11 = vadd.f32 %v2655_v36, %v2643_v34 }
 0x44d   : > { %v2652_v24 = vadd.f32 %v2650_v3, %v2638_v0  ;;  %v2665_v36 = vadd.f32 %v2663_v48, %v2651_v45  ;;  %v2920_v45 = vstv %s3392_s13 }
 0x44e   : > { %v2671_v42 = vadd.f32 %v2669_v6, %v2657_v11  ;;  %v2724_v15 = vpop.permute.xlu2 %2723 }
 0x44f   : > { %v2696_v40 = vpop.permute.xlu1 %2695  ;;  %v2666_v59 = vadd.f32 %v2664_v39, %v2652_v24  ;;  %v2679_v34 = vadd.f32 %v2677_v63, %v2665_v36 }
 0x450   : > { %v2685_v54 = vadd.f32 %v2683_v55, %v2671_v42  ;;  %v2694_v28 = vpop.permute.xlu0 %2693 }
 0x451   : > { %v2680_v4 = vadd.f32 %v2678_v12, %v2666_v59  ;;  %v2699_v50 = vadd.f32 %v2694_v28, %v2679_v34 }
 0x452   : > { %v5478_v2 = vadd.f32 %v2708_v18, %v2685_v54  ;;  %v2672_v54 = vadd.f32 %v2670_v23, %v2658_v25 }
 0x453   : > { %v2700_v5 = vadd.f32 %v2696_v40, %v2680_v4 }
 0x454   : > { %v2686_v40 = vadd.f32 %v2684_v9, %v2672_v54 }
 0x455   : > { %v2728_v6 = vadd.f32 %v2724_v15, %v2700_v5 }
 0x456   : > { %v2750_v41 = vpop.permute.xlu2 %2749 }
 0x457   : > { %v2722_v30 = vpop.permute.xlu1 %2721 }
 0x458   : > { %v2710_v31 = vpop.permute.xlu0 %2709  ;;  %v2727_v42 = vadd.f32 %v2722_v30, %v2699_v50 }
 0x459   : > { %v2714_v60 = vadd.f32 %v2710_v31, %v2686_v40 }
 0x45a   : > { %v2755_v27 = vadd.f32 %v2750_v41, %v2727_v42 }
 0x45e   : > { %v5480_v8 = vpop.permute.xlu2 %2765 }
 0x45f   : > { %v5482_v53 = vpop.permute.xlu1 %2737 }
 0x460   : > { %v5484_v13 = vpop.permute.xlu0 %2735 }
 0x461   : > { %v2741_v33 = vadd.f32 %v5484_v13, %v5478_v2 }
 0x466   : > { %v5486_v61 = vpop.permute.xlu2 %2791 }
 0x467   : > { %v5488_v20 = vpop.permute.xlu1 %2763 }
 0x468   : > { %v2752_v21 = vpop.permute.xlu0 %2751  ;;  %v2769_v0 = vadd.f32 %v5488_v20, %v2741_v33 }
 0x469   : > { %v2756_v32 = vadd.f32 %v2752_v21, %v2728_v6  ;;  %v2742_v21 = vadd.f32 %v5482_v53, %v2714_v60 }
 0x46a   : > { %v2797_v53 = vadd.f32 %v5486_v61, %v2769_v0 }
 0x46b   : > { %v2770_v41 = vadd.f32 %v5480_v8, %v2742_v21 }
 0x46e   : > { %v2808_v47 = vpop.permute.xlu2 %2807 }
 0x46f   : > { %v2780_v29 = vpop.permute.xlu1 %2779 }
 0x470   : > { %v2778_v58 = vpop.permute.xlu0 %2777  ;;  %v2784_v52 = vadd.f32 %v2780_v29, %v2756_v32 }
 0x471   : > { %v2783_v38 = vadd.f32 %v2778_v58, %v2755_v27 }
 0x472   : > { %v2812_v15 = vadd.f32 %v2808_v47, %v2784_v52 }
 0x476   : > { %v2834_v35 = vpop.permute.xlu2 %2833 }
 0x477   : > { %v2806_v1 = vpop.permute.xlu1 %2805 }
 0x478   : > { %v2794_v10 = vpop.permute.xlu0 %2793  ;;  %v2811_v30 = vadd.f32 %v2806_v1, %v2783_v38 }
 0x479   : > { %v2798_v58 = vadd.f32 %v2794_v10, %v2770_v41 }
 0x47a   : > { %v2839_v31 = vadd.f32 %v2834_v35, %v2811_v30 }
 0x47e   : > { %v2850_v62 = vpop.permute.xlu2 %2849 }
 0x47f   : > { %v2822_v18 = vpop.permute.xlu1 %2821 }
 0x480   : > { %v2820_v7 = vpop.permute.xlu0 %2819  ;;  %v2826_v39 = vadd.f32 %v2822_v18, %v2798_v58 }
 0x481   : > { %v2825_v13 = vadd.f32 %v2820_v7, %v2797_v53 }
 0x482   : > { %v2854_v20 = vadd.f32 %v2850_v62, %v2826_v39 }
 0x486   : > { %v2876_v11 = vpop.permute.xlu2 %2875 }
 0x487   : > { %v2848_v55 = vpop.permute.xlu1 %2847 }
 0x488   : > { %v2836_v22 = vpop.permute.xlu0 %2835  ;;  %v2853_v8 = vadd.f32 %v2848_v55, %v2825_v13 }
 0x489   : > { %v2840_v57 = vadd.f32 %v2836_v22, %v2812_v15 }
 0x48a   : > { %v2881_v10 = vadd.f32 %v2876_v11, %v2853_v8 }
 0x48e   : > { %v2892_v28 = vpop.permute.xlu2 %2891 }
 0x48f   : > { %v2864_v46 = vpop.permute.xlu1 %2863 }
 0x490   : > { %v2868_v51 = vadd.f32 %v2864_v46, %v2840_v57  ;;  %v2862_v3 = vpop.permute.xlu0 %2861 }
 0x491   : > { %v2867_v16 = vadd.f32 %v2862_v3, %v2839_v31 }
 0x492   : > { %v2896_v29 = vadd.f32 %v2892_v28, %v2868_v51 }
 0x494   : > { %v2914_v47 = vadd.f32 %v2912_v44, %v2896_v29 }
 0x496   : > { %v2916_v37 = vmax.f32 %v2914_v47, 0.0 }
 0x497   : > { %v2890_v24 = vpop.permute.xlu1 %2889 }
 0x498   : > { %v2918_v43 = vpack.c.bf16 %v2916_v37, %v2916_v37  ;;  %v2895_v1 = vadd.f32 %v2890_v24, %v2867_v16  ;;  %v2878_v2 = vpop.permute.xlu0 %2877 }
 0x499   : > { %v2882_v59 = vadd.f32 %v2878_v2, %v2854_v20 }
 0x49a   : > { %v2930_v19 = vunpack.c.l.b16 %v2918_v43  ;;  %v2913_v26 = vadd.f32 %v2912_v44, %v2895_v1 }
 0x49c   : > { %v2936_v35 = vpack.c.b16 %v2930_v19, %v2930_v19  ;;  %v2915_v12 = vmax.f32 %v2913_v26, 0.0 }
 0x49e   : > { %2944 = vst.msk [vmem:[%s298_s6 + $0x4] sm:$0xf] %vm1182_vm0, %v2936_v35  ;;  %v2917_v61 = vpack.c.bf16 %v2915_v12, %v2915_v12 }
 0x49f   : > { %v2906_v14 = vpop.permute.xlu1 %2905 }
 0x4a0   : > { %v2929_v4 = vunpack.c.l.b16 %v2917_v61  ;;  %v2910_v48 = vadd.f32 %v2906_v14, %v2882_v59  ;;  %v2904_v17 = vpop.permute.xlu0 %2903 }
 0x4a1   : > { %v2909_v63 = vadd.f32 %v2904_v17, %v2881_v10 }
 0x4a2   : > { %v2935_v18 = vpack.c.b16 %v2929_v4, %v2929_v4  ;;  %v2922_v56 = vadd.f32 %v2920_v45, %v2910_v48 }
 0x4a3   : > { %v2921_v49 = vadd.f32 %v2920_v45, %v2909_v63 }
 0x4a4   : > { %2943 = vst.msk [vmem:[%s298_s6] sm:$0xf] %vm1182_vm0, %v2935_v18  ;;  %v2924_v5 = vmax.f32 %v2922_v56, 0.0 }
 0x4a5   : > { %v2923_v62 = vmax.f32 %v2921_v49, 0.0 }
 0x4a6   : > { %v2926_v36 = vpack.c.bf16 %v2924_v5, %v2924_v5 }
 0x4a7   : > { %v2925_v7 = vpack.c.bf16 %v2923_v62, %v2923_v62 }
 0x4a8   : > { %v2934_v25 = vunpack.c.l.b16 %v2926_v36 }
 0x4a9   : > { %v2933_v34 = vunpack.c.l.b16 %v2925_v7 }
 0x4aa   : > { %v2938_v6 = vpack.c.b16 %v2934_v25, %v2934_v25 }
 0x4ab   : > { %v2937_v23 = vpack.c.b16 %v2933_v34, %v2933_v34 }
 0x4ac   : > { %2946 = vst.msk [vmem:[%s298_s6 + $0xc] sm:$0xf] %vm1182_vm0, %v2938_v6 }
 0x4ad   : > { %2945 = vst.msk [vmem:[%s298_s6 + $0x8] sm:$0xf] %vm1182_vm0, %v2937_v23 }
 0x4ae PF: > { %p18_p8 = scmp.ge.s32.totalorder %s3637_s23, 4   ;;  %s5685_s18 = smov %s3566_s19 }
 0x4af   : > { %s5686_s19 = smov %s3570_s20  ;;  %s5687_s20 = smov %s3647_s26 }
 0x4b0   : > { %s5688_s21 = smov %s3637_s23  ;;  %20 = sbr.rel (!%p18_p8) target bundleno = 5 (0x5), region = 109 }
 0x4b5   :  { %3000 = vsyncpa [#allocation3], 1 }
 0x4b6   :  { %3002 = vsyncpa [#allocation3 + $0x1], 1 }
 0x4b7   :  { %3003 = vsyncpa [#allocation4], 1 }
 0x4b8   :  { %3005 = vsyncpa [#allocation4 + $0x1], 1 }
 0x4b9   :  { %3006 = vsyncpa [#allocation5], 1 }
 0x4ba   :  { %3008 = vsyncpa [#allocation5 + $0x1], 1 }

</bundles_post_ra>
